<compile_context>
chip_gen: v7x
topology: tpu7x:2x2x1
jax: 0.10.0
libtpu: 0.0.40
codegen_flags: <defaults>
</compile_context>

<pallas_src>
import jax
import jax.numpy as jnp
from jax import lax
from jax.experimental import pallas as pl
from jax.experimental.pallas import tpu as pltpu

KH, KW = 5, 5
PAD = 2
EPS = 1e-5
C_BLK = 128


def _dwconv_bn_kernel(x_ref, w_ref, gamma_ref, beta_ref, o_ref, xs_ref):
    """One 128-channel block of depthwise 5x5 conv + training-mode BN.

    x_ref     : (N, H, W, CB)              input block (f32)
    w_ref     : (KH*KW, CB)                depthwise taps, row k = (kh, kw)
    gamma_ref : (1, CB)
    beta_ref  : (1, CB)
    o_ref     : (N, H, W, CB)
    xs_ref    : (KW*N, H + 2*PAD, W, CB)   f32 scratch.  Slab kw holds the
                input padded by PAD rows top/bottom and shifted by (kw - PAD)
                along W with zero fill, so every tap is a pure H offset.
    """
    N, H, W, CB = x_ref.shape

    x_blk = x_ref[...].astype(jnp.float32)                      # (N, H, W, CB)

    # ---- zero only the H-padding rows of every slab (aligned, tiny) ---------
    zrows = jnp.zeros((KW * N, PAD, W, CB), jnp.float32)
    xs_ref[:, :PAD, :, :] = zrows
    xs_ref[:, PAD + H:, :, :] = zrows

    # ---- build KW column-pre-shifted copies; stores are full-width/aligned --
    for kw in range(KW):
        s = kw - PAD                                            # column shift
        if s > 0:
            shifted = jnp.concatenate(
                [x_blk[:, :, s:, :],
                 jnp.zeros((N, H, s, CB), jnp.float32)], axis=2)
        elif s < 0:
            shifted = jnp.concatenate(
                [jnp.zeros((N, H, -s, CB), jnp.float32),
                 x_blk[:, :, :W + s, :]], axis=2)
        else:
            shifted = x_blk
        xs_ref[kw * N:(kw + 1) * N, PAD:PAD + H, :, :] = shifted

    # ---- depthwise 5x5 conv: every tap read is a major-axis (H) offset ------
    wts = w_ref[...]                                            # (KH*KW, CB)
    acc = jnp.zeros((N, H, W, CB), jnp.float32)
    for kh in range(KH):
        for kw in range(KW):
            tap = xs_ref[kw * N:(kw + 1) * N, kh:kh + H, :, :]  # (N,H,W,CB)
            k = kh * KW + kw
            wk = wts[k:k + 1, :].reshape(1, 1, 1, CB)
            acc = acc + tap * wk

    # ---- BatchNorm2d (biased batch variance, eps inside rsqrt, affine) ------
    cnt = jnp.float32(N * H * W)
    mean = jnp.sum(acc, axis=(0, 1, 2), keepdims=True) / cnt
    diff = acc - mean
    var = jnp.sum(diff * diff, axis=(0, 1, 2), keepdims=True) / cnt
    scale = gamma_ref[...].reshape(1, 1, 1, CB) * lax.rsqrt(var + EPS)
    shift = beta_ref[...].reshape(1, 1, 1, CB) - mean * scale
    o_ref[...] = (acc * scale + shift).astype(o_ref.dtype)


def dwconv_bn_nhwc(x_nhwc, w, gamma, beta, *, c_blk=C_BLK):
    """x_nhwc: (N, H, W, C) f32; w: (C, 1, KH, KW) (PyTorch depthwise layout);
    gamma, beta: (C,).  Returns (N, H, W, C) f32."""
    N, H, W, C = x_nhwc.shape
    assert w.shape == (C, 1, KH, KW)

    # Pad the channel axis to a multiple of the lane block; padded lanes are
    # fully independent (w/gamma/beta = 0 -> output 0) and sliced off at end.
    c_pad = ((C + c_blk - 1) // c_blk) * c_blk
    if c_pad != C:
        x_nhwc = jnp.pad(x_nhwc, ((0, 0), (0, 0), (0, 0), (0, c_pad - C)))
        w = jnp.pad(w, ((0, c_pad - C), (0, 0), (0, 0), (0, 0)))
        gamma = jnp.pad(gamma, (0, c_pad - C))
        beta = jnp.pad(beta, (0, c_pad - C))

    # (C,1,KH,KW) -> (KH*KW, C): tap-major rows, channels on lanes (tiny array).
    w2d = jnp.transpose(w.reshape(c_pad, KH * KW), (1, 0)).astype(jnp.float32)
    gamma2d = gamma.reshape(1, c_pad).astype(jnp.float32)
    beta2d = beta.reshape(1, c_pad).astype(jnp.float32)

    n_blocks = c_pad // c_blk

    out = pl.pallas_call(
        _dwconv_bn_kernel,
        out_shape=jax.ShapeDtypeStruct((N, H, W, c_pad), jnp.float32),
        grid_spec=pltpu.PrefetchScalarGridSpec(
            num_scalar_prefetch=0,
            grid=(n_blocks,),
            in_specs=[
                pl.BlockSpec((N, H, W, c_blk), lambda c: (0, 0, 0, c)),
                pl.BlockSpec((KH * KW, c_blk), lambda c: (0, c)),
                pl.BlockSpec((1, c_blk), lambda c: (0, c)),
                pl.BlockSpec((1, c_blk), lambda c: (0, c)),
            ],
            out_specs=pl.BlockSpec((N, H, W, c_blk), lambda c: (0, 0, 0, c)),
            scratch_shapes=[
                pltpu.VMEM((KW * N, H + 2 * PAD, W, c_blk), jnp.float32),
            ],
        ),
        compiler_params=pltpu.CompilerParams(
            dimension_semantics=("parallel",),
            vmem_limit_bytes=32 * 1024 * 1024,
        ),
    )(x_nhwc.astype(jnp.float32), w2d, gamma2d, beta2d)

    if c_pad != C:
        out = out[..., :C]
    return out


def dwconv_bn_nchw(x_nchw, w, gamma, beta):
    """PyTorch-layout adapter (NCHW in/out).  Prefer dwconv_bn_nhwc and keep
    the surrounding model in NHWC: these two transposes are full HBM round
    trips that cost more than the kernel itself at this size."""
    x_nhwc = jnp.transpose(x_nchw, (0, 2, 3, 1))
    out_nhwc = dwconv_bn_nhwc(x_nhwc, w, gamma, beta)
    return jnp.transpose(out_nhwc, (0, 3, 1, 2))


def _reference_nhwc(x_nhwc, w, gamma, beta):
    """Pure-JAX reference (depthwise conv + training-mode BN) in NHWC."""
    C = x_nhwc.shape[-1]
    w_hwio = jnp.transpose(w[:, 0, :, :], (1, 2, 0))[:, :, None, :]  # (KH,KW,1,C)
    y = lax.conv_general_dilated(
        x_nhwc, w_hwio, window_strides=(1, 1),
        padding=((PAD, PAD), (PAD, PAD)),
        dimension_numbers=("NHWC", "HWIO", "NHWC"),
        feature_group_count=C, precision=lax.Precision.HIGHEST)
    mean = jnp.mean(y, axis=(0, 1, 2), keepdims=True)
    var = jnp.mean((y - mean) ** 2, axis=(0, 1, 2), keepdims=True)
    return (y - mean) * lax.rsqrt(var + EPS) * gamma + beta


if __name__ == "__main__":
    # Module shapes: x198 = (1, 720, 14, 14) NCHW  ->  NHWC (1, 14, 14, 720).
    # 720 is not a multiple of 128, so this also exercises the channel-padding
    # path (720 -> 768, 6 lane blocks) and per-block BN statistics.
    N, C, H, W = 1, 720, 14, 14

    key = jax.random.PRNGKey(0)
    kx, kw_, kg, kb = jax.random.split(key, 4)

    x_nhwc = jax.random.normal(kx, (N, H, W, C), dtype=jnp.float32)
    fan_in = KH * KW
    bound = 1.0 / float(fan_in) ** 0.5
    w = jax.random.uniform(kw_, (C, 1, KH, KW), dtype=jnp.float32,
                           minval=-bound, maxval=bound)
    gamma = jnp.ones((C,), jnp.float32) + 0.01 * jax.random.normal(kg, (C,), jnp.float32)
    beta = 0.01 * jax.random.normal(kb, (C,), jnp.float32)

    out = dwconv_bn_nhwc(x_nhwc, w, gamma, beta)
    out = jax.block_until_ready(out)

    assert out.shape == (N, H, W, C)
    assert out.dtype == jnp.float32

    ref = jax.block_until_ready(_reference_nhwc(x_nhwc, w, gamma, beta))
    max_err = float(jnp.max(jnp.abs(out - ref)))
    assert max_err < 1e-3, f"mismatch vs reference: max abs err {max_err}"

    print("KERNEL_OK")
</pallas_src>

<mosaic_0001>
module attributes {stable_mosaic.version = 11 : i64} {
  func.func @_dwconv_bn_kernel(%arg0: i32, %arg1: memref<1x14x14x128xf32, #tpu.memory_space<vmem>>, %arg2: memref<25x128xf32, #tpu.memory_space<vmem>>, %arg3: memref<1x128xf32, #tpu.memory_space<vmem>>, %arg4: memref<1x128xf32, #tpu.memory_space<vmem>>, %arg5: memref<1x14x14x128xf32, #tpu.memory_space<vmem>>, %arg6: memref<5x18x14x128xf32, #tpu.memory_space<vmem>>) attributes {dimension_semantics = [#tpu.dimension_semantics<parallel>], iteration_bounds = array<i64: 6>, scalar_prefetch = 0 : i64, scratch_operands = 1 : i64, tpu.core_type = #tpu.core_type<tc>, window_params = [{transform_indices = @transform_0, window_bounds = array<i64: 1, 14, 14, 128>}, {transform_indices = @transform_1, window_bounds = array<i64: 25, 128>}, {transform_indices = @transform_2, window_bounds = array<i64: 1, 128>}, {transform_indices = @transform_3, window_bounds = array<i64: 1, 128>}, {transform_indices = @transform_4, window_bounds = array<i64: 1, 14, 14, 128>}]} {
    %c0 = arith.constant 0 : index
    %c0_0 = arith.constant 0 : index
    %c0_1 = arith.constant 0 : index
    %c0_2 = arith.constant 0 : index
    %0 = vector.load %arg1[%c0, %c0_0, %c0_1, %c0_2] : memref<1x14x14x128xf32, #tpu.memory_space<vmem>>, vector<1x14x14x128xf32>
    %cst = arith.constant 0.000000e+00 : f32
    %1 = vector.broadcast %cst : f32 to vector<5x2x14x128xf32>
    %c0_3 = arith.constant 0 : index
    %c0_4 = arith.constant 0 : index
    %c0_5 = arith.constant 0 : index
    %c0_6 = arith.constant 0 : index
    %2 = vector.load %arg6[%c0_3, %c0_4, %c0_5, %c0_6] : memref<5x18x14x128xf32, #tpu.memory_space<vmem>>, vector<5x2x14x128xf32>
    tpu.vector_store %arg6[%c0_3, %c0_4, %c0_5, %c0_6], %1 {strides = array<i32>} : memref<5x18x14x128xf32, #tpu.memory_space<vmem>>, vector<5x2x14x128xf32>,
    %c0_7 = arith.constant 0 : index
    %c16 = arith.constant 16 : index
    %c0_8 = arith.constant 0 : index
    %c0_9 = arith.constant 0 : index
    %3 = vector.load %arg6[%c0_7, %c16, %c0_8, %c0_9] : memref<5x18x14x128xf32, #tpu.memory_space<vmem>>, vector<5x2x14x128xf32>
    tpu.vector_store %arg6[%c0_7, %c16, %c0_8, %c0_9], %1 {strides = array<i32>} : memref<5x18x14x128xf32, #tpu.memory_space<vmem>>, vector<5x2x14x128xf32>,
    %cst_10 = arith.constant 0.000000e+00 : f32
    %4 = vector.broadcast %cst_10 : f32 to vector<1x14x2x128xf32>
    %5 = vector.extract_strided_slice %0 {offsets = [0, 0, 0, 0], sizes = [1, 14, 12, 128], strides = [1, 1, 1, 1]} : vector<1x14x14x128xf32> to vector<1x14x12x128xf32>
    %6 = tpu.concatenate %4, %5 in 2 : vector<1x14x2x128xf32>, vector<1x14x12x128xf32> -> vector<1x14x14x128xf32>
    %c0_11 = arith.constant 0 : index
    %c2 = arith.constant 2 : index
    %c0_12 = arith.constant 0 : index
    %c0_13 = arith.constant 0 : index
    %7 = vector.load %arg6[%c0_11, %c2, %c0_12, %c0_13] : memref<5x18x14x128xf32, #tpu.memory_space<vmem>>, vector<1x14x14x128xf32>
    tpu.vector_store %arg6[%c0_11, %c2, %c0_12, %c0_13], %6 {strides = array<i32>} : memref<5x18x14x128xf32, #tpu.memory_space<vmem>>, vector<1x14x14x128xf32>,
    %cst_14 = arith.constant 0.000000e+00 : f32
    %8 = vector.broadcast %cst_14 : f32 to vector<1x14x1x128xf32>
    %9 = vector.extract_strided_slice %0 {offsets = [0, 0, 0, 0], sizes = [1, 14, 13, 128], strides = [1, 1, 1, 1]} : vector<1x14x14x128xf32> to vector<1x14x13x128xf32>
    %10 = tpu.concatenate %8, %9 in 2 : vector<1x14x1x128xf32>, vector<1x14x13x128xf32> -> vector<1x14x14x128xf32>
    %c1 = arith.constant 1 : index
    %c2_15 = arith.constant 2 : index
    %c0_16 = arith.constant 0 : index
    %c0_17 = arith.constant 0 : index
    %11 = vector.load %arg6[%c1, %c2_15, %c0_16, %c0_17] : memref<5x18x14x128xf32, #tpu.memory_space<vmem>>, vector<1x14x14x128xf32>
    tpu.vector_store %arg6[%c1, %c2_15, %c0_16, %c0_17], %10 {strides = array<i32>} : memref<5x18x14x128xf32, #tpu.memory_space<vmem>>, vector<1x14x14x128xf32>,
    %c2_18 = arith.constant 2 : index
    %c2_19 = arith.constant 2 : index
    %c0_20 = arith.constant 0 : index
    %c0_21 = arith.constant 0 : index
    %12 = vector.load %arg6[%c2_18, %c2_19, %c0_20, %c0_21] : memref<5x18x14x128xf32, #tpu.memory_space<vmem>>, vector<1x14x14x128xf32>
    tpu.vector_store %arg6[%c2_18, %c2_19, %c0_20, %c0_21], %0 {strides = array<i32>} : memref<5x18x14x128xf32, #tpu.memory_space<vmem>>, vector<1x14x14x128xf32>,
    %13 = vector.extract_strided_slice %0 {offsets = [0, 0, 1, 0], sizes = [1, 14, 13, 128], strides = [1, 1, 1, 1]} : vector<1x14x14x128xf32> to vector<1x14x13x128xf32>
    %cst_22 = arith.constant 0.000000e+00 : f32
    %14 = vector.broadcast %cst_22 : f32 to vector<1x14x1x128xf32>
    %15 = tpu.concatenate %13, %14 in 2 : vector<1x14x13x128xf32>, vector<1x14x1x128xf32> -> vector<1x14x14x128xf32>
    %c3 = arith.constant 3 : index
    %c2_23 = arith.constant 2 : index
    %c0_24 = arith.constant 0 : index
    %c0_25 = arith.constant 0 : index
    %16 = vector.load %arg6[%c3, %c2_23, %c0_24, %c0_25] : memref<5x18x14x128xf32, #tpu.memory_space<vmem>>, vector<1x14x14x128xf32>
    tpu.vector_store %arg6[%c3, %c2_23, %c0_24, %c0_25], %15 {strides = array<i32>} : memref<5x18x14x128xf32, #tpu.memory_space<vmem>>, vector<1x14x14x128xf32>,
    %17 = vector.extract_strided_slice %0 {offsets = [0, 0, 2, 0], sizes = [1, 14, 12, 128], strides = [1, 1, 1, 1]} : vector<1x14x14x128xf32> to vector<1x14x12x128xf32>
    %cst_26 = arith.constant 0.000000e+00 : f32
    %18 = vector.broadcast %cst_26 : f32 to vector<1x14x2x128xf32>
    %19 = tpu.concatenate %17, %18 in 2 : vector<1x14x12x128xf32>, vector<1x14x2x128xf32> -> vector<1x14x14x128xf32>
    %c4 = arith.constant 4 : index
    %c2_27 = arith.constant 2 : index
    %c0_28 = arith.constant 0 : index
    %c0_29 = arith.constant 0 : index
    %20 = vector.load %arg6[%c4, %c2_27, %c0_28, %c0_29] : memref<5x18x14x128xf32, #tpu.memory_space<vmem>>, vector<1x14x14x128xf32>
    tpu.vector_store %arg6[%c4, %c2_27, %c0_28, %c0_29], %19 {strides = array<i32>} : memref<5x18x14x128xf32, #tpu.memory_space<vmem>>, vector<1x14x14x128xf32>,
    %c0_30 = arith.constant 0 : index
    %c0_31 = arith.constant 0 : index
    %21 = vector.load %arg2[%c0_30, %c0_31] : memref<25x128xf32, #tpu.memory_space<vmem>>, vector<25x128xf32>
    %cst_32 = arith.constant 0.000000e+00 : f32
    %22 = vector.broadcast %cst_32 : f32 to vector<1x14x14x128xf32>
    %c0_33 = arith.constant 0 : index
    %c0_34 = arith.constant 0 : index
    %c0_35 = arith.constant 0 : index
    %c0_36 = arith.constant 0 : index
    %23 = vector.load %arg6[%c0_33, %c0_34, %c0_35, %c0_36] : memref<5x18x14x128xf32, #tpu.memory_space<vmem>>, vector<1x14x14x128xf32>
    %24 = vector.extract_strided_slice %21 {offsets = [0, 0], sizes = [1, 128], strides = [1, 1]} : vector<25x128xf32> to vector<1x128xf32>
    %25 = vector.shape_cast %24 : vector<1x128xf32> to vector<1x1x1x128xf32>
    %26 = vector.broadcast %25 : vector<1x1x1x128xf32> to vector<1x14x14x128xf32>
    %27 = arith.mulf %23, %26 : vector<1x14x14x128xf32>
    %28 = arith.addf %22, %27 : vector<1x14x14x128xf32>
    %c1_37 = arith.constant 1 : index
    %c0_38 = arith.constant 0 : index
    %c0_39 = arith.constant 0 : index
    %c0_40 = arith.constant 0 : index
    %29 = vector.load %arg6[%c1_37, %c0_38, %c0_39, %c0_40] : memref<5x18x14x128xf32, #tpu.memory_space<vmem>>, vector<1x14x14x128xf32>
    %30 = vector.extract_strided_slice %21 {offsets = [1, 0], sizes = [1, 128], strides = [1, 1]} : vector<25x128xf32> to vector<1x128xf32>
    %31 = vector.shape_cast %30 : vector<1x128xf32> to vector<1x1x1x128xf32>
    %32 = vector.broadcast %31 : vector<1x1x1x128xf32> to vector<1x14x14x128xf32>
    %33 = arith.mulf %29, %32 : vector<1x14x14x128xf32>
    %34 = arith.addf %28, %33 : vector<1x14x14x128xf32>
    %c2_41 = arith.constant 2 : index
    %c0_42 = arith.constant 0 : index
    %c0_43 = arith.constant 0 : index
    %c0_44 = arith.constant 0 : index
    %35 = vector.load %arg6[%c2_41, %c0_42, %c0_43, %c0_44] : memref<5x18x14x128xf32, #tpu.memory_space<vmem>>, vector<1x14x14x128xf32>
    %36 = vector.extract_strided_slice %21 {offsets = [2, 0], sizes = [1, 128], strides = [1, 1]} : vector<25x128xf32> to vector<1x128xf32>
    %37 = vector.shape_cast %36 : vector<1x128xf32> to vector<1x1x1x128xf32>
    %38 = vector.broadcast %37 : vector<1x1x1x128xf32> to vector<1x14x14x128xf32>
    %39 = arith.mulf %35, %38 : vector<1x14x14x128xf32>
    %40 = arith.addf %34, %39 : vector<1x14x14x128xf32>
    %c3_45 = arith.constant 3 : index
    %c0_46 = arith.constant 0 : index
    %c0_47 = arith.constant 0 : index
    %c0_48 = arith.constant 0 : index
    %41 = vector.load %arg6[%c3_45, %c0_46, %c0_47, %c0_48] : memref<5x18x14x128xf32, #tpu.memory_space<vmem>>, vector<1x14x14x128xf32>
    %42 = vector.extract_strided_slice %21 {offsets = [3, 0], sizes = [1, 128], strides = [1, 1]} : vector<25x128xf32> to vector<1x128xf32>
    %43 = vector.shape_cast %42 : vector<1x128xf32> to vector<1x1x1x128xf32>
    %44 = vector.broadcast %43 : vector<1x1x1x128xf32> to vector<1x14x14x128xf32>
    %45 = arith.mulf %41, %44 : vector<1x14x14x128xf32>
    %46 = arith.addf %40, %45 : vector<1x14x14x128xf32>
    %c4_49 = arith.constant 4 : index
    %c0_50 = arith.constant 0 : index
    %c0_51 = arith.constant 0 : index
    %c0_52 = arith.constant 0 : index
    %47 = vector.load %arg6[%c4_49, %c0_50, %c0_51, %c0_52] : memref<5x18x14x128xf32, #tpu.memory_space<vmem>>, vector<1x14x14x128xf32>
    %48 = vector.extract_strided_slice %21 {offsets = [4, 0], sizes = [1, 128], strides = [1, 1]} : vector<25x128xf32> to vector<1x128xf32>
    %49 = vector.shape_cast %48 : vector<1x128xf32> to vector<1x1x1x128xf32>
    %50 = vector.broadcast %49 : vector<1x1x1x128xf32> to vector<1x14x14x128xf32>
    %51 = arith.mulf %47, %50 : vector<1x14x14x128xf32>
    %52 = arith.addf %46, %51 : vector<1x14x14x128xf32>
    %c0_53 = arith.constant 0 : index
    %c1_54 = arith.constant 1 : index
    %c0_55 = arith.constant 0 : index
    %c0_56 = arith.constant 0 : index
    %53 = vector.load %arg6[%c0_53, %c1_54, %c0_55, %c0_56] : memref<5x18x14x128xf32, #tpu.memory_space<vmem>>, vector<1x14x14x128xf32>
    %54 = vector.extract_strided_slice %21 {offsets = [5, 0], sizes = [1, 128], strides = [1, 1]} : vector<25x128xf32> to vector<1x128xf32>
    %55 = vector.shape_cast %54 : vector<1x128xf32> to vector<1x1x1x128xf32>
    %56 = vector.broadcast %55 : vector<1x1x1x128xf32> to vector<1x14x14x128xf32>
    %57 = arith.mulf %53, %56 : vector<1x14x14x128xf32>
    %58 = arith.addf %52, %57 : vector<1x14x14x128xf32>
    %c1_57 = arith.constant 1 : index
    %c1_58 = arith.constant 1 : index
    %c0_59 = arith.constant 0 : index
    %c0_60 = arith.constant 0 : index
    %59 = vector.load %arg6[%c1_57, %c1_58, %c0_59, %c0_60] : memref<5x18x14x128xf32, #tpu.memory_space<vmem>>, vector<1x14x14x128xf32>
    %60 = vector.extract_strided_slice %21 {offsets = [6, 0], sizes = [1, 128], strides = [1, 1]} : vector<25x128xf32> to vector<1x128xf32>
    %61 = vector.shape_cast %60 : vector<1x128xf32> to vector<1x1x1x128xf32>
    %62 = vector.broadcast %61 : vector<1x1x1x128xf32> to vector<1x14x14x128xf32>
    %63 = arith.mulf %59, %62 : vector<1x14x14x128xf32>
    %64 = arith.addf %58, %63 : vector<1x14x14x128xf32>
    %c2_61 = arith.constant 2 : index
    %c1_62 = arith.constant 1 : index
    %c0_63 = arith.constant 0 : index
    %c0_64 = arith.constant 0 : index
    %65 = vector.load %arg6[%c2_61, %c1_62, %c0_63, %c0_64] : memref<5x18x14x128xf32, #tpu.memory_space<vmem>>, vector<1x14x14x128xf32>
    %66 = vector.extract_strided_slice %21 {offsets = [7, 0], sizes = [1, 128], strides = [1, 1]} : vector<25x128xf32> to vector<1x128xf32>
    %67 = vector.shape_cast %66 : vector<1x128xf32> to vector<1x1x1x128xf32>
    %68 = vector.broadcast %67 : vector<1x1x1x128xf32> to vector<1x14x14x128xf32>
    %69 = arith.mulf %65, %68 : vector<1x14x14x128xf32>
    %70 = arith.addf %64, %69 : vector<1x14x14x128xf32>
    %c3_65 = arith.constant 3 : index
    %c1_66 = arith.constant 1 : index
    %c0_67 = arith.constant 0 : index
    %c0_68 = arith.constant 0 : index
    %71 = vector.load %arg6[%c3_65, %c1_66, %c0_67, %c0_68] : memref<5x18x14x128xf32, #tpu.memory_space<vmem>>, vector<1x14x14x128xf32>
    %72 = vector.extract_strided_slice %21 {offsets = [8, 0], sizes = [1, 128], strides = [1, 1]} : vector<25x128xf32> to vector<1x128xf32>
    %73 = vector.shape_cast %72 : vector<1x128xf32> to vector<1x1x1x128xf32>
    %74 = vector.broadcast %73 : vector<1x1x1x128xf32> to vector<1x14x14x128xf32>
    %75 = arith.mulf %71, %74 : vector<1x14x14x128xf32>
    %76 = arith.addf %70, %75 : vector<1x14x14x128xf32>
    %c4_69 = arith.constant 4 : index
    %c1_70 = arith.constant 1 : index
    %c0_71 = arith.constant 0 : index
    %c0_72 = arith.constant 0 : index
    %77 = vector.load %arg6[%c4_69, %c1_70, %c0_71, %c0_72] : memref<5x18x14x128xf32, #tpu.memory_space<vmem>>, vector<1x14x14x128xf32>
    %78 = vector.extract_strided_slice %21 {offsets = [9, 0], sizes = [1, 128], strides = [1, 1]} : vector<25x128xf32> to vector<1x128xf32>
    %79 = vector.shape_cast %78 : vector<1x128xf32> to vector<1x1x1x128xf32>
    %80 = vector.broadcast %79 : vector<1x1x1x128xf32> to vector<1x14x14x128xf32>
    %81 = arith.mulf %77, %80 : vector<1x14x14x128xf32>
    %82 = arith.addf %76, %81 : vector<1x14x14x128xf32>
    %c0_73 = arith.constant 0 : index
    %c2_74 = arith.constant 2 : index
    %c0_75 = arith.constant 0 : index
    %c0_76 = arith.constant 0 : index
    %83 = vector.load %arg6[%c0_73, %c2_74, %c0_75, %c0_76] : memref<5x18x14x128xf32, #tpu.memory_space<vmem>>, vector<1x14x14x128xf32>
    %84 = vector.extract_strided_slice %21 {offsets = [10, 0], sizes = [1, 128], strides = [1, 1]} : vector<25x128xf32> to vector<1x128xf32>
    %85 = vector.shape_cast %84 : vector<1x128xf32> to vector<1x1x1x128xf32>
    %86 = vector.broadcast %85 : vector<1x1x1x128xf32> to vector<1x14x14x128xf32>
    %87 = arith.mulf %83, %86 : vector<1x14x14x128xf32>
    %88 = arith.addf %82, %87 : vector<1x14x14x128xf32>
    %c1_77 = arith.constant 1 : index
    %c2_78 = arith.constant 2 : index
    %c0_79 = arith.constant 0 : index
    %c0_80 = arith.constant 0 : index
    %89 = vector.load %arg6[%c1_77, %c2_78, %c0_79, %c0_80] : memref<5x18x14x128xf32, #tpu.memory_space<vmem>>, vector<1x14x14x128xf32>
    %90 = vector.extract_strided_slice %21 {offsets = [11, 0], sizes = [1, 128], strides = [1, 1]} : vector<25x128xf32> to vector<1x128xf32>
    %91 = vector.shape_cast %90 : vector<1x128xf32> to vector<1x1x1x128xf32>
    %92 = vector.broadcast %91 : vector<1x1x1x128xf32> to vector<1x14x14x128xf32>
    %93 = arith.mulf %89, %92 : vector<1x14x14x128xf32>
    %94 = arith.addf %88, %93 : vector<1x14x14x128xf32>
    %c2_81 = arith.constant 2 : index
    %c2_82 = arith.constant 2 : index
    %c0_83 = arith.constant 0 : index
    %c0_84 = arith.constant 0 : index
    %95 = vector.load %arg6[%c2_81, %c2_82, %c0_83, %c0_84] : memref<5x18x14x128xf32, #tpu.memory_space<vmem>>, vector<1x14x14x128xf32>
    %96 = vector.extract_strided_slice %21 {offsets = [12, 0], sizes = [1, 128], strides = [1, 1]} : vector<25x128xf32> to vector<1x128xf32>
    %97 = vector.shape_cast %96 : vector<1x128xf32> to vector<1x1x1x128xf32>
    %98 = vector.broadcast %97 : vector<1x1x1x128xf32> to vector<1x14x14x128xf32>
    %99 = arith.mulf %95, %98 : vector<1x14x14x128xf32>
    %100 = arith.addf %94, %99 : vector<1x14x14x128xf32>
    %c3_85 = arith.constant 3 : index
    %c2_86 = arith.constant 2 : index
    %c0_87 = arith.constant 0 : index
    %c0_88 = arith.constant 0 : index
    %101 = vector.load %arg6[%c3_85, %c2_86, %c0_87, %c0_88] : memref<5x18x14x128xf32, #tpu.memory_space<vmem>>, vector<1x14x14x128xf32>
    %102 = vector.extract_strided_slice %21 {offsets = [13, 0], sizes = [1, 128], strides = [1, 1]} : vector<25x128xf32> to vector<1x128xf32>
    %103 = vector.shape_cast %102 : vector<1x128xf32> to vector<1x1x1x128xf32>
    %104 = vector.broadcast %103 : vector<1x1x1x128xf32> to vector<1x14x14x128xf32>
    %105 = arith.mulf %101, %104 : vector<1x14x14x128xf32>
    %106 = arith.addf %100, %105 : vector<1x14x14x128xf32>
    %c4_89 = arith.constant 4 : index
    %c2_90 = arith.constant 2 : index
    %c0_91 = arith.constant 0 : index
    %c0_92 = arith.constant 0 : index
    %107 = vector.load %arg6[%c4_89, %c2_90, %c0_91, %c0_92] : memref<5x18x14x128xf32, #tpu.memory_space<vmem>>, vector<1x14x14x128xf32>
    %108 = vector.extract_strided_slice %21 {offsets = [14, 0], sizes = [1, 128], strides = [1, 1]} : vector<25x128xf32> to vector<1x128xf32>
    %109 = vector.shape_cast %108 : vector<1x128xf32> to vector<1x1x1x128xf32>
    %110 = vector.broadcast %109 : vector<1x1x1x128xf32> to vector<1x14x14x128xf32>
    %111 = arith.mulf %107, %110 : vector<1x14x14x128xf32>
    %112 = arith.addf %106, %111 : vector<1x14x14x128xf32>
    %c0_93 = arith.constant 0 : index
    %c3_94 = arith.constant 3 : index
    %c0_95 = arith.constant 0 : index
    %c0_96 = arith.constant 0 : index
    %113 = vector.load %arg6[%c0_93, %c3_94, %c0_95, %c0_96] : memref<5x18x14x128xf32, #tpu.memory_space<vmem>>, vector<1x14x14x128xf32>
    %114 = vector.extract_strided_slice %21 {offsets = [15, 0], sizes = [1, 128], strides = [1, 1]} : vector<25x128xf32> to vector<1x128xf32>
    %115 = vector.shape_cast %114 : vector<1x128xf32> to vector<1x1x1x128xf32>
    %116 = vector.broadcast %115 : vector<1x1x1x128xf32> to vector<1x14x14x128xf32>
    %117 = arith.mulf %113, %116 : vector<1x14x14x128xf32>
    %118 = arith.addf %112, %117 : vector<1x14x14x128xf32>
    %c1_97 = arith.constant 1 : index
    %c3_98 = arith.constant 3 : index
    %c0_99 = arith.constant 0 : index
    %c0_100 = arith.constant 0 : index
    %119 = vector.load %arg6[%c1_97, %c3_98, %c0_99, %c0_100] : memref<5x18x14x128xf32, #tpu.memory_space<vmem>>, vector<1x14x14x128xf32>
    %120 = vector.extract_strided_slice %21 {offsets = [16, 0], sizes = [1, 128], strides = [1, 1]} : vector<25x128xf32> to vector<1x128xf32>
    %121 = vector.shape_cast %120 : vector<1x128xf32> to vector<1x1x1x128xf32>
    %122 = vector.broadcast %121 : vector<1x1x1x128xf32> to vector<1x14x14x128xf32>
    %123 = arith.mulf %119, %122 : vector<1x14x14x128xf32>
    %124 = arith.addf %118, %123 : vector<1x14x14x128xf32>
    %c2_101 = arith.constant 2 : index
    %c3_102 = arith.constant 3 : index
    %c0_103 = arith.constant 0 : index
    %c0_104 = arith.constant 0 : index
    %125 = vector.load %arg6[%c2_101, %c3_102, %c0_103, %c0_104] : memref<5x18x14x128xf32, #tpu.memory_space<vmem>>, vector<1x14x14x128xf32>
    %126 = vector.extract_strided_slice %21 {offsets = [17, 0], sizes = [1, 128], strides = [1, 1]} : vector<25x128xf32> to vector<1x128xf32>
    %127 = vector.shape_cast %126 : vector<1x128xf32> to vector<1x1x1x128xf32>
    %128 = vector.broadcast %127 : vector<1x1x1x128xf32> to vector<1x14x14x128xf32>
    %129 = arith.mulf %125, %128 : vector<1x14x14x128xf32>
    %130 = arith.addf %124, %129 : vector<1x14x14x128xf32>
    %c3_105 = arith.constant 3 : index
    %c3_106 = arith.constant 3 : index
    %c0_107 = arith.constant 0 : index
    %c0_108 = arith.constant 0 : index
    %131 = vector.load %arg6[%c3_105, %c3_106, %c0_107, %c0_108] : memref<5x18x14x128xf32, #tpu.memory_space<vmem>>, vector<1x14x14x128xf32>
    %132 = vector.extract_strided_slice %21 {offsets = [18, 0], sizes = [1, 128], strides = [1, 1]} : vector<25x128xf32> to vector<1x128xf32>
    %133 = vector.shape_cast %132 : vector<1x128xf32> to vector<1x1x1x128xf32>
    %134 = vector.broadcast %133 : vector<1x1x1x128xf32> to vector<1x14x14x128xf32>
    %135 = arith.mulf %131, %134 : vector<1x14x14x128xf32>
    %136 = arith.addf %130, %135 : vector<1x14x14x128xf32>
    %c4_109 = arith.constant 4 : index
    %c3_110 = arith.constant 3 : index
    %c0_111 = arith.constant 0 : index
    %c0_112 = arith.constant 0 : index
    %137 = vector.load %arg6[%c4_109, %c3_110, %c0_111, %c0_112] : memref<5x18x14x128xf32, #tpu.memory_space<vmem>>, vector<1x14x14x128xf32>
    %138 = vector.extract_strided_slice %21 {offsets = [19, 0], sizes = [1, 128], strides = [1, 1]} : vector<25x128xf32> to vector<1x128xf32>
    %139 = vector.shape_cast %138 : vector<1x128xf32> to vector<1x1x1x128xf32>
    %140 = vector.broadcast %139 : vector<1x1x1x128xf32> to vector<1x14x14x128xf32>
    %141 = arith.mulf %137, %140 : vector<1x14x14x128xf32>
    %142 = arith.addf %136, %141 : vector<1x14x14x128xf32>
    %c0_113 = arith.constant 0 : index
    %c4_114 = arith.constant 4 : index
    %c0_115 = arith.constant 0 : index
    %c0_116 = arith.constant 0 : index
    %143 = vector.load %arg6[%c0_113, %c4_114, %c0_115, %c0_116] : memref<5x18x14x128xf32, #tpu.memory_space<vmem>>, vector<1x14x14x128xf32>
    %144 = vector.extract_strided_slice %21 {offsets = [20, 0], sizes = [1, 128], strides = [1, 1]} : vector<25x128xf32> to vector<1x128xf32>
    %145 = vector.shape_cast %144 : vector<1x128xf32> to vector<1x1x1x128xf32>
    %146 = vector.broadcast %145 : vector<1x1x1x128xf32> to vector<1x14x14x128xf32>
    %147 = arith.mulf %143, %146 : vector<1x14x14x128xf32>
    %148 = arith.addf %142, %147 : vector<1x14x14x128xf32>
    %c1_117 = arith.constant 1 : index
    %c4_118 = arith.constant 4 : index
    %c0_119 = arith.constant 0 : index
    %c0_120 = arith.constant 0 : index
    %149 = vector.load %arg6[%c1_117, %c4_118, %c0_119, %c0_120] : memref<5x18x14x128xf32, #tpu.memory_space<vmem>>, vector<1x14x14x128xf32>
    %150 = vector.extract_strided_slice %21 {offsets = [21, 0], sizes = [1, 128], strides = [1, 1]} : vector<25x128xf32> to vector<1x128xf32>
    %151 = vector.shape_cast %150 : vector<1x128xf32> to vector<1x1x1x128xf32>
    %152 = vector.broadcast %151 : vector<1x1x1x128xf32> to vector<1x14x14x128xf32>
    %153 = arith.mulf %149, %152 : vector<1x14x14x128xf32>
    %154 = arith.addf %148, %153 : vector<1x14x14x128xf32>
    %c2_121 = arith.constant 2 : index
    %c4_122 = arith.constant 4 : index
    %c0_123 = arith.constant 0 : index
    %c0_124 = arith.constant 0 : index
    %155 = vector.load %arg6[%c2_121, %c4_122, %c0_123, %c0_124] : memref<5x18x14x128xf32, #tpu.memory_space<vmem>>, vector<1x14x14x128xf32>
    %156 = vector.extract_strided_slice %21 {offsets = [22, 0], sizes = [1, 128], strides = [1, 1]} : vector<25x128xf32> to vector<1x128xf32>
    %157 = vector.shape_cast %156 : vector<1x128xf32> to vector<1x1x1x128xf32>
    %158 = vector.broadcast %157 : vector<1x1x1x128xf32> to vector<1x14x14x128xf32>
    %159 = arith.mulf %155, %158 : vector<1x14x14x128xf32>
    %160 = arith.addf %154, %159 : vector<1x14x14x128xf32>
    %c3_125 = arith.constant 3 : index
    %c4_126 = arith.constant 4 : index
    %c0_127 = arith.constant 0 : index
    %c0_128 = arith.constant 0 : index
    %161 = vector.load %arg6[%c3_125, %c4_126, %c0_127, %c0_128] : memref<5x18x14x128xf32, #tpu.memory_space<vmem>>, vector<1x14x14x128xf32>
    %162 = vector.extract_strided_slice %21 {offsets = [23, 0], sizes = [1, 128], strides = [1, 1]} : vector<25x128xf32> to vector<1x128xf32>
    %163 = vector.shape_cast %162 : vector<1x128xf32> to vector<1x1x1x128xf32>
    %164 = vector.broadcast %163 : vector<1x1x1x128xf32> to vector<1x14x14x128xf32>
    %165 = arith.mulf %161, %164 : vector<1x14x14x128xf32>
    %166 = arith.addf %160, %165 : vector<1x14x14x128xf32>
    %c4_129 = arith.constant 4 : index
    %c4_130 = arith.constant 4 : index
    %c0_131 = arith.constant 0 : index
    %c0_132 = arith.constant 0 : index
    %167 = vector.load %arg6[%c4_129, %c4_130, %c0_131, %c0_132] : memref<5x18x14x128xf32, #tpu.memory_space<vmem>>, vector<1x14x14x128xf32>
    %168 = vector.extract_strided_slice %21 {offsets = [24, 0], sizes = [1, 128], strides = [1, 1]} : vector<25x128xf32> to vector<1x128xf32>
    %169 = vector.shape_cast %168 : vector<1x128xf32> to vector<1x1x1x128xf32>
    %170 = vector.broadcast %169 : vector<1x1x1x128xf32> to vector<1x14x14x128xf32>
    %171 = arith.mulf %167, %170 : vector<1x14x14x128xf32>
    %172 = arith.addf %166, %171 : vector<1x14x14x128xf32>
    %cst_133 = arith.constant dense<0.000000e+00> : vector<128xf32>
    %173 = vector.multi_reduction <add>, %172, %cst_133 [0, 1, 2] : vector<1x14x14x128xf32> to vector<128xf32>
    %174 = vector.shape_cast %173 : vector<128xf32> to vector<1x1x1x128xf32>
    %cst_134 = arith.constant 1.960000e+02 : f32
    %175 = vector.broadcast %cst_134 : f32 to vector<1x1x1x128xf32>
    %176 = arith.divf %174, %175 : vector<1x1x1x128xf32>
    %177 = vector.broadcast %176 : vector<1x1x1x128xf32> to vector<1x14x14x128xf32>
    %178 = arith.subf %172, %177 : vector<1x14x14x128xf32>
    %179 = arith.mulf %178, %178 : vector<1x14x14x128xf32>
    %cst_135 = arith.constant dense<0.000000e+00> : vector<128xf32>
    %180 = vector.multi_reduction <add>, %179, %cst_135 [0, 1, 2] : vector<1x14x14x128xf32> to vector<128xf32>
    %181 = vector.shape_cast %180 : vector<128xf32> to vector<1x1x1x128xf32>
    %cst_136 = arith.constant 1.960000e+02 : f32
    %182 = vector.broadcast %cst_136 : f32 to vector<1x1x1x128xf32>
    %183 = arith.divf %181, %182 : vector<1x1x1x128xf32>
    %c0_137 = arith.constant 0 : index
    %c0_138 = arith.constant 0 : index
    %184 = vector.load %arg3[%c0_137, %c0_138] : memref<1x128xf32, #tpu.memory_space<vmem>>, vector<1x128xf32>
    %185 = vector.shape_cast %184 : vector<1x128xf32> to vector<1x1x1x128xf32>
    %cst_139 = arith.constant 9.99999974E-6 : f32
    %186 = vector.broadcast %cst_139 : f32 to vector<1x1x1x128xf32>
    %187 = arith.addf %183, %186 : vector<1x1x1x128xf32>
    %188 = math.rsqrt %187 : vector<1x1x1x128xf32>
    %189 = arith.mulf %185, %188 : vector<1x1x1x128xf32>
    %c0_140 = arith.constant 0 : index
    %c0_141 = arith.constant 0 : index
    %190 = vector.load %arg4[%c0_140, %c0_141] : memref<1x128xf32, #tpu.memory_space<vmem>>, vector<1x128xf32>
    %191 = vector.shape_cast %190 : vector<1x128xf32> to vector<1x1x1x128xf32>
    %192 = arith.mulf %176, %189 : vector<1x1x1x128xf32>
    %193 = arith.subf %191, %192 : vector<1x1x1x128xf32>
    %194 = vector.broadcast %189 : vector<1x1x1x128xf32> to vector<1x14x14x128xf32>
    %195 = arith.mulf %172, %194 : vector<1x14x14x128xf32>
    %196 = vector.broadcast %193 : vector<1x1x1x128xf32> to vector<1x14x14x128xf32>
    %197 = arith.addf %195, %196 : vector<1x14x14x128xf32>
    %c0_142 = arith.constant 0 : index
    %c0_143 = arith.constant 0 : index
    %c0_144 = arith.constant 0 : index
    %c0_145 = arith.constant 0 : index
    %198 = vector.load %arg5[%c0_142, %c0_143, %c0_144, %c0_145] : memref<1x14x14x128xf32, #tpu.memory_space<vmem>>, vector<1x14x14x128xf32>
    tpu.vector_store %arg5[%c0_142, %c0_143, %c0_144, %c0_145], %197 {strides = array<i32>} : memref<1x14x14x128xf32, #tpu.memory_space<vmem>>, vector<1x14x14x128xf32>,
    return
  }
  func.func @transform_0(%arg0: i32) -> (i32, i32, i32, i32) {
    %c0_i32 = arith.constant 0 : i32
    %c0_i32_0 = arith.constant 0 : i32
    %c0_i32_1 = arith.constant 0 : i32
    %c0_i32_2 = arith.constant 0 : i32
    return %c0_i32, %c0_i32_0, %c0_i32_1, %arg0 : i32, i32, i32, i32
  }
  func.func @transform_1(%arg0: i32) -> (i32, i32) {
    %c0_i32 = arith.constant 0 : i32
    %c0_i32_0 = arith.constant 0 : i32
    return %c0_i32, %arg0 : i32, i32
  }
  func.func @transform_2(%arg0: i32) -> (i32, i32) {
    %c0_i32 = arith.constant 0 : i32
    %c0_i32_0 = arith.constant 0 : i32
    return %c0_i32, %arg0 : i32, i32
  }
  func.func @transform_3(%arg0: i32) -> (i32, i32) {
    %c0_i32 = arith.constant 0 : i32
    %c0_i32_0 = arith.constant 0 : i32
    return %c0_i32, %arg0 : i32, i32
  }
  func.func @transform_4(%arg0: i32) -> (i32, i32, i32, i32) {
    %c0_i32 = arith.constant 0 : i32
    %c0_i32_0 = arith.constant 0 : i32
    %c0_i32_1 = arith.constant 0 : i32
    %c0_i32_2 = arith.constant 0 : i32
    return %c0_i32, %c0_i32_0, %c0_i32_1, %arg0 : i32, i32, i32, i32
  }
}

</mosaic_0001>

<bundles_post_ra>
// kernel: tpu_custom_call.1
= control target key start
LH: loop header
LB: loop body
LE: loop exit
PB: predicated region body
PF: predicated region fallthrough
CT: control target
= control target key end

     0   :  { %s3847_s15 = smov 0   ;;  %s3849_s16 = smov 0   ;;  %s6642_s0 = inlined_call_operand.vmem [shape: f32[1,14,14,768], index: 0, kind: input, shape index: {}]   ;;  %s6643_s1 = inlined_call_operand.vmem [shape: f32[25,768], index: 1, kind: input, shape index: {}]   ;;  %s6644_s2 = inlined_call_operand.vmem [shape: f32[1,768], index: 2, kind: input, shape index: {}]   ;;  %s6645_s3 = inlined_call_operand.vmem [shape: f32[1,768], index: 3, kind: input, shape index: {}]   ;;  %s6646_s4 = inlined_call_operand.vmem [shape: f32[1,14,14,768], index: 4, kind: output, shape index: {}]  }
   0x1   :  { %s3851_s17 = smov 0  }
   0x2 LB: > { %s3863_s18 = sadd.s32 4294967295, %s3819_s17   ;;  %s3866_s19 = sadd.s32 1, %s3819_s17   ;;  %s3819_s17 = sphi %s3851_s17, %s7271_s17   ;;  %s3815_s16 = sphi %s3849_s16, %s7270_s16   ;;  %s3811_s15 = sphi %s3847_s15, %s7269_s15  }
   0x3   : > { %s18_s20 = ssub.s32 %s3819_s17, %s3866_s19  ;;  %s21_s21 = sadd.s32 1, %s3815_s16 }
   0x4   : > { %p19_p0 = scmp.eq.s32.totalorder %s18_s20, 0  ;;  %p28_p1 = scmp.ne.s32.totalorder %s3815_s16, %s3811_s15 }
   0x5   : > { %p29_p2 = scmp.eq.s32.totalorder %s3819_s17, 0  ;;  %p136_p3 = scmp.eq.s32.totalorder %s3863_s18, 5 }
   0x6   : > { %s3876_s22 = scalar_select %p19_p0, %s3815_s16, %s21_s21  }
   0x7   : > { %p3878_p4 = por %p29_p2, %p28_p1  ;;  %p3882_p5 = por %p136_p3, %p28_p1 }
   0x8   : > { %p3735_p6 = scmp.ge.s32.totalorder %s3819_s17, 6 }
   0xa   : > { %158 = sbr.rel (%p3735_p6) target bundleno = 42 (0x2a), region = 16 }
  0x11   : > { %161 = sbr.rel (!%p3878_p4) target bundleno = 35 (0x23), region = 20  ;;  %s163_s25 = sand.u32 (%p3878_p4), 1, %s3815_s16  }
  0x12   : > { %s3736_s26 = sshll.u32 (%p3878_p4), %s3819_s17, 3  ;;  %s3745_s27 = smul.u32 (%p3878_p4), 224, %s163_s25 }
  0x13   : > { %s3894_s30 = scalar_lea.vmem (%p3878_p4), %s6642_s0, %s3736_s26 }
  0x14   : > { %v249_v0 = vld [vmem:[%s3894_s30] sm:$0xff] (%p3878_p4)  ;;  %v251_v1 = vld [vmem:[%s3894_s30 + $0x30] sm:$0xff] (%p3878_p4)  ;;  %s3902_s5 = scalar_lea.vmem (%p3878_p4), [#allocation3], %s3745_s27 }
  0x15   : > { %v253_v2 = vld [vmem:[%s3894_s30 + $0x60] sm:$0xff] (%p3878_p4)  ;;  %v255_v3 = vld [vmem:[%s3894_s30 + $0x90] sm:$0xff] (%p3878_p4)  ;;  %250 = vst [vmem:[%s3902_s5] sm:$0xff] (%p3878_p4), %v249_v0  ;;  %252 = vst [vmem:[%s3902_s5 + $0x8] sm:$0xff] (%p3878_p4), %v251_v1 }
  0x16   : > { %v257_v4 = vld [vmem:[%s3894_s30 + $0xc0] sm:$0xff] (%p3878_p4)  ;;  %v259_v5 = vld [vmem:[%s3894_s30 + $0xf0] sm:$0xff] (%p3878_p4)  ;;  %254 = vst [vmem:[%s3902_s5 + $0x10] sm:$0xff] (%p3878_p4), %v253_v2  ;;  %256 = vst [vmem:[%s3902_s5 + $0x18] sm:$0xff] (%p3878_p4), %v255_v3 }
  0x17   : > { %258 = vst [vmem:[%s3902_s5 + $0x20] sm:$0xff] (%p3878_p4), %v257_v4  ;;  %260 = vst [vmem:[%s3902_s5 + $0x28] sm:$0xff] (%p3878_p4), %v259_v5  ;;  %v261_v6 = vld [vmem:[%s3894_s30 + $0x120] sm:$0xff] (%p3878_p4)  ;;  %v263_v7 = vld [vmem:[%s3894_s30 + $0x150] sm:$0xff] (%p3878_p4) }
  0x18   : > { %v265_v8 = vld [vmem:[%s3894_s30 + $0x180] sm:$0xff]  ;;  %262 = vst [vmem:[%s3902_s5 + $0x30] sm:$0xff] %v261_v6  ;;  %264 = vst [vmem:[%s3902_s5 + $0x38] sm:$0xff] %v263_v7  ;;  %v267_v9 = vld [vmem:[%s3894_s30 + $0x1b0] sm:$0xff] }
  0x19   : > { %266 = vst [vmem:[%s3902_s5 + $0x40] sm:$0xff] %v265_v8  ;;  %v269_v10 = vld [vmem:[%s3894_s30 + $0x1e0] sm:$0xff]  ;;  %v271_v11 = vld [vmem:[%s3894_s30 + $0x210] sm:$0xff]  ;;  %268 = vst [vmem:[%s3902_s5 + $0x48] sm:$0xff] %v267_v9 }
  0x1a   : > { %270 = vst [vmem:[%s3902_s5 + $0x50] sm:$0xff] %v269_v10  ;;  %272 = vst [vmem:[%s3902_s5 + $0x58] sm:$0xff] %v271_v11  ;;  %v273_v12 = vld [vmem:[%s3894_s30 + $0x240] sm:$0xff]  ;;  %v275_v13 = vld [vmem:[%s3894_s30 + $0x270] sm:$0xff] }
  0x1b   : > { %v277_v14 = vld [vmem:[%s3894_s30 + $0x2a0] sm:$0xff]  ;;  %274 = vst [vmem:[%s3902_s5 + $0x60] sm:$0xff] %v273_v12  ;;  %276 = vst [vmem:[%s3902_s5 + $0x68] sm:$0xff] %v275_v13  ;;  %v279_v15 = vld [vmem:[%s3894_s30 + $0x2d0] sm:$0xff] }
  0x1c   : > { %278 = vst [vmem:[%s3902_s5 + $0x70] sm:$0xff] %v277_v14  ;;  %v281_v16 = vld [vmem:[%s3894_s30 + $0x300] sm:$0xff]  ;;  %v283_v17 = vld [vmem:[%s3894_s30 + $0x330] sm:$0xff]  ;;  %280 = vst [vmem:[%s3902_s5 + $0x78] sm:$0xff] %v279_v15 }
  0x1d   : > { %282 = vst [vmem:[%s3902_s5 + $0x80] sm:$0xff] %v281_v16  ;;  %284 = vst [vmem:[%s3902_s5 + $0x88] sm:$0xff] %v283_v17  ;;  %v285_v18 = vld [vmem:[%s3894_s30 + $0x360] sm:$0xff]  ;;  %v287_v19 = vld [vmem:[%s3894_s30 + $0x390] sm:$0xff] }
  0x1e   : > { %v289_v20 = vld [vmem:[%s3894_s30 + $0x3c0] sm:$0xff]  ;;  %286 = vst [vmem:[%s3902_s5 + $0x90] sm:$0xff] %v285_v18  ;;  %288 = vst [vmem:[%s3902_s5 + $0x98] sm:$0xff] %v287_v19  ;;  %v291_v21 = vld [vmem:[%s3894_s30 + $0x3f0] sm:$0xff] }
  0x1f   : > { %290 = vst [vmem:[%s3902_s5 + $0xa0] sm:$0xff] %v289_v20  ;;  %v293_v22 = vld [vmem:[%s3894_s30 + $0x420] sm:$0xff]  ;;  %v295_v23 = vld [vmem:[%s3894_s30 + $0x450] sm:$0xff]  ;;  %292 = vst [vmem:[%s3902_s5 + $0xa8] sm:$0xff] %v291_v21 }
  0x20   : > { %294 = vst [vmem:[%s3902_s5 + $0xb0] sm:$0xff] %v293_v22  ;;  %296 = vst [vmem:[%s3902_s5 + $0xb8] sm:$0xff] %v295_v23  ;;  %v297_v24 = vld [vmem:[%s3894_s30 + $0x480] sm:$0xff]  ;;  %v299_v25 = vld [vmem:[%s3894_s30 + $0x4b0] sm:$0xff] }
  0x21   : > { %v301_v26 = vld [vmem:[%s3894_s30 + $0x4e0] sm:$0xff]  ;;  %298 = vst [vmem:[%s3902_s5 + $0xc0] sm:$0xff] %v297_v24  ;;  %300 = vst [vmem:[%s3902_s5 + $0xc8] sm:$0xff] %v299_v25  ;;  %v303_v27 = vld [vmem:[%s3894_s30 + $0x510] sm:$0xff] }
  0x22   : > { %302 = vst [vmem:[%s3902_s5 + $0xd0] sm:$0xff] %v301_v26  ;;  %304 = vst [vmem:[%s3902_s5 + $0xd8] sm:$0xff] %v303_v27 }
  0x23 PF: > { %310 = sbr.rel (!%p3878_p4) target bundleno = 42 (0x2a), region = 58  ;;  %s312_s6 = sand.u32 (%p3878_p4), 1, %s3815_s16  }
  0x24   : > { %s3738_s7 = sshll.u32 (%p3878_p4), %s3819_s17, 3  ;;  %s3737_s8 = sshll.u32 (%p3878_p4), %s312_s6, 5 }
  0x25   : > { %s316_s11 = scalar_lea.vmem (%p3878_p4), %s6643_s1, %s3738_s7  ;;  %s314_s12 = scalar_lea.vmem (%p3878_p4), [#allocation4], %s3737_s8 }
  0x26   : > { %v350_v28 = vld [vmem:[%s316_s11] sm:$0xff] (%p3878_p4)  ;;  %v352_v29 = vld [vmem:[%s316_s11 + $0x30] sm:$0xff] (%p3878_p4) }
  0x27   : > { %v354_v30 = vld [vmem:[%s316_s11 + $0x60] sm:$0xff] (%p3878_p4)  ;;  %351 = vst [vmem:[%s314_s12] sm:$0xff] (%p3878_p4), %v350_v28  ;;  %353 = vst [vmem:[%s314_s12 + $0x8] sm:$0xff] (%p3878_p4), %v352_v29  ;;  %v356_v31 = vld [vmem:[%s316_s11 + $0x90] sm:$0xff] (%p3878_p4) }
  0x28   : > { %355 = vst [vmem:[%s314_s12 + $0x10] sm:$0xff] (%p3878_p4), %v354_v30  ;;  %357 = vst [vmem:[%s314_s12 + $0x18] sm:$0xff] (%p3878_p4), %v356_v31 }
  0x2a PF: > { %p3739_p7 = scmp.ge.s32.totalorder %s3819_s17, 1  ;;  %p374_p8 = scmp.lt.s32.totalorder %s3819_s17, 7 }
  0x2c   : > { %p375_p9 = pnand %p3739_p7, %p374_p8 }
  0x2e   : > { %378 = sbr.rel (%p375_p9) target bundleno = 655 (0x28f), region = 104 }
  0x35   : > { %s381_s13 = sand.u32 1, %s3811_s15   ;;  %v1044_v32 = vlaneseq  ;;  %v3821_v33 = vmov 0.0   ;;  %vm525_vm0 = vcmask 1041408   ;;  %vm639_vm1 = vcmask 1040384   ;;  %p422_p10 = scmp.lt.s32.totalorder %s3863_s18, 5 }
  0x36   : > { %s3740_s14 = sshll.u32 %s381_s13, 5  ;;  %456 = vst [vmem:[#allocation2] sm:$0xff] %v3821_v33  ;;  %457 = vst [vmem:[#allocation2 + $0x8] sm:$0x3f] %v3821_v33  ;;  %s3964_s15 = smul.u32 224, %s381_s13  ;;  %vm782_vm2 = vcmask 1046528  }
  0x37   : > { %459 = vst [vmem:[#allocation2 + $0x18] sm:$0x3f] %v3821_v33  ;;  %461 = vst [vmem:[#allocation2 + $0x128] sm:$0x3f] %v3821_v33  ;;  %v1045_v34 = vshrl.u32 %v1044_v32, 7  ;;  %s3966_s17 = scalar_lea.vmem [#allocation4], %s3740_s14 }
  0x38   : > { %463 = vst [vmem:[#allocation2 + $0x138] sm:$0x3f] %v3821_v33  ;;  %465 = vst [vmem:[#allocation2 + $0x248] sm:$0x3f] %v3821_v33  ;;  %v1012_v35 = vld [vmem:[%s3966_s17] sm:$0xff]  ;;  %s3974_s20 = scalar_lea.vmem [#allocation3], %s3964_s15 }
  0x39   : > { %467 = vst [vmem:[#allocation2 + $0x258] sm:$0x3f] %v3821_v33  ;;  %469 = vst [vmem:[#allocation2 + $0x368] sm:$0x3f] %v3821_v33  ;;  %v3969_v36 = vsub.s32 0, %v1045_v34  ;;  %v3971_v37 = vsub.s32 1, %v1045_v34 }
  0x3a   : > { %471 = vst [vmem:[#allocation2 + $0x378] sm:$0x3f] %v3821_v33  ;;  %473 = vst [vmem:[#allocation2 + $0x488] sm:$0x3f] %v3821_v33  ;;  %v3977_v38 = vld [vmem:[%s3974_s20] sm:$0xff]  ;;  %v3980_v39 = vld [vmem:[%s3974_s20 + $0x10] sm:$0xff] }
  0x3b   : > { %475 = vst [vmem:[#allocation2 + $0x498] sm:$0x3f] %v3821_v33  ;;  %478 = vst [vmem:[#allocation2 + $0x108] sm:$0x3f] %v3821_v33  ;;  %v3982_v40 = vsub.s32 2, %v1045_v34  ;;  %v3984_v41 = vsub.s32 3, %v1045_v34  ;;  %v3992_v43 = vrot.slane %v1012_v35, %v3969_v36  ;;  %v3995_v44 = vrot.slane %v1012_v35, %v3971_v37 }
  0x3c   : > { %480 = vst [vmem:[#allocation2 + $0x118] sm:$0x3f] %v3821_v33  ;;  %482 = vst [vmem:[#allocation2 + $0x228] sm:$0x3f] %v3821_v33  ;;  %v3988_v42 = vld [vmem:[%s3974_s20 + $0x8] sm:$0x3f] }
  0x3d   : > { %484 = vst [vmem:[#allocation2 + $0x238] sm:$0x3f] %v3821_v33  ;;  %486 = vst [vmem:[#allocation2 + $0x348] sm:$0x3f] %v3821_v33  ;;  %v3999_v45 = vld [vmem:[%s3974_s20 + $0x18] sm:$0x3f]  ;;  %v4008_v48 = vrot.slane %v1012_v35, %v3982_v40  ;;  %v4011_v49 = vrot.slane %v1012_v35, %v3984_v41 }
  0x3e   : > { %488 = vst [vmem:[#allocation2 + $0x358] sm:$0x3f] %v3821_v33  ;;  %490 = vst [vmem:[#allocation2 + $0x468] sm:$0x3f] %v3821_v33  ;;  %v4002_v46 = vld [vmem:[%s3974_s20 + $0x20] sm:$0xff]  ;;  %v4017_v50 = vld [vmem:[%s3974_s20 + $0x30] sm:$0xff] }
  0x3f   : > { %492 = vst [vmem:[#allocation2 + $0x478] sm:$0x3f] %v3821_v33  ;;  %494 = vst [vmem:[#allocation2 + $0x588] sm:$0x3f] %v3821_v33  ;;  %v4005_v47 = vld [vmem:[%s3974_s20 + $0x28] sm:$0x3f] }
  0x40   : > { %496 = vst [vmem:[#allocation2 + $0x598] sm:$0x3f] %v3821_v33  ;;  %6766 = vst [vmem:[#allocation6_spill] sm:$0xff] %v3969_v36  ;;  %v4020_v51 = vld [vmem:[%s3974_s20 + $0x38] sm:$0x3f]  ;;  %v4023_v52 = vld [vmem:[%s3974_s20 + $0x40] sm:$0xff] }
  0x41   : > { %6767 = vst [vmem:[#allocation7_spill] sm:$0xff] %v3971_v37  ;;  %6768 = vst [vmem:[#allocation8_spill] sm:$0xff] %v3984_v41  ;;  %v1048_v53 = vmul.f32 0.0, %v3992_v43  ;;  %v1137_v54 = vmul.f32 0.0, %v3995_v44  ;;  %v1226_v55 = vmul.f32 0.0, %v4008_v48  ;;  %v4031_v56 = vsub.s32 5, %v1045_v34 }
  0x42   : > { %754 = vst [vmem:[#allocation2 + $0x260] sm:$0xff] %v3977_v38  ;;  %756 = vst [vmem:[#allocation2 + $0x270] sm:$0xff] %v3980_v39  ;;  %v4033_v58 = vsub.s32 4, %v1045_v34  ;;  %v4035_v59 = vsub.s32 6, %v1045_v34  ;;  %v4037_v60 = vsub.s32 7, %v1045_v34  ;;  %v1315_v61 = vmul.f32 0.0, %v4011_v49 }
  0x43   : > { %6769 = vst [vmem:[#allocation9_spill] sm:$0xff] %v3992_v43  ;;  %6770 = vst [vmem:[#allocation10_spill] sm:$0xff] %v3995_v44  ;;  %v1165_v57 = vadd.f32 %v1137_v54, %v1048_v53  ;;  %v4041_v63 = vld [vmem:[%s3966_s17 + $0x8] sm:$0xff]  ;;  %v4044_v0 = vrot.slane %v1012_v35, %v4031_v56  ;;  %v526_v13 = vrot.slane %v3977_v38, 6  ;;  %v4073_v15 = vld [vmem:[%s3974_s20 + $0x50] sm:$0xff]  ;;  %v527_v18 = vrot.slane %v3988_v42, 6 }
  0x44   : > { %755 = vst [vmem:[#allocation2 + $0x268] sm:$0x3f] %v3988_v42  ;;  %6771 = vst [vmem:[#allocation11_spill] sm:$0xff] %v4008_v48  ;;  %v4047_v2 = vrot.slane %v1012_v35, %v4033_v58  ;;  %v4050_v3 = vrot.slane %v1012_v35, %v4035_v59  ;;  %v4053_v4 = vrot.slane %v1012_v35, %v4037_v60  ;;  %v4070_v14 = vld [vmem:[%s3974_s20 + $0x48] sm:$0x3f]  ;;  %v529_v19 = vrot.slane %v3980_v39, 6 }
  0x45   : > { %6772 = vst [vmem:[#allocation12_spill] sm:$0xff] %v4011_v49  ;;  %757 = vst [vmem:[#allocation2 + $0x278] sm:$0x3f] %v3999_v45  ;;  %v1254_v62 = vadd.f32 %v1226_v55, %v1165_v57  ;;  %v1493_v5 = vmul.f32 0.0, %v4044_v0  ;;  %v4058_v6 = vrot.slane %v4041_v63, %v3969_v36  ;;  %v4066_v12 = vrot.slane %v4041_v63, %v3971_v37  ;;  %v4076_v16 = vld [vmem:[%s3974_s20 + $0x58] sm:$0x3f] }
  0x46   : > { %758 = vst [vmem:[#allocation2 + $0x280] sm:$0xff] %v4002_v46  ;;  %759 = vst [vmem:[#allocation2 + $0x288] sm:$0x3f] %v4005_v47  ;;  %v1404_v7 = vmul.f32 0.0, %v4047_v2  ;;  %v1582_v8 = vmul.f32 0.0, %v4050_v3  ;;  %v1671_v9 = vmul.f32 0.0, %v4053_v4  ;;  %v4080_v17 = vrot.slane %v4041_v63, %v3982_v40 }
  0x47   : > { %6773 = vst [vmem:[#allocation13_spill] sm:$0xff] %v4020_v51  ;;  %760 = vst [vmem:[#allocation2 + $0x290] sm:$0xff] %v4017_v50  ;;  %v1343_v1 = vadd.f32 %v1315_v61, %v1254_v62  ;;  %v1760_v10 = vmul.f32 0.0, %v4058_v6  ;;  %v530_v20 = vrot.slane %v3999_v45, 6  ;;  %v4089_v21 = vld [vmem:[%s3974_s20 + $0x60] sm:$0xff]  ;;  %v4092_v22 = vld [vmem:[%s3974_s20 + $0x70] sm:$0xff]  ;;  %v528_v31 = vsel %vm525_vm0, %v526_v13, %v527_v18 }
  0x48   : > { %761 = vst [vmem:[#allocation2 + $0x298] sm:$0x3f] %v4020_v51  ;;  %762 = vst [vmem:[#allocation2 + $0x2a0] sm:$0xff] %v4023_v52  ;;  %v596_v24 = vsel %vm525_vm0, 0.0, %v526_v13  ;;  %v532_v25 = vrot.slane %v4002_v46, 6  ;;  %v533_v26 = vrot.slane %v4005_v47, 6  ;;  %v4113_v35 = vrot.slane %v4041_v63, %v4037_v60 }
  0x49   : > { %6774 = vst [vmem:[#allocation14_spill] sm:$0xff] %v4033_v58  ;;  %6775 = vst [vmem:[#allocation15_spill] sm:$0xff] %v4035_v59  ;;  %v1432_v11 = vadd.f32 %v1404_v7, %v1343_v1  ;;  %v4099_v27 = vld [vmem:[%s3974_s20 + $0x68] sm:$0x3f]  ;;  %v4103_v28 = vmul.f32 %v3992_v43, %v596_v24  ;;  %v1495_v29 = vmul.f32 %v4044_v0, %v596_v24  ;;  %v597_v33 = vsel %vm525_vm0, 0.0, %v529_v19  ;;  %s423_s21 = scalar_select %p422_p10, %s3863_s18, 5 }
  0x4a   : > { %6776 = vst [vmem:[#allocation16_spill] sm:$0xff] %v4037_v60  ;;  %6777 = vst [vmem:[#allocation17_spill] sm:$0xff] %v4044_v0  ;;  %v1937_v30 = vmul.f32 %v4080_v17, %v596_v24  ;;  %v531_v34 = vsel %vm525_vm0, %v529_v19, %v530_v20  ;;  %v4118_v54 = vmul.f32 %v3992_v43, %v597_v33  ;;  %v1849_v62 = vmul.f32 0.0, %v4066_v12  ;;  %v1286_v60 = vld [vmem:[#allocation2 + $0x378] sm:$0x3f]  ;;  %s6490_s30 = scalar_lea.vmem [#allocation5], %s3964_s15 }
  0x4b   : > { %6778 = vst [vmem:[#allocation18_spill] sm:$0xff] %v4047_v2  ;;  %6779 = vst [vmem:[#allocation19_spill] sm:$0xff] %v4050_v3  ;;  %v1521_v23 = vadd.f32 %v1493_v5, %v1432_v11  ;;  %v4115_v53 = vadd.f32 %v1495_v29, %v1432_v11  ;;  %v4121_v55 = vmul.f32 %v4044_v0, %v597_v33  ;;  %v598_v1 = vsel %vm525_vm0, 0.0, %v532_v25  ;;  %s424_s26 = scalar_lea.vmem %s6644_s2, %s423_s21  ;;  %s427_s29 = scalar_lea.vmem %s6645_s3, %s423_s21 }
  0x4c   : > { %6780 = vst [vmem:[#allocation20_spill] sm:$0xff] %v4053_v4  ;;  %6781 = vst [vmem:[#allocation21_spill] sm:$0xff] %v4058_v6  ;;  %v4124_v57 = vmul.f32 %v4080_v17, %v597_v33  ;;  %v534_v5 = vsel %vm525_vm0, %v532_v25, %v533_v26  ;;  %v4130_v7 = vmul.f32 %v3992_v43, %v598_v1  ;;  %v535_v18 = vrot.slane %v4017_v50, 6  ;;  %s3742_s5 = sshll.u32 (%p3882_p5), %s3863_s18, 3 }
  0x4d   : > { %6782 = vst [vmem:[#allocation22_spill] sm:$0xff] %v4066_v12  ;;  %6783 = vst [vmem:[#allocation23_spill] sm:$0xff] %v4076_v16  ;;  %v1610_v32 = vadd.f32 %v1582_v8, %v1521_v23  ;;  %v4133_v8 = vmul.f32 %v4044_v0, %v598_v1  ;;  %v4136_v11 = vmul.f32 %v4080_v17, %v598_v1  ;;  %v536_v19 = vrot.slane %v4020_v51, 6  ;;  %s6577_s8 = scalar_lea.vmem (%p3882_p5), %s6646_s4, %s3742_s5 }
  0x4e   : > { %6784 = vst [vmem:[#allocation24_spill] sm:$0xff] %v4080_v17  ;;  %763 = vst [vmem:[#allocation2 + $0x2a8] sm:$0x3f] %v4070_v14  ;;  %v4139_v13 = vmul.f32 %v4113_v35, %v598_v1  ;;  %v599_v23 = vsel %vm525_vm0, 0.0, %v535_v18  ;;  %v538_v25 = vrot.slane %v4023_v52, 6  ;;  %vm853_vm3 = vcmask 1044480  }
  0x4f   : > { %764 = vst [vmem:[#allocation2 + $0x2b0] sm:$0xff] %v4073_v15  ;;  %765 = vst [vmem:[#allocation2 + $0x2b8] sm:$0x3f] %v4076_v16  ;;  %v1699_v61 = vadd.f32 %v1671_v9, %v1610_v32  ;;  %v537_v24 = vsel %vm525_vm0, %v535_v18, %v536_v19  ;;  %v4147_v26 = vmul.f32 %v3992_v43, %v599_v23  ;;  %vm968_vm4 = vcmask 1043456  }
  0x50   : > { %6785 = vst [vmem:[#allocation25_spill] sm:$0xff] %v4089_v21  ;;  %766 = vst [vmem:[#allocation2 + $0x2c0] sm:$0xff] %v4089_v21  ;;  %v4150_v29 = vmul.f32 %v4044_v0, %v599_v23  ;;  %vm897_vm5 = vcmask 1045504  }
  0x51   : > { %6786 = vst [vmem:[#allocation26_spill] sm:$0xff] %v4099_v27  ;;  %768 = vst [vmem:[#allocation2 + $0x2d0] sm:$0xff] %v4092_v22  ;;  %v1788_v9 = vadd.f32 %v1760_v10, %v1699_v61  ;;  %v4153_v10 = vmul.f32 %v4080_v17, %v599_v23  ;;  %v539_v61 = vrot.slane %v4070_v14, 6 }
  0x52   : > { %767 = vst [vmem:[#allocation2 + $0x2c8] sm:$0x3f] %v4099_v27  ;;  %612 = vst [vmem:[#allocation2 + $0x28] sm:$0x3f] %v528_v31  ;;  %v4156_v31 = vmul.f32 %v4113_v35, %v599_v23 }
  0x53   : > { %6787 = vst [vmem:[#allocation27_spill] sm:$0xff] %v4113_v35  ;;  %613 = vst [vmem:[#allocation2 + $0x30] sm:$0xff] %v597_v33  ;;  %v1877_v20 = vadd.f32 %v1849_v62, %v1788_v9  ;;  %v4161_v33 = vld [vmem:[%s3966_s17 + $0x10] sm:$0xff]  ;;  %v540_v19 = vsel %vm525_vm0, %v538_v25, %v539_v61 }
  0x54   : > { %6788 = vst [vmem:[#allocation28_spill] sm:$0xff] %v4121_v55  ;;  %6789 = vst [vmem:[#allocation29_spill] sm:$0xff] %v4124_v57  ;;  %v656_v57 = vrot.slane %v4076_v16, 7 }
  0x55   : > { %614 = vst [vmem:[#allocation2 + $0x38] sm:$0x3f] %v531_v34  ;;  %615 = vst [vmem:[#allocation2 + $0x40] sm:$0xff] %v598_v1  ;;  %v4158_v32 = vadd.f32 %v1937_v30, %v1877_v20  ;;  %v600_v34 = vsel %vm525_vm0, 0.0, %v538_v25  ;;  %v4170_v1 = vrot.slane %v4161_v33, %v4033_v58  ;;  %v541_v20 = vrot.slane %v4073_v15, 6 }
  0x56   : > { %6790 = vst [vmem:[#allocation30_spill] sm:$0xff] %v4133_v8  ;;  %6791 = vst [vmem:[#allocation31_spill] sm:$0xff] %v4136_v11  ;;  %v4166_v62 = vmul.f32 %v3992_v43, %v600_v34  ;;  %v4176_v30 = vmul.f32 %v4080_v17, %v600_v34  ;;  %v4179_v9 = vmul.f32 %v4113_v35, %v600_v34 }
  0x57   : > { %6792 = vst [vmem:[#allocation32_spill] sm:$0xff] %v4139_v13  ;;  %616 = vst [vmem:[#allocation2 + $0x48] sm:$0x3f] %v534_v5  ;;  %v4173_v5 = vmul.f32 %v4044_v0, %v600_v34  ;;  %v4182_v18 = vmul.f32 %v4170_v1, %v600_v34  ;;  %v4197_v34 = vld [vmem:[%s3974_s20 + $0x78] sm:$0x3f] }
  0x58   : > { %617 = vst [vmem:[#allocation2 + $0x50] sm:$0xff] %v599_v23  ;;  %6793 = vst [vmem:[#allocation33_spill] sm:$0xff] %v4150_v29  ;;  %v601_v23 = vsel %vm525_vm0, 0.0, %v541_v20  ;;  %v1195_v29 = vld [vmem:[#allocation2 + $0x248] sm:$0x3f] }
  0x59   : > { %6794 = vst [vmem:[#allocation34_spill] sm:$0xff] %v4153_v10  ;;  %6795 = vst [vmem:[#allocation35_spill] sm:$0xff] %v4156_v31  ;;  %v4200_v25 = vmul.f32 %v4113_v35, %v601_v23  ;;  %v4203_v61 = vmul.f32 %v4170_v1, %v601_v23  ;;  %v640_v31 = vrot.slane %v3977_v38, 7  ;;  %v644_v10 = vrot.slane %v3999_v45, 7 }
  0x5a   : > { %618 = vst [vmem:[#allocation2 + $0x58] sm:$0x3f] %v537_v24  ;;  %6796 = vst [vmem:[#allocation36_spill] sm:$0xff] %v4158_v32  ;;  %v1017_v24 = vld [vmem:[#allocation2 + $0x8] sm:$0x3f] }
  0x5b   : > { %6797 = vst [vmem:[#allocation37_spill] sm:$0xff] %v4170_v1  ;;  %6798 = vst [vmem:[#allocation38_spill] sm:$0xff] %v4173_v5  ;;  %v1106_v32 = vld [vmem:[#allocation2 + $0x128] sm:$0x3f]  ;;  %v4188_v5 = vmul.f32 %v3992_v43, %v601_v23  ;;  %v1049_v13 = vmul.f32 %v3992_v43, %v1017_v24 }
  0x5c   : > { %6799 = vst [vmem:[#allocation39_spill] sm:$0xff] %v4176_v30  ;;  %6800 = vst [vmem:[#allocation40_spill] sm:$0xff] %v4179_v9  ;;  %v4191_v30 = vmul.f32 %v4044_v0, %v601_v23  ;;  %v4194_v9 = vmul.f32 %v4080_v17, %v601_v23 }
  0x5d   : > { %6801 = vst [vmem:[#allocation41_spill] sm:$0xff] %v4182_v18  ;;  %620 = vst [vmem:[#allocation2 + $0x68] sm:$0x3f] %v540_v19  ;;  %v542_v19 = vrot.slane %v4076_v16, 6  ;;  %v6648_v18 = vrot.slane %v4089_v21, 6 }
  0x5e   : > { %6802 = vst [vmem:[#allocation42_spill] sm:$0xff] %v4191_v30  ;;  %6803 = vst [vmem:[#allocation43_spill] sm:$0xff] %v4194_v9  ;;  %v641_v30 = vrot.slane %v3988_v42, 7  ;;  %v643_v9 = vrot.slane %v3980_v39, 7 }
  0x5f   : > { %6804 = vst [vmem:[#allocation44_spill] sm:$0xff] %v4197_v34  ;;  %6805 = vst [vmem:[#allocation45_spill] sm:$0xff] %v4200_v25  ;;  %v1138_v25 = vmul.f32 %v3995_v44, %v1106_v32  ;;  %v543_v23 = vsel %vm525_vm0, %v541_v20, %v542_v19 }
  0x60   : > { %6806 = vst [vmem:[#allocation46_spill] sm:$0xff] %v4203_v61  ;;  %769 = vst [vmem:[#allocation2 + $0x2d8] sm:$0x3f] %v4197_v34  ;;  %v602_v61 = vsel %vm525_vm0, 0.0, %v6648_v18  ;;  %v642_v20 = vsel %vm639_vm1, %v640_v31, %v641_v30  ;;  %v645_v19 = vsel %vm639_vm1, %v643_v9, %v644_v10  ;;  %v4238_v18 = vrot.slane %v4041_v63, %v3984_v41  ;;  %v1375_v34 = vld [vmem:[#allocation2 + $0x498] sm:$0x3f] }
  0x61   : > { %622 = vst [vmem:[#allocation2 + $0x78] sm:$0x3f] %v543_v23  ;;  %v4219_v37 = vmul.f32 %v3992_v43, %v602_v61  ;;  %v4222_v11 = vmul.f32 %v4044_v0, %v602_v61  ;;  %v4225_v8 = vmul.f32 %v4080_v17, %v602_v61  ;;  %v4228_v24 = vmul.f32 %v4113_v35, %v602_v61 }
  0x62   : > { %v4231_v32 = vmul.f32 %v4170_v1, %v602_v61  ;;  %v710_v23 = vsel %vm639_vm1, 0.0, %v640_v31  ;;  %6811 = vst [vmem:[#allocation51_spill] sm:$0xff] %v4238_v18  ;;  %726 = vst [vmem:[#allocation2 + $0x148] sm:$0x3f] %v642_v20  ;;  %v711_v10 = vsel %vm639_vm1, 0.0, %v643_v9  ;;  %v646_v31 = vrot.slane %v4002_v46, 7 }
  0x63   : > { %6807 = vst [vmem:[#allocation47_spill] sm:$0xff] %v4222_v11  ;;  %6808 = vst [vmem:[#allocation48_spill] sm:$0xff] %v4225_v8  ;;  %v1166_v11 = vadd.f32 %v1138_v25, %v1049_v13  ;;  %v1227_v8 = vmul.f32 %v4008_v48, %v1195_v29  ;;  %v1584_v61 = vmul.f32 %v4050_v3, %v710_v23  ;;  %v647_v30 = vrot.slane %v4005_v47, 7 }
  0x64   : > { %6809 = vst [vmem:[#allocation49_spill] sm:$0xff] %v4228_v24  ;;  %6810 = vst [vmem:[#allocation50_spill] sm:$0xff] %v4231_v32  ;;  %v1141_v24 = vmul.f32 %v3995_v44, %v710_v23  ;;  %v4244_v32 = vmul.f32 %v4238_v18, %v710_v23  ;;  %v1143_v29 = vmul.f32 %v3995_v44, %v711_v10 }
  0x65   : > { %728 = vst [vmem:[#allocation2 + $0x158] sm:$0x3f] %v645_v19  ;;  %v4253_v13 = vadd.f32 %v1584_v61, %v4115_v53  ;;  %727 = vst [vmem:[#allocation2 + $0x150] sm:$0xff] %v711_v10  ;;  %v4257_v25 = vmul.f32 %v4050_v3, %v711_v10  ;;  %v4260_v20 = vmul.f32 %v4238_v18, %v711_v10  ;;  %v712_v19 = vsel %vm639_vm1, 0.0, %v646_v31  ;;  %v1284_v10 = vld [vmem:[#allocation2 + $0x368] sm:$0x3f] }
  0x66   : > { %6812 = vst [vmem:[#allocation52_spill] sm:$0xff] %v4244_v32  ;;  %v4250_v41 = vadd.f32 %v1141_v24, %v4103_v28  ;;  %v4264_v9 = vrot.slane %v4161_v33, %v3969_v36  ;;  %v648_v28 = vsel %vm639_vm1, %v646_v31, %v647_v30  ;;  %v4269_v53 = vadd.f32 %v1143_v29, %v4118_v54 }
  0x67   : > { %6813 = vst [vmem:[#allocation53_spill] sm:$0xff] %v4257_v25  ;;  %6814 = vst [vmem:[#allocation54_spill] sm:$0xff] %v4260_v20  ;;  %v1145_v24 = vmul.f32 %v3995_v44, %v712_v19  ;;  %v4273_v23 = vmul.f32 %v4050_v3, %v712_v19  ;;  %v4276_v61 = vmul.f32 %v4238_v18, %v712_v19  ;;  %v649_v54 = vrot.slane %v4017_v50, 7  ;;  %v1373_v20 = vld [vmem:[#allocation2 + $0x488] sm:$0x3f] }
  0x68   : > { %6815 = vst [vmem:[#allocation55_spill] sm:$0xff] %v4264_v9  ;;  %729 = vst [vmem:[#allocation2 + $0x160] sm:$0xff] %v712_v19  ;;  %v4279_v36 = vmul.f32 %v4264_v9, %v712_v19  ;;  %v1255_v31 = vadd.f32 %v1227_v8, %v1166_v11  ;;  %v1316_v30 = vmul.f32 %v4011_v49, %v1284_v10  ;;  %v650_v10 = vrot.slane %v4020_v51, 7 }
  0x69   : > { %6816 = vst [vmem:[#allocation56_spill] sm:$0xff] %v4273_v23  ;;  %6817 = vst [vmem:[#allocation57_spill] sm:$0xff] %v4276_v61  ;;  %v4282_v32 = vadd.f32 %v1145_v24, %v4130_v7  ;;  %v713_v29 = vsel %vm639_vm1, 0.0, %v649_v54  ;;  %v1405_v8 = vmul.f32 %v4047_v2, %v1373_v20  ;;  %v653_v61 = vrot.slane %v4070_v14, 7 }
  0x6a   : > { %730 = vst [vmem:[#allocation2 + $0x168] sm:$0x3f] %v648_v28  ;;  %6818 = vst [vmem:[#allocation58_spill] sm:$0xff] %v4279_v36  ;;  %v1147_v23 = vmul.f32 %v3995_v44, %v713_v29  ;;  %v4289_v28 = vmul.f32 %v4050_v3, %v713_v29  ;;  %v4292_v19 = vmul.f32 %v4238_v18, %v713_v29  ;;  %v652_v36 = vrot.slane %v4023_v52, 7 }
  0x6b   : > { %731 = vst [vmem:[#allocation2 + $0x170] sm:$0xff] %v713_v29  ;;  %v4295_v7 = vmul.f32 %v4264_v9, %v713_v29  ;;  %v1344_v24 = vadd.f32 %v1316_v30, %v1255_v31  ;;  %v651_v29 = vsel %vm639_vm1, %v649_v54, %v650_v10  ;;  %v545_v20 = vrot.slane %v4099_v27, 6 }
  0x6c   : > { %6819 = vst [vmem:[#allocation59_spill] sm:$0xff] %v4289_v28  ;;  %6820 = vst [vmem:[#allocation60_spill] sm:$0xff] %v4292_v19  ;;  %v4299_v11 = vadd.f32 %v1147_v23, %v4147_v26  ;;  %v655_v28 = vrot.slane %v4073_v15, 7  ;;  %v658_v19 = vrot.slane %v4089_v21, 7  ;;  %v4309_v31 = vsel %vm639_vm1, 0.0, %v652_v36 }
  0x6d   : > { %6821 = vst [vmem:[#allocation61_spill] sm:$0xff] %v4295_v7  ;;  %6822 = vst [vmem:[#allocation62_spill] sm:$0xff] %v4309_v31  ;;  %v654_v26 = vsel %vm639_vm1, %v652_v36, %v653_v61  ;;  %v1433_v23 = vadd.f32 %v1405_v8, %v1344_v24  ;;  %v1149_v30 = vmul.f32 %v3995_v44, %v4309_v31  ;;  %v6824_v61 = vrot.slane %v4089_v21, 6  ;;  %v1462_v8 = vld [vmem:[#allocation2 + $0x18] sm:$0x3f] }
  0x6e   : > { %732 = vst [vmem:[#allocation2 + $0x178] sm:$0x3f] %v651_v29  ;;  %733 = vst [vmem:[#allocation2 + $0x180] sm:$0xff] %v4309_v31  ;;  %v4318_v7 = vrot.slane %v4161_v33, %v4031_v56  ;;  %v715_v54 = vsel %vm639_vm1, 0.0, %v655_v28  ;;  %v657_v10 = vsel %vm639_vm1, %v655_v28, %v656_v57  ;;  %v716_v36 = vsel %vm639_vm1, 0.0, %v658_v19 }
  0x6f   : > { %734 = vst [vmem:[#allocation2 + $0x188] sm:$0x3f] %v654_v26  ;;  %v546_v24 = vsel %vm525_vm0, %v6824_v61, %v545_v20  ;;  %v1177_v29 = vadd.f32 %v1149_v30, %v4166_v62  ;;  %v1151_v25 = vmul.f32 %v3995_v44, %v715_v54  ;;  %v4329_v26 = vmul.f32 %v4050_v3, %v715_v54  ;;  %v1019_v30 = vld [vmem:[#allocation2 + $0x18] sm:$0x3f] }
  0x70   : > { %6823 = vst [vmem:[#allocation63_spill] sm:$0xff] %v4318_v7  ;;  %v4332_v58 = vmul.f32 %v4238_v18, %v715_v54  ;;  %736 = vst [vmem:[#allocation2 + $0x198] sm:$0x3f] %v657_v10  ;;  %v4335_v57 = vmul.f32 %v4264_v9, %v715_v54  ;;  %v4338_v28 = vmul.f32 %v4318_v7, %v715_v54  ;;  %v1108_v61 = vld [vmem:[#allocation2 + $0x138] sm:$0x3f] }
  0x71   : > { %6825 = vst [vmem:[#allocation64_spill] sm:$0xff] %v4329_v26  ;;  %624 = vst [vmem:[#allocation2 + $0x88] sm:$0x3f] %v546_v24  ;;  %v1153_v20 = vmul.f32 %v3995_v44, %v716_v36  ;;  %v4342_v62 = vmul.f32 %v4050_v3, %v716_v36  ;;  %v1179_v26 = vadd.f32 %v1151_v25, %v4188_v5  ;;  %v1197_v25 = vld [vmem:[#allocation2 + $0x258] sm:$0x3f] }
  0x72   : > { %6826 = vst [vmem:[#allocation65_spill] sm:$0xff] %v4332_v58  ;;  %6827 = vst [vmem:[#allocation66_spill] sm:$0xff] %v4335_v57  ;;  %v4346_v55 = vmul.f32 %v4238_v18, %v716_v36  ;;  %v4349_v10 = vmul.f32 %v4264_v9, %v716_v36  ;;  %v4352_v24 = vmul.f32 %v4318_v7, %v716_v36  ;;  %v659_v57 = vrot.slane %v4099_v27, 7  ;;  %v1551_v58 = vld [vmem:[#allocation2 + $0x138] sm:$0x3f] }
  0x73   : > { %6828 = vst [vmem:[#allocation67_spill] sm:$0xff] %v4338_v28  ;;  %6829 = vst [vmem:[#allocation68_spill] sm:$0xff] %v4342_v62  ;;  %v1494_v54 = vmul.f32 %v4044_v0, %v1462_v8  ;;  %v1181_v28 = vadd.f32 %v1153_v20, %v4219_v37  ;;  %v1230_v62 = vmul.f32 %v4008_v48, %v3977_v38  ;;  %v1640_v37 = vld [vmem:[#allocation2 + $0x258] sm:$0x3f] }
  0x74   : > { %6830 = vst [vmem:[#allocation69_spill] sm:$0xff] %v4346_v55  ;;  %6831 = vst [vmem:[#allocation70_spill] sm:$0xff] %v4349_v10  ;;  %v1051_v5 = vmul.f32 %v3992_v43, %v1019_v30  ;;  %v1140_v55 = vmul.f32 %v3995_v44, %v1108_v61  ;;  %v660_v10 = vsel %vm639_vm1, %v658_v19, %v659_v57  ;;  %v1818_v31 = vld [vmem:[#allocation2 + $0x498] sm:$0x3f] }
  0x75   : > { %6832 = vst [vmem:[#allocation71_spill] sm:$0xff] %v4352_v24  ;;  %v1522_v59 = vadd.f32 %v1494_v54, %v1433_v23  ;;  %738 = vst [vmem:[#allocation2 + $0x1a8] sm:$0x3f] %v660_v10  ;;  %v1583_v36 = vmul.f32 %v4050_v3, %v1551_v58  ;;  %v4364_v8 = vadd.f32 %v1230_v62, %v4250_v41  ;;  %v1729_v62 = vld [vmem:[#allocation2 + $0x378] sm:$0x3f] }
  0x76   : > { %v1229_v20 = vmul.f32 %v4008_v48, %v1197_v25  ;;  %v1232_v24 = vmul.f32 %v4008_v48, %v3980_v39  ;;  %v1234_v30 = vmul.f32 %v4008_v48, %v4002_v46  ;;  %v1168_v61 = vadd.f32 %v1140_v55, %v1051_v5 }
  0x77   : > { %v1611_v23 = vadd.f32 %v1583_v36, %v1522_v59  ;;  %v1236_v19 = vmul.f32 %v4008_v48, %v4017_v50  ;;  %v1238_v58 = vmul.f32 %v4008_v48, %v4023_v52  ;;  %v1672_v41 = vmul.f32 %v4053_v4, %v1640_v37 }
  0x78   : > { %v1240_v57 = vmul.f32 %v4008_v48, %v4073_v15  ;;  %v1318_v10 = vmul.f32 %v4011_v49, %v1286_v60  ;;  %v1242_v54 = vmul.f32 %v4008_v48, %v4089_v21  ;;  %v4382_v55 = vadd.f32 %v1232_v24, %v4269_v53 }
  0x79   : > { %v4385_v59 = vadd.f32 %v1234_v30, %v4282_v32  ;;  %v1257_v5 = vadd.f32 %v1229_v20, %v1168_v61  ;;  %v1700_v25 = vadd.f32 %v1672_v41, %v1611_v23  ;;  %v4388_v36 = vadd.f32 %v1236_v19, %v4299_v11  ;;  %v1464_v20 = vld [vmem:[#allocation2 + $0x28] sm:$0x3f] }
  0x7a   : > { %v4390_v37 = vadd.f32 %v1238_v58, %v1177_v29  ;;  %v1761_v27 = vmul.f32 %v4058_v6, %v1729_v62  ;;  %v4393_v60 = vadd.f32 %v1240_v57, %v1179_v26  ;;  %v4395_v21 = vadd.f32 %v1242_v54, %v1181_v28  ;;  %v2373_v29 = vld [vmem:[#allocation2 + $0x108] sm:$0x3f]  ;;  %v1023_v26 = vld [vmem:[#allocation2 + $0x38] sm:$0x3f]  ;;  %v444_v62 = vld [vmem:[%s3974_s20 + $0x80] sm:$0xff] }
  0x7b   : > { %v1673_v32 = vmul.f32 %v4053_v4, %v3977_v38  ;;  %v1346_v53 = vadd.f32 %v1318_v10, %v1257_v5  ;;  %v1407_v24 = vmul.f32 %v4047_v2, %v1375_v34  ;;  %v1850_v30 = vmul.f32 %v4066_v12, %v1818_v31  ;;  %v1021_v61 = vld [vmem:[#allocation2 + $0x28] sm:$0x3f]  ;;  %v1466_v57 = vld [vmem:[#allocation2 + $0x38] sm:$0x3f]  ;;  %770 = vst [vmem:[#allocation2 + $0x2e0] sm:$0xff] %v444_v62 }
  0x7c   : > { %v1789_v11 = vadd.f32 %v1761_v27, %v1700_v25  ;;  %v1906_v23 = vld [vmem:[#allocation2 + $0x28] sm:$0x3f]  ;;  %v1496_v41 = vmul.f32 %v4044_v0, %v1464_v20  ;;  %v1908_v34 = vld [vmem:[#allocation2 + $0x38] sm:$0x3f]  ;;  %v4412_v5 = vmul.f32 0.0, %v4113_v35  ;;  %v4421_v20 = vmul.f32 %v4044_v0, %v1466_v57 }
  0x7d   : > { %v4402_v19 = vadd.f32 %v1673_v32, %v4253_v13  ;;  %v1435_v28 = vadd.f32 %v1407_v24, %v1346_v53  ;;  %v4407_v10 = vld [vmem:[%s3974_s20 + $0x88] sm:$0x3f]  ;;  %v2347_v27 = vld [vmem:[#allocation2 + $0x38] sm:$0x3f]  ;;  %v1938_v31 = vmul.f32 %v4080_v17, %v1906_v23  ;;  %v4415_v24 = vmul.f32 %v3992_v43, %v1021_v61 }
  0x7e   : > { %v1878_v58 = vadd.f32 %v1850_v30, %v1789_v11  ;;  %6833 = vst [vmem:[#allocation72_spill] sm:$0xff] %v4407_v10  ;;  %v1025_v54 = vld [vmem:[#allocation2 + $0x48] sm:$0x3f]  ;;  %771 = vst [vmem:[#allocation2 + $0x2e8] sm:$0x3f] %v4407_v10  ;;  %v4418_v11 = vmul.f32 %v3992_v43, %v1023_v26  ;;  %v4424_v30 = vmul.f32 %v4113_v35, %v2373_v29 }
  0x7f   : > { %6834 = vst [vmem:[#allocation73_spill] sm:$0xff] %v4412_v5  ;;  %v1468_v13 = vld [vmem:[#allocation2 + $0x48] sm:$0x3f]  ;;  %6835 = vst [vmem:[#allocation74_spill] sm:$0xff] %v4421_v20  ;;  %v1027_v23 = vld [vmem:[#allocation2 + $0x58] sm:$0x3f]  ;;  %v4426_v5 = vadd.f32 %v1496_v41, %v1435_v28  ;;  %v4431_v4 = vmul.f32 %v4080_v17, %v1908_v34  ;;  %v4434_v61 = vmul.f32 %v4113_v35, %v2347_v27 }
  0x80   : > { %v1910_v25 = vld [vmem:[#allocation2 + $0x48] sm:$0x3f]  ;;  %6836 = vst [vmem:[#allocation75_spill] sm:$0xff] %v4424_v30  ;;  %v1470_v62 = vld [vmem:[#allocation2 + $0x58] sm:$0x3f]  ;;  %v4428_v10 = vadd.f32 %v1938_v31, %v1878_v58  ;;  %v4437_v57 = vmul.f32 %v3992_v43, %v1025_v54  ;;  %v4440_v29 = vmul.f32 %v4044_v0, %v1468_v13  ;;  %v4449_v27 = vmul.f32 %v3992_v43, %v1027_v23 }
  0x81   : > { %v2349_v32 = vld [vmem:[#allocation2 + $0x48] sm:$0x3f]  ;;  %6837 = vst [vmem:[#allocation76_spill] sm:$0xff] %v4431_v4  ;;  %6838 = vst [vmem:[#allocation77_spill] sm:$0xff] %v4434_v61  ;;  %v1912_v26 = vld [vmem:[#allocation2 + $0x58] sm:$0x3f]  ;;  %v4443_v28 = vmul.f32 %v4080_v17, %v1910_v25  ;;  %v4452_v31 = vmul.f32 %v4044_v0, %v1470_v62 }
  0x82   : > { %v2816_v53 = vld [vmem:[#allocation2 + $0x108] sm:$0x3f]  ;;  %v2351_v12 = vld [vmem:[#allocation2 + $0x58] sm:$0x3f]  ;;  %6839 = vst [vmem:[#allocation78_spill] sm:$0xff] %v4440_v29  ;;  %v4446_v58 = vmul.f32 %v4113_v35, %v2349_v32  ;;  %v4455_v54 = vmul.f32 0.0, %v4170_v1  ;;  %v4461_v61 = vmul.f32 %v4080_v17, %v1912_v26 }
  0x83   : > { %v2462_v2 = vld [vmem:[#allocation2 + $0x228] sm:$0x3f]  ;;  %6840 = vst [vmem:[#allocation79_spill] sm:$0xff] %v4443_v28  ;;  %6842 = vst [vmem:[#allocation81_spill] sm:$0xff] %v4452_v31  ;;  %v4458_v13 = vmul.f32 %v4170_v1, %v2816_v53  ;;  %v4464_v32 = vmul.f32 %v4113_v35, %v2351_v12  ;;  %v4467_v23 = vmul.f32 0.0, %v4264_v9  ;;  %v6672_v62 = vrot.slane %v4092_v22, 6 }
  0x84   : > { %6841 = vst [vmem:[#allocation80_spill] sm:$0xff] %v4446_v58  ;;  %v1029_v41 = vld [vmem:[#allocation2 + $0x68] sm:$0x3f]  ;;  %6843 = vst [vmem:[#allocation82_spill] sm:$0xff] %v4455_v54  ;;  %v4477_v53 = vmul.f32 %v4264_v9, %v2462_v2  ;;  %v4480_v26 = vmul.f32 0.0, %v4318_v7 }
  0x85   : > { %v1472_v34 = vld [vmem:[#allocation2 + $0x68] sm:$0x3f]  ;;  %6844 = vst [vmem:[#allocation83_spill] sm:$0xff] %v4458_v13  ;;  %6845 = vst [vmem:[#allocation84_spill] sm:$0xff] %v4461_v61  ;;  %v4471_v58 = vmul.f32 %v3992_v43, %v1029_v41  ;;  %v603_v41 = vsel %vm525_vm0, 0.0, %v6672_v62 }
  0x86   : > { %v1914_v30 = vld [vmem:[#allocation2 + $0x68] sm:$0x3f]  ;;  %6846 = vst [vmem:[#allocation85_spill] sm:$0xff] %v4464_v32  ;;  %6847 = vst [vmem:[#allocation86_spill] sm:$0xff] %v4467_v23  ;;  %v4474_v54 = vmul.f32 %v4044_v0, %v1472_v34  ;;  %v6674_v23 = vrot.slane %v4092_v22, 7  ;;  %v1066_v32 = vmul.f32 %v3992_v43, %v603_v41  ;;  %v4494_v2 = vmul.f32 %v4044_v0, %v603_v41 }
  0x87   : > { %v2353_v25 = vld [vmem:[#allocation2 + $0x68] sm:$0x3f]  ;;  %6849 = vst [vmem:[#allocation88_spill] sm:$0xff] %v4477_v53  ;;  %6850 = vst [vmem:[#allocation89_spill] sm:$0xff] %v4480_v26  ;;  %v4483_v12 = vmul.f32 %v4080_v17, %v1914_v30  ;;  %v4497_v53 = vmul.f32 %v4080_v17, %v603_v41  ;;  %v4500_v30 = vmul.f32 %v4113_v35, %v603_v41  ;;  %v783_v26 = vrot.slane %v3977_v38, 1 }
  0x88   : > { %6848 = vst [vmem:[#allocation87_spill] sm:$0xff] %v4474_v54  ;;  %v4486_v13 = vmul.f32 %v4113_v35, %v2353_v25  ;;  %v2796_v34 = vld [vmem:[#allocation2 + $0x68] sm:$0x3f]  ;;  %6853 = vst [vmem:[#allocation92_spill] sm:$0xff] %v4494_v2  ;;  %v4503_v25 = vmul.f32 %v4170_v1, %v603_v41  ;;  %v717_v62 = vsel %vm639_vm1, 0.0, %v6674_v23 }
  0x89   : > { %6851 = vst [vmem:[#allocation90_spill] sm:$0xff] %v4483_v12  ;;  %6854 = vst [vmem:[#allocation93_spill] sm:$0xff] %v4497_v53  ;;  %v1155_v12 = vmul.f32 %v3995_v44, %v717_v62  ;;  %v4512_v61 = vmul.f32 %v4050_v3, %v717_v62  ;;  %v4515_v4 = vmul.f32 %v4238_v18, %v717_v62  ;;  %v1553_v29 = vld [vmem:[#allocation2 + $0x148] sm:$0x3f] }
  0x8a   : > { %6852 = vst [vmem:[#allocation91_spill] sm:$0xff] %v4486_v13  ;;  %6855 = vst [vmem:[#allocation94_spill] sm:$0xff] %v4500_v30  ;;  %v784_v13 = vrot.slane %v3988_v42, 1  ;;  %v4518_v28 = vmul.f32 %v4264_v9, %v717_v62  ;;  %v4521_v41 = vmul.f32 %v4170_v1, %v2796_v34  ;;  %v4524_v23 = vmul.f32 %v4318_v7, %v717_v62  ;;  %v1994_v20 = vld [vmem:[#allocation2 + $0x148] sm:$0x3f] }
  0x8b   : > { %6856 = vst [vmem:[#allocation95_spill] sm:$0xff] %v4503_v25  ;;  %6857 = vst [vmem:[#allocation96_spill] sm:$0xff] %v4512_v61  ;;  %v4528_v30 = vadd.f32 %v1155_v12, %v1066_v32  ;;  %v4535_v34 = vrot.slane %v4041_v63, %v4031_v56  ;;  %v787_v62 = vrot.slane %v3999_v45, 1  ;;  %v1031_v32 = vld [vmem:[#allocation2 + $0x78] sm:$0x3f]  ;;  %v792_v56 = vrot.slane %v4017_v50, 1 }
  0x8c   : > { %6858 = vst [vmem:[#allocation97_spill] sm:$0xff] %v4515_v4  ;;  %6859 = vst [vmem:[#allocation98_spill] sm:$0xff] %v4518_v28  ;;  %v785_v38 = vsel %vm782_vm2, %v783_v26, %v784_v13  ;;  %v854_v25 = vsel %vm853_vm3, %v784_v13, 0.0  ;;  %v786_v28 = vrot.slane %v3980_v39, 1  ;;  %v789_v26 = vrot.slane %v4002_v46, 1 }
  0x8d   : > { %6860 = vst [vmem:[#allocation99_spill] sm:$0xff] %v4521_v41  ;;  %6861 = vst [vmem:[#allocation100_spill] sm:$0xff] %v4524_v23  ;;  %v1319_v61 = vmul.f32 %v4011_v49, %v785_v38  ;;  %v1762_v4 = vmul.f32 %v4058_v6, %v785_v38  ;;  %v790_v13 = vrot.slane %v4005_v47, 1  ;;  %v4548_v39 = vrot.slane %v4161_v33, %v3982_v40 }
  0x8e   : > { %869 = vst [vmem:[#allocation2 + $0x380] sm:$0xff] %v785_v38  ;;  %870 = vst [vmem:[#allocation2 + $0x388] sm:$0x3f] %v854_v25  ;;  %v788_v63 = vsel %vm782_vm2, %v786_v28, %v787_v62  ;;  %v855_v25 = vsel %vm853_vm3, %v787_v62, 0.0  ;;  %v793_v38 = vrot.slane %v4020_v51, 1  ;;  %v4564_v50 = vmul.f32 %v3992_v43, %v1031_v32 }
  0x8f   : > { %6862 = vst [vmem:[#allocation101_spill] sm:$0xff] %v4535_v34  ;;  %v4541_v12 = vadd.f32 %v1319_v61, %v4364_v8  ;;  %v4544_v41 = vadd.f32 %v1762_v4, %v4402_v19  ;;  %6863 = vst [vmem:[#allocation102_spill] sm:$0xff] %v4548_v39  ;;  %v791_v46 = vsel %vm782_vm2, %v789_v26, %v790_v13  ;;  %v1474_v61 = vld [vmem:[#allocation2 + $0x78] sm:$0x3f]  ;;  %v1110_v62 = vld [vmem:[#allocation2 + $0x148] sm:$0x3f] }
  0x90   : > { %871 = vst [vmem:[#allocation2 + $0x390] sm:$0xff] %v788_v63  ;;  %v1321_v8 = vmul.f32 %v4011_v49, %v788_v63  ;;  %v4557_v4 = vmul.f32 %v4058_v6, %v788_v63  ;;  %v4560_v19 = vmul.f32 %v4535_v34, %v788_v63  ;;  %872 = vst [vmem:[#allocation2 + $0x398] sm:$0x3f] %v855_v25  ;;  %v1916_v28 = vld [vmem:[#allocation2 + $0x78] sm:$0x3f]  ;;  %v856_v31 = vsel %vm853_vm3, %v790_v13, 0.0 }
  0x91   : > { %873 = vst [vmem:[#allocation2 + $0x3a0] sm:$0xff] %v791_v46  ;;  %v1323_v40 = vmul.f32 %v4011_v49, %v791_v46  ;;  %v4567_v26 = vmul.f32 %v4058_v6, %v791_v46  ;;  %v4570_v23 = vmul.f32 %v4535_v34, %v791_v46  ;;  %v4573_v53 = vmul.f32 %v4548_v39, %v791_v46  ;;  %v2355_v63 = vld [vmem:[#allocation2 + $0x78] sm:$0x3f] }
  0x92   : > { %v2798_v25 = vld [vmem:[#allocation2 + $0x78] sm:$0x3f]  ;;  %v4576_v54 = vadd.f32 %v1321_v8, %v4382_v55  ;;  %v794_v2 = vsel %vm782_vm2, %v792_v56, %v793_v38  ;;  %874 = vst [vmem:[#allocation2 + $0x3a8] sm:$0x3f] %v856_v31  ;;  %v4594_v13 = vmul.f32 %v4044_v0, %v1474_v61  ;;  %v4597_v56 = vmul.f32 %v4080_v17, %v1916_v28 }
  0x93   : > { %6864 = vst [vmem:[#allocation103_spill] sm:$0xff] %v4567_v26  ;;  %6865 = vst [vmem:[#allocation104_spill] sm:$0xff] %v4570_v23  ;;  %v4579_v32 = vadd.f32 %v1323_v40, %v4385_v59  ;;  %v1112_v51 = vld [vmem:[#allocation2 + $0x158] sm:$0x3f]  ;;  %v1325_v46 = vmul.f32 %v4011_v49, %v794_v2  ;;  %v4588_v55 = vmul.f32 %v4535_v34, %v794_v2  ;;  %v857_v23 = vsel %vm853_vm3, %v793_v38, 0.0 }
  0x94   : > { %6866 = vst [vmem:[#allocation105_spill] sm:$0xff] %v4573_v53  ;;  %875 = vst [vmem:[#allocation2 + $0x3b0] sm:$0xff] %v794_v2  ;;  %v4585_v53 = vmul.f32 %v4058_v6, %v794_v2  ;;  %v4591_v59 = vmul.f32 %v4548_v39, %v794_v2  ;;  %v1142_v31 = vmul.f32 %v3995_v44, %v1110_v62  ;;  %v1555_v8 = vld [vmem:[#allocation2 + $0x158] sm:$0x3f]  ;;  %v795_v61 = vrot.slane %v4023_v52, 1 }
  0x95   : > { %6868 = vst [vmem:[#allocation107_spill] sm:$0xff] %v4588_v55  ;;  %6870 = vst [vmem:[#allocation109_spill] sm:$0xff] %v4594_v13  ;;  %v1996_v40 = vld [vmem:[#allocation2 + $0x158] sm:$0x3f]  ;;  %v4603_v26 = vmul.f32 %v4113_v35, %v2355_v63  ;;  %v1114_v55 = vld [vmem:[#allocation2 + $0x168] sm:$0x3f]  ;;  %v4606_v2 = vadd.f32 %v1325_v46, %v4388_v36  ;;  %v4611_v62 = vmul.f32 %v4170_v1, %v2798_v25 }
  0x96   : > { %6867 = vst [vmem:[#allocation106_spill] sm:$0xff] %v4585_v53  ;;  %6869 = vst [vmem:[#allocation108_spill] sm:$0xff] %v4591_v59  ;;  %v446_v53 = vld [vmem:[%s3974_s20 + $0x90] sm:$0xff]  ;;  %v796_v28 = vrot.slane %v4070_v14, 1  ;;  %v1585_v59 = vmul.f32 %v4050_v3, %v1553_v29  ;;  %v2026_v38 = vmul.f32 %v4238_v18, %v1994_v20  ;;  %v798_v63 = vrot.slane %v4073_v15, 1 }
  0x97   : > { %6871 = vst [vmem:[#allocation110_spill] sm:$0xff] %v4597_v56  ;;  %6872 = vst [vmem:[#allocation111_spill] sm:$0xff] %v4603_v26  ;;  %v4617_v26 = vld [vmem:[%s3974_s20 + $0x98] sm:$0x3f]  ;;  %v1144_v36 = vmul.f32 %v3995_v44, %v1112_v51  ;;  %v4624_v52 = vmul.f32 %v4238_v18, %v1996_v40  ;;  %v4629_v29 = vadd.f32 %v1142_v31, %v4415_v24  ;;  %v1998_v40 = vld [vmem:[#allocation2 + $0x168] sm:$0x3f] }
  0x98   : > { %876 = vst [vmem:[#allocation2 + $0x3b8] sm:$0x3f] %v857_v23  ;;  %772 = vst [vmem:[#allocation2 + $0x2f0] sm:$0xff] %v446_v53  ;;  %v4621_v23 = vmul.f32 %v4050_v3, %v1555_v8  ;;  %v1199_v53 = vld [vmem:[#allocation2 + $0x268] sm:$0x3f]  ;;  %v797_v25 = vsel %vm782_vm2, %v795_v61, %v796_v28  ;;  %v1146_v15 = vmul.f32 %v3995_v44, %v1114_v55  ;;  %v799_v8 = vrot.slane %v4076_v16, 1 }
  0x99   : > { %6873 = vst [vmem:[#allocation112_spill] sm:$0xff] %v4611_v62  ;;  %6874 = vst [vmem:[#allocation113_spill] sm:$0xff] %v4617_v26  ;;  %v2436_v20 = vld [vmem:[#allocation2 + $0x158] sm:$0x3f]  ;;  %v1327_v51 = vmul.f32 %v4011_v49, %v797_v25  ;;  %v1557_v62 = vld [vmem:[#allocation2 + $0x168] sm:$0x3f]  ;;  %v4638_v61 = vmul.f32 %v4535_v34, %v797_v25  ;;  %v4641_v24 = vmul.f32 %v4548_v39, %v797_v25 }
  0x9a   : > { %6875 = vst [vmem:[#allocation114_spill] sm:$0xff] %v4621_v23  ;;  %6876 = vst [vmem:[#allocation115_spill] sm:$0xff] %v4624_v52  ;;  %v1201_v46 = vld [vmem:[#allocation2 + $0x278] sm:$0x3f]  ;;  %v4635_v52 = vmul.f32 %v4058_v6, %v797_v25  ;;  %v858_v31 = vsel %vm853_vm3, %v796_v28, 0.0  ;;  %v4645_v55 = vadd.f32 %v1585_v59, %v4426_v5  ;;  %v4654_v23 = vsel %vm782_vm2, %v798_v63, %v799_v8 }
  0x9b   : > { %773 = vst [vmem:[#allocation2 + $0x2f8] sm:$0x3f] %v4617_v26  ;;  %877 = vst [vmem:[#allocation2 + $0x3c0] sm:$0xff] %v797_v25  ;;  %v4648_v26 = vadd.f32 %v2026_v38, %v4428_v10  ;;  %v2438_v56 = vld [vmem:[#allocation2 + $0x168] sm:$0x3f]  ;;  %v4651_v13 = vadd.f32 %v1327_v51, %v4390_v37  ;;  %v4657_v16 = vadd.f32 %v1144_v36, %v4418_v11 }
  0x9c   : > { %6877 = vst [vmem:[#allocation116_spill] sm:$0xff] %v4635_v52  ;;  %6878 = vst [vmem:[#allocation117_spill] sm:$0xff] %v4638_v61  ;;  %v4660_v25 = vmul.f32 %v4264_v9, %v2436_v20  ;;  %v1203_v28 = vld [vmem:[#allocation2 + $0x288] sm:$0x3f]  ;;  %v4663_v5 = vmul.f32 %v4008_v48, %v1199_v53  ;;  %v1329_v37 = vmul.f32 %v4011_v49, %v4654_v23  ;;  %v1205_v11 = vld [vmem:[#allocation2 + $0x298] sm:$0x3f] }
  0x9d   : > { %6879 = vst [vmem:[#allocation118_spill] sm:$0xff] %v4641_v24  ;;  %6880 = vst [vmem:[#allocation119_spill] sm:$0xff] %v4648_v26  ;;  %v4669_v10 = vmul.f32 %v4050_v3, %v1557_v62  ;;  %v4672_v59 = vmul.f32 %v4238_v18, %v1998_v40  ;;  %v1207_v38 = vld [vmem:[#allocation2 + $0x2a8] sm:$0x3f]  ;;  %v4675_v63 = vmul.f32 %v4008_v48, %v1201_v46  ;;  %v1116_v51 = vld [vmem:[#allocation2 + $0x178] sm:$0x3f] }
  0x9e   : > { %6881 = vst [vmem:[#allocation120_spill] sm:$0xff] %v4651_v13  ;;  %878 = vst [vmem:[#allocation2 + $0x3c8] sm:$0x3f] %v858_v31  ;;  %v1244_v36 = vmul.f32 %v4008_v48, %v4092_v22  ;;  %v4680_v53 = vadd.f32 %v1146_v15, %v4437_v57  ;;  %v4683_v20 = vmul.f32 %v4264_v9, %v2438_v56  ;;  %v6887_v62 = vld [vmem:[#allocation62_spill] sm:$0xff]  ;;  %v1209_v46 = vld [vmem:[#allocation2 + $0x2b8] sm:$0x3f] }
  0x9f   : > { %6882 = vst [vmem:[#allocation121_spill] sm:$0xff] %v4654_v23  ;;  %6883 = vst [vmem:[#allocation122_spill] sm:$0xff] %v4660_v25  ;;  %v4687_v31 = vmul.f32 %v4050_v3, %v6887_v62  ;;  %v4691_v40 = vmul.f32 %v4238_v18, %v6887_v62  ;;  %v1559_v25 = vld [vmem:[#allocation2 + $0x178] sm:$0x3f]  ;;  %v4698_v57 = vmul.f32 %v4008_v48, %v1203_v28  ;;  %v859_v15 = vsel %vm853_vm3, %v799_v8, 0.0  ;;  %v6894_v8 = vld [vmem:[#allocation44_spill] sm:$0xff] }
  0xa0   : > { %879 = vst [vmem:[#allocation2 + $0x3d0] sm:$0xff] %v4654_v23  ;;  %6884 = vst [vmem:[#allocation123_spill] sm:$0xff] %v4669_v10  ;;  %v4695_v10 = vmul.f32 %v4264_v9, %v6887_v62  ;;  %v4701_v56 = vadd.f32 %v1329_v37, %v4393_v60  ;;  %v1211_v23 = vld [vmem:[#allocation2 + $0x2c8] sm:$0x3f]  ;;  %v4705_v24 = vmul.f32 %v4008_v48, %v1205_v11  ;;  %v6892_v52 = vld [vmem:[#allocation25_spill] sm:$0xff] }
  0xa1   : > { %6885 = vst [vmem:[#allocation124_spill] sm:$0xff] %v4672_v59  ;;  %6886 = vst [vmem:[#allocation125_spill] sm:$0xff] %v4683_v20  ;;  %v2000_v59 = vld [vmem:[#allocation2 + $0x178] sm:$0x3f]  ;;  %v1118_v20 = vld [vmem:[#allocation2 + $0x188] sm:$0x3f]  ;;  %v4708_v61 = vmul.f32 %v4008_v48, %v1207_v38  ;;  %v1148_v28 = vmul.f32 %v3995_v44, %v1116_v51  ;;  %v4714_v37 = vmul.f32 %v4008_v48, %v1209_v46 }
  0xa2   : > { %6888 = vst [vmem:[#allocation62_spill] sm:$0xff] %v4687_v31  ;;  %6889 = vst [vmem:[#allocation126_spill] sm:$0xff] %v4691_v40  ;;  %v801_v62 = vrot.slane %v6892_v52, 1  ;;  %v2440_v60 = vld [vmem:[#allocation2 + $0x178] sm:$0x3f]  ;;  %v4718_v11 = vadd.f32 %v1244_v36, %v4528_v30  ;;  %v4721_v38 = vmul.f32 %v4050_v3, %v1559_v25  ;;  %v662_v51 = vrot.slane %v6894_v8, 7 }
  0xa3   : > { %6890 = vst [vmem:[#allocation127_spill] sm:$0xff] %v4695_v10  ;;  %6891 = vst [vmem:[#allocation128_spill] sm:$0xff] %v4701_v56  ;;  %v6893_v10 = vld [vmem:[#allocation26_spill] sm:$0xff]  ;;  %v548_v56 = vrot.slane %v6894_v8, 6  ;;  %v1561_v52 = vld [vmem:[#allocation2 + $0x188] sm:$0x3f]  ;;  %v1150_v40 = vmul.f32 %v3995_v44, %v1118_v20  ;;  %v4730_v31 = vmul.f32 %v4008_v48, %v1211_v23 }
  0xa4   : > { %880 = vst [vmem:[#allocation2 + $0x3d8] sm:$0x3f] %v859_v15  ;;  %v802_v13 = vrot.slane %v6893_v10, 1  ;;  %6895 = vst [vmem:[#allocation25_spill] sm:$0xff] %v4718_v11  ;;  %v4724_v15 = vmul.f32 %v4238_v18, %v2000_v59  ;;  %v2002_v46 = vld [vmem:[#allocation2 + $0x188] sm:$0x3f]  ;;  %v4738_v59 = vmul.f32 %v4264_v9, %v2440_v60 }
  0xa5   : > { %6896 = vst [vmem:[#allocation129_spill] sm:$0xff] %v4721_v38  ;;  %v6898_v26 = vld [vmem:[#allocation16_spill] sm:$0xff]  ;;  %v2442_v36 = vld [vmem:[#allocation2 + $0x188] sm:$0x3f]  ;;  %v2004_v8 = vld [vmem:[#allocation2 + $0x198] sm:$0x3f] }
  0xa6   : > { %6897 = vst [vmem:[#allocation130_spill] sm:$0xff] %v4724_v15  ;;  %v803_v10 = vsel %vm782_vm2, %v801_v62, %v802_v13  ;;  %v4734_v30 = vrot.slane %v4161_v33, %v6898_v26  ;;  %6900 = vst [vmem:[#allocation131_spill] sm:$0xff] %v4738_v59  ;;  %v2885_v15 = vld [vmem:[#allocation2 + $0x188] sm:$0x3f]  ;;  %v1120_v62 = vld [vmem:[#allocation2 + $0x198] sm:$0x3f]  ;;  %v4750_v33 = vmul.f32 %v4050_v3, %v1561_v52 }
  0xa7   : > { %v1331_v25 = vmul.f32 %v4011_v49, %v803_v10  ;;  %v4741_v11 = vmul.f32 %v4058_v6, %v803_v10  ;;  %v4744_v20 = vmul.f32 %v4535_v34, %v803_v10  ;;  %v4747_v23 = vmul.f32 %v4548_v39, %v803_v10  ;;  %v1563_v26 = vld [vmem:[#allocation2 + $0x198] sm:$0x3f] }
  0xa8   : > { %6899 = vst [vmem:[#allocation16_spill] sm:$0xff] %v4734_v30  ;;  %6904 = vst [vmem:[#allocation135_spill] sm:$0xff] %v4750_v33  ;;  %v2444_v38 = vld [vmem:[#allocation2 + $0x198] sm:$0x3f]  ;;  %v4756_v59 = vmul.f32 %v4734_v30, %v803_v10  ;;  %v1033_v33 = vld [vmem:[#allocation2 + $0x88] sm:$0x3f] }
  0xa9   : > { %6901 = vst [vmem:[#allocation132_spill] sm:$0xff] %v4741_v11  ;;  %6902 = vst [vmem:[#allocation133_spill] sm:$0xff] %v4744_v20  ;;  %v4753_v60 = vadd.f32 %v1331_v25, %v4395_v21  ;;  %v6907_v11 = vrot.slane %v4092_v22, 6  ;;  %v4762_v20 = vadd.f32 %v1148_v28, %v4449_v27  ;;  %v2887_v52 = vld [vmem:[#allocation2 + $0x198] sm:$0x3f]  ;;  %v6909_v34 = vrot.slane %v4092_v22, 7 }
  0xaa   : > { %6903 = vst [vmem:[#allocation134_spill] sm:$0xff] %v4747_v23  ;;  %6906 = vst [vmem:[#allocation137_spill] sm:$0xff] %v4756_v59  ;;  %v4765_v23 = vmul.f32 %v4238_v18, %v2002_v46  ;;  %v860_v10 = vsel %vm853_vm3, %v802_v13, 0.0  ;;  %v4772_v25 = vadd.f32 %v1150_v40, %v4471_v58  ;;  %v4778_v27 = vmul.f32 %v4318_v7, %v2885_v15  ;;  %v4794_v40 = vld [vmem:[#allocation2 + $0x260] sm:$0xff]  ;;  %v6916_v59 = vld [vmem:[#allocation15_spill] sm:$0xff] }
  0xab   : > { %6905 = vst [vmem:[#allocation136_spill] sm:$0xff] %v4753_v60  ;;  %v549_v48 = vsel %vm525_vm0, %v6907_v11, %v548_v56  ;;  %v663_v21 = vsel %vm639_vm1, %v6909_v34, %v662_v51  ;;  %v4775_v56 = vmul.f32 %v4264_v9, %v2442_v36  ;;  %v1152_v28 = vmul.f32 %v3995_v44, %v1120_v62  ;;  %v1476_v51 = vld [vmem:[#allocation2 + $0x88] sm:$0x3f]  ;;  %v4803_v62 = vld [vmem:[#allocation2 + $0x280] sm:$0xff] }
  0xac   : > { %6908 = vst [vmem:[#allocation138_spill] sm:$0xff] %v4765_v23  ;;  %626 = vst [vmem:[#allocation2 + $0x98] sm:$0x3f] %v549_v48  ;;  %v4782_v48 = vmul.f32 %v4050_v3, %v1563_v26  ;;  %v4785_v22 = vmul.f32 %v4238_v18, %v2004_v8  ;;  %v4788_v34 = vmul.f32 %v4264_v9, %v2444_v38  ;;  %v898_v11 = vrot.slane %v4794_v40, 2  ;;  %v3775_v38 = vld [vmem:[#allocation2 + $0x270] sm:$0xff] }
  0xad   : > { %6910 = vst [vmem:[#allocation139_spill] sm:$0xff] %v4775_v56  ;;  %6911 = vst [vmem:[#allocation140_spill] sm:$0xff] %v4778_v27  ;;  %v4791_v58 = vmul.f32 %v4318_v7, %v2887_v52  ;;  %v1065_v13 = vmul.f32 %v3992_v43, %v1033_v33  ;;  %v899_v15 = vrot.slane %v3988_v42, 2  ;;  %v4800_v8 = vadd.f32 %v4663_v5, %v4629_v29  ;;  %v1918_v33 = vld [vmem:[#allocation2 + $0x88] sm:$0x3f]  ;;  %v6919_v56 = vld [vmem:[#allocation22_spill] sm:$0xff] }
  0xae   : > { %740 = vst [vmem:[#allocation2 + $0x1b8] sm:$0x3f] %v663_v21  ;;  %882 = vst [vmem:[#allocation2 + $0x3e8] sm:$0x3f] %v860_v10  ;;  %v901_v46 = vrot.slane %v3775_v38, 2  ;;  %v902_v36 = vrot.slane %v3999_v45, 2 }
  0xaf   : > { %6912 = vst [vmem:[#allocation141_spill] sm:$0xff] %v4782_v48  ;;  %6913 = vst [vmem:[#allocation142_spill] sm:$0xff] %v4785_v22  ;;  %v904_v26 = vrot.slane %v4803_v62, 2  ;;  %v1122_v52 = vld [vmem:[#allocation2 + $0x1a8] sm:$0x3f]  ;;  %v900_v21 = vsel %vm897_vm5, %v898_v11, %v899_v15  ;;  %v969_v10 = vsel %vm968_vm4, %v899_v15, 0.0 }
  0xb0   : > { %6914 = vst [vmem:[#allocation143_spill] sm:$0xff] %v4788_v34  ;;  %6915 = vst [vmem:[#allocation144_spill] sm:$0xff] %v4791_v58  ;;  %v3777_v42 = vld [vmem:[%s3966_s17 + $0x8] sm:$0xff]  ;;  %v6918_v45 = vld [vmem:[#allocation18_spill] sm:$0xff]  ;;  %v1851_v22 = vmul.f32 %v6919_v56, %v900_v21  ;;  %v903_v23 = vsel %vm897_vm5, %v901_v46, %v902_v36  ;;  %v970_v11 = vsel %vm968_vm4, %v902_v36, 0.0  ;;  %v6920_v43 = vrot.slane %v4005_v47, 2 }
  0xb1   : > { %v4810_v58 = vrot.slane %v3777_v42, %v6916_v59  ;;  %v2357_v5 = vld [vmem:[#allocation2 + $0x88] sm:$0x3f]  ;;  %984 = vst [vmem:[#allocation2 + $0x4a0] sm:$0xff] %v900_v21  ;;  %v1408_v34 = vmul.f32 %v6918_v45, %v900_v21  ;;  %985 = vst [vmem:[#allocation2 + $0x4a8] sm:$0x3f] %v969_v10  ;;  %v1410_v15 = vmul.f32 %v6918_v45, %v903_v23 }
  0xb2   : > { %v2800_v27 = vld [vmem:[#allocation2 + $0x88] sm:$0x3f]  ;;  %986 = vst [vmem:[#allocation2 + $0x4b0] sm:$0xff] %v903_v23  ;;  %v4819_v48 = vmul.f32 %v6919_v56, %v903_v23  ;;  %987 = vst [vmem:[#allocation2 + $0x4b8] sm:$0x3f] %v970_v11  ;;  %v4827_v60 = vsel %vm897_vm5, %v904_v26, %v6920_v43  ;;  %v1180_v21 = vadd.f32 %v1152_v28, %v4564_v50 }
  0xb3   : > { %6917 = vst [vmem:[#allocation15_spill] sm:$0xff] %v4810_v58  ;;  %v4822_v29 = vmul.f32 %v4810_v58, %v903_v23  ;;  %v4831_v46 = vmul.f32 %v4044_v0, %v1476_v51  ;;  %v1154_v36 = vmul.f32 %v3995_v44, %v1122_v52  ;;  %v1565_v10 = vld [vmem:[#allocation2 + $0x1a8] sm:$0x3f]  ;;  %v1436_v39 = vadd.f32 %v1408_v34, %v4541_v12  ;;  %v6925_v34 = vld [vmem:[#allocation20_spill] sm:$0xff]  ;;  %v7026_v44 = vld [vmem:[#allocation114_spill] sm:$0xff] }
  0xb4   : > { %v2006_v30 = vld [vmem:[#allocation2 + $0x1a8] sm:$0x3f]  ;;  %988 = vst [vmem:[#allocation2 + $0x4c0] sm:$0xff] %v4827_v60  ;;  %v4837_v23 = vmul.f32 %v4080_v17, %v1918_v33  ;;  %v4840_v11 = vmul.f32 %v4113_v35, %v2357_v5  ;;  %v4843_v43 = vmul.f32 %v4170_v1, %v2800_v27  ;;  %v1879_v28 = vadd.f32 %v1851_v22, %v4544_v41  ;;  %v6926_v52 = vld [vmem:[#allocation28_spill] sm:$0xff]  ;;  %v6929_v22 = vld [vmem:[#allocation14_spill] sm:$0xff] }
  0xb5   : > { %6921 = vst [vmem:[#allocation145_spill] sm:$0xff] %v4831_v46  ;;  %v2446_v50 = vld [vmem:[#allocation2 + $0x1a8] sm:$0x3f]  ;;  %v4848_v26 = vadd.f32 %v4675_v63, %v4657_v16  ;;  %v4852_v12 = vadd.f32 %v4698_v57, %v4680_v53  ;;  %v1675_v33 = vmul.f32 %v3775_v38, %v6925_v34  ;;  %v1525_v5 = vadd.f32 %v6926_v52, %v1436_v39  ;;  %v1644_v63 = vld [vmem:[#allocation2 + $0x278] sm:$0x3f] }
  0xb6   : > { %6922 = vst [vmem:[#allocation146_spill] sm:$0xff] %v4837_v23  ;;  %6923 = vst [vmem:[#allocation147_spill] sm:$0xff] %v4840_v11  ;;  %v2889_v51 = vld [vmem:[#allocation2 + $0x1a8] sm:$0x3f]  ;;  %v4857_v11 = vmul.f32 %v4050_v3, %v1565_v10  ;;  %v4860_v27 = vmul.f32 %v4238_v18, %v2006_v30  ;;  %v4864_v41 = vadd.f32 %v4705_v24, %v4762_v20  ;;  %v6932_v30 = vld [vmem:[#allocation53_spill] sm:$0xff] }
  0xb7   : > { %6924 = vst [vmem:[#allocation148_spill] sm:$0xff] %v4843_v43  ;;  %v1642_v16 = vld [vmem:[#allocation2 + $0x268] sm:$0x3f]  ;;  %v4867_v43 = vrot.slane %v3777_v42, %v6929_v22  ;;  %v1182_v53 = vadd.f32 %v1154_v36, %v1065_v13  ;;  %v4870_v57 = vmul.f32 %v4264_v9, %v2446_v50  ;;  %v4874_v39 = vadd.f32 %v4708_v61, %v4772_v25  ;;  %v1648_v20 = vld [vmem:[#allocation2 + $0x298] sm:$0x3f]  ;;  %v6949_v9 = vld [vmem:[#allocation32_spill] sm:$0xff] }
  0xb8   : > { %6927 = vst [vmem:[#allocation28_spill] sm:$0xff] %v4857_v11  ;;  %6928 = vst [vmem:[#allocation149_spill] sm:$0xff] %v4860_v27  ;;  %v1646_v10 = vld [vmem:[#allocation2 + $0x288] sm:$0x3f]  ;;  %v1614_v52 = vadd.f32 %v6932_v30, %v1525_v5  ;;  %v4878_v24 = vmul.f32 %v4318_v7, %v2889_v51  ;;  %v6934_v42 = vld [vmem:[#allocation29_spill] sm:$0xff]  ;;  %v1438_v13 = vadd.f32 %v1410_v15, %v4576_v54 }
  0xb9   : > { %6930 = vst [vmem:[#allocation14_spill] sm:$0xff] %v4867_v43  ;;  %6931 = vst [vmem:[#allocation150_spill] sm:$0xff] %v4870_v57  ;;  %v2115_v27 = vmul.f32 %v3775_v38, %v4867_v43  ;;  %v1967_v22 = vadd.f32 %v6934_v42, %v1879_v28  ;;  %v4884_v36 = vadd.f32 %v4714_v37, %v1180_v21  ;;  %v1650_v50 = vld [vmem:[#allocation2 + $0x2a8] sm:$0x3f]  ;;  %v1652_v51 = vld [vmem:[#allocation2 + $0x2b8] sm:$0x3f] }
  0xba   : > { %6933 = vst [vmem:[#allocation53_spill] sm:$0xff] %v4878_v24  ;;  %v1674_v61 = vmul.f32 %v6925_v34, %v1642_v16  ;;  %v4888_v25 = vmul.f32 %v6925_v34, %v1644_v63  ;;  %v1703_v5 = vadd.f32 %v1675_v33, %v1614_v52  ;;  %v1677_v30 = vmul.f32 %v4803_v62, %v6925_v34  ;;  %v6935_v28 = vld [vmem:[#allocation54_spill] sm:$0xff]  ;;  %v4901_v16 = vld [vmem:[#allocation2 + $0x290] sm:$0xff]  ;;  %v1656_v3 = vld [vmem:[#allocation2 + $0x2d8] sm:$0x3f] }
  0xbb   : > { %v4893_v38 = vmul.f32 %v6925_v34, %v1646_v10  ;;  %v2055_v54 = vadd.f32 %v6935_v28, %v1967_v22  ;;  %v6936_v15 = vld [vmem:[#allocation30_spill] sm:$0xff]  ;;  %v4899_v42 = vadd.f32 %v4730_v31, %v1182_v53  ;;  %v1679_v33 = vmul.f32 %v4901_v16, %v6925_v34  ;;  %v4910_v10 = vld [vmem:[%s3974_s20 + $0xa8] sm:$0x3f] }
  0xbc   : > { %v1527_v37 = vadd.f32 %v6936_v15, %v1438_v13  ;;  %v448_v21 = vld [vmem:[%s3974_s20 + $0xa0] sm:$0xff]  ;;  %v4906_v63 = vmul.f32 %v6925_v34, %v1648_v20  ;;  %v1792_v52 = vadd.f32 %v4557_v4, %v1703_v5  ;;  %6938 = vst [vmem:[#allocation54_spill] sm:$0xff] %v4910_v10  ;;  %v1654_v22 = vld [vmem:[#allocation2 + $0x2c8] sm:$0x3f]  ;;  %v4919_v53 = vmul.f32 %v6925_v34, %v1650_v50  ;;  %v6939_v13 = vld [vmem:[#allocation56_spill] sm:$0xff] }
  0xbd   : > { %6937 = vst [vmem:[#allocation29_spill] sm:$0xff] %v4899_v42  ;;  %774 = vst [vmem:[#allocation2 + $0x300] sm:$0xff] %v448_v21  ;;  %v4912_v28 = vld [vmem:[#allocation2 + $0x2a0] sm:$0xff]  ;;  %v2143_v24 = vadd.f32 %v2115_v27, %v2055_v54  ;;  %v4923_v20 = vld [vmem:[#allocation2 + $0x2b0] sm:$0xff]  ;;  %v4930_v5 = vmul.f32 %v6925_v34, %v1652_v51  ;;  %v1412_v50 = vmul.f32 %v6918_v45, %v4827_v60 }
  0xbe   : > { %v4916_v31 = vmul.f32 %v4912_v28, %v6925_v34  ;;  %v1616_v15 = vadd.f32 %v6939_v13, %v1527_v37  ;;  %775 = vst [vmem:[#allocation2 + $0x308] sm:$0x3f] %v4910_v10  ;;  %v4927_v4 = vmul.f32 %v4923_v20, %v6925_v34  ;;  %v1881_v21 = vadd.f32 %v4819_v48, %v1792_v52  ;;  %v4935_v57 = vld [vmem:[#allocation2 + $0x2c0] sm:$0xff]  ;;  %v2082_v10 = vld [vmem:[#allocation2 + $0x268] sm:$0x3f] }
  0xbf   : > { %6940 = vst [vmem:[#allocation30_spill] sm:$0xff] %v4930_v5  ;;  %v4939_v27 = vmul.f32 %v4935_v57, %v6925_v34  ;;  %v2231_v54 = vadd.f32 %v4560_v19, %v2143_v24  ;;  %v1855_v13 = vmul.f32 %v6919_v56, %v4827_v60  ;;  %v4945_v51 = vmul.f32 %v6925_v34, %v1654_v22  ;;  %v6942_v52 = vld [vmem:[#allocation31_spill] sm:$0xff]  ;;  %v2084_v42 = vld [vmem:[#allocation2 + $0x278] sm:$0x3f]  ;;  %v3782_v19 = vld [vmem:[%s3966_s17 + $0x10] sm:$0xff] }
  0xc0   : > { %v1705_v37 = vadd.f32 %v1677_v30, %v1616_v15  ;;  %v2117_v48 = vmul.f32 %v4803_v62, %v4867_v43  ;;  %v1969_v23 = vadd.f32 %v6942_v52, %v1881_v21  ;;  %v1440_v11 = vadd.f32 %v1412_v50, %v4579_v32  ;;  %v6943_v24 = vld [vmem:[#allocation7_spill] sm:$0xff]  ;;  %v6947_v32 = vld [vmem:[#allocation57_spill] sm:$0xff] }
  0xc1   : > { %6941 = vst [vmem:[#allocation56_spill] sm:$0xff] %v4945_v51  ;;  %v4952_v46 = vadd.f32 %v1674_v61, %v4645_v55  ;;  %v4956_v30 = vrot.slane %v3782_v19, %v6943_v24  ;;  %v2319_v15 = vadd.f32 %v4822_v29, %v2231_v54  ;;  %v6944_v22 = vld [vmem:[#allocation103_spill] sm:$0xff]  ;;  %v4962_v7 = vmul.f32 %v4794_v40, %v4867_v43  ;;  %v6948_v61 = vld [vmem:[#allocation33_spill] sm:$0xff] }
  0xc2   : > { %v1794_v51 = vadd.f32 %v6944_v22, %v1705_v37  ;;  %v2086_v5 = vld [vmem:[#allocation2 + $0x288] sm:$0x3f]  ;;  %v4965_v21 = vrot.slane %v3782_v19, %v6916_v59  ;;  %v2057_v55 = vadd.f32 %v6947_v32, %v1969_v23  ;;  %v1529_v50 = vadd.f32 %v6948_v61, %v1440_v11  ;;  %v2088_v52 = vld [vmem:[#allocation2 + $0x298] sm:$0x3f]  ;;  %v6959_v61 = vld [vmem:[#allocation60_spill] sm:$0xff] }
  0xc3   : > { %6945 = vst [vmem:[#allocation31_spill] sm:$0xff] %v4962_v7  ;;  %v2114_v24 = vmul.f32 %v4867_v43, %v2082_v10  ;;  %v4971_v18 = vadd.f32 %v6949_v9, %v2319_v15  ;;  %v6951_v54 = vrot.slane %v4005_v47, 2  ;;  %v2090_v40 = vld [vmem:[#allocation2 + $0x2a8] sm:$0x3f]  ;;  %v4977_v22 = vmul.f32 %v4867_v43, %v2084_v42  ;;  %v6954_v47 = vld [vmem:[#allocation34_spill] sm:$0xff]  ;;  %v6956_v15 = vld [vmem:[#allocation104_spill] sm:$0xff] }
  0xc4   : > { %6946 = vst [vmem:[#allocation7_spill] sm:$0xff] %v4965_v21  ;;  %v1883_v29 = vadd.f32 %v1855_v13, %v1794_v51  ;;  %v6953_v59 = vld [vmem:[#allocation59_spill] sm:$0xff]  ;;  %v2145_v23 = vadd.f32 %v2117_v48, %v2057_v55  ;;  %v2293_v11 = vmul.f32 %v4810_v58, %v4827_v60  ;;  %v4983_v10 = vmul.f32 %v4867_v43, %v2086_v5  ;;  %v6957_v60 = vld [vmem:[#allocation13_spill] sm:$0xff] }
  0xc5   : > { %6950 = vst [vmem:[#allocation103_spill] sm:$0xff] %v4971_v18  ;;  %v971_v37 = vsel %vm968_vm4, %v6951_v54, 0.0  ;;  %6952 = vst [vmem:[#allocation57_spill] sm:$0xff] %v4977_v22  ;;  %v1618_v7 = vadd.f32 %v6953_v59, %v1529_v50  ;;  %v2119_v9 = vmul.f32 %v4901_v16, %v4867_v43  ;;  %v907_v51 = vrot.slane %v4901_v16, 2  ;;  %v6960_v59 = vld [vmem:[#allocation8_spill] sm:$0xff] }
  0xc6   : > { %989 = vst [vmem:[#allocation2 + $0x4c8] sm:$0x3f] %v971_v37  ;;  %v1971_v13 = vadd.f32 %v6954_v47, %v1883_v29  ;;  %v4990_v42 = vmul.f32 %v4867_v43, %v2088_v52  ;;  %v2121_v48 = vmul.f32 %v4912_v28, %v4867_v43  ;;  %v2233_v32 = vadd.f32 %v6956_v15, %v2145_v23  ;;  %v2094_v23 = vld [vmem:[#allocation2 + $0x2c8] sm:$0x3f] }
  0xc7   : > { %v908_v55 = vrot.slane %v6957_v60, 2  ;;  %v4997_v5 = vmul.f32 %v4867_v43, %v2090_v40  ;;  %v1707_v54 = vadd.f32 %v1679_v33, %v1618_v7  ;;  %v910_v29 = vrot.slane %v4912_v28, 2  ;;  %v6962_v40 = vld [vmem:[#allocation106_spill] sm:$0xff] }
  0xc8   : > { %6955 = vst [vmem:[#allocation33_spill] sm:$0xff] %v4990_v42  ;;  %v2059_v50 = vadd.f32 %v6959_v61, %v1971_v13  ;;  %v2321_v37 = vadd.f32 %v2293_v11, %v2233_v32  ;;  %v5002_v47 = vrot.slane %v3782_v19, %v6960_v59  ;;  %v2092_v42 = vld [vmem:[#allocation2 + $0x2b8] sm:$0x3f]  ;;  %v5011_v33 = vmul.f32 %v4923_v20, %v4867_v43  ;;  %v6963_v11 = vld [vmem:[#allocation35_spill] sm:$0xff] }
  0xc9   : > { %6958 = vst [vmem:[#allocation32_spill] sm:$0xff] %v4997_v5  ;;  %v909_v52 = vsel %vm897_vm5, %v907_v51, %v908_v55  ;;  %v1796_v60 = vadd.f32 %v6962_v40, %v1707_v54  ;;  %v2525_v19 = vld [vmem:[#allocation2 + $0x278] sm:$0x3f]  ;;  %v2527_v59 = vld [vmem:[#allocation2 + $0x288] sm:$0x3f]  ;;  %v5024_v22 = vmul.f32 %v4867_v43, %v2092_v42  ;;  %v6973_v42 = vld [vmem:[#allocation38_spill] sm:$0xff] }
  0xca   : > { %6961 = vst [vmem:[#allocation59_spill] sm:$0xff] %v5002_v47  ;;  %990 = vst [vmem:[#allocation2 + $0x4d0] sm:$0xff] %v909_v52  ;;  %v1414_v15 = vmul.f32 %v6918_v45, %v909_v52  ;;  %v1857_v13 = vmul.f32 %v6919_v56, %v909_v52  ;;  %v2147_v7 = vadd.f32 %v2119_v9, %v2059_v50  ;;  %v6965_v54 = vld [vmem:[#allocation107_spill] sm:$0xff]  ;;  %v6966_v9 = vrot.slane %v4070_v14, 2 }
  0xcb   : > { %v2410_v32 = vadd.f32 %v6963_v11, %v2321_v37  ;;  %v2295_v51 = vmul.f32 %v4810_v58, %v909_v52  ;;  %v5016_v61 = vmul.f32 %v5002_v47, %v909_v52  ;;  %6967 = vst [vmem:[#allocation104_spill] sm:$0xff] %v5024_v22  ;;  %v5028_v37 = vmul.f32 %v4935_v57, %v4867_v43  ;;  %v6969_v11 = vld [vmem:[#allocation61_spill] sm:$0xff] }
  0xcc   : > { %v1442_v18 = vadd.f32 %v1414_v15, %v4606_v2  ;;  %v1885_v5 = vadd.f32 %v1857_v13, %v1796_v60  ;;  %v2235_v40 = vadd.f32 %v6965_v54, %v2147_v7  ;;  %v912_v50 = vsel %vm897_vm5, %v910_v29, %v6966_v9  ;;  %v6971_v2 = vld [vmem:[#allocation119_spill] sm:$0xff]  ;;  %v2529_v60 = vld [vmem:[#allocation2 + $0x298] sm:$0x3f] }
  0xcd   : > { %6964 = vst [vmem:[#allocation34_spill] sm:$0xff] %v5016_v61  ;;  %v5031_v52 = vmul.f32 %v4867_v43, %v2094_v23  ;;  %v5034_v61 = vadd.f32 %v6969_v11, %v2410_v32  ;;  %992 = vst [vmem:[#allocation2 + $0x4e0] sm:$0xff] %v912_v50  ;;  %v5037_v15 = vadd.f32 %v2114_v24, %v6971_v2  ;;  %v2531_v13 = vld [vmem:[#allocation2 + $0x2a8] sm:$0x3f]  ;;  %v2533_v2 = vld [vmem:[#allocation2 + $0x2b8] sm:$0x3f] }
  0xce   : > { %v5040_v29 = vmul.f32 %v4956_v30, %v2525_v19  ;;  %v1531_v7 = vadd.f32 %v6973_v42, %v1442_v18  ;;  %v6974_v54 = vld [vmem:[#allocation39_spill] sm:$0xff]  ;;  %v5046_v23 = vmul.f32 %v4803_v62, %v4956_v30  ;;  %v5049_v32 = vmul.f32 %v4956_v30, %v2527_v59 }
  0xcf   : > { %6968 = vst [vmem:[#allocation13_spill] sm:$0xff] %v5031_v52  ;;  %6970 = vst [vmem:[#allocation60_spill] sm:$0xff] %v5034_v61  ;;  %v1973_v9 = vadd.f32 %v6974_v54, %v1885_v5  ;;  %v5053_v24 = vmul.f32 %v4901_v16, %v4956_v30  ;;  %v2323_v11 = vadd.f32 %v2295_v51, %v2235_v40  ;;  %v6978_v61 = vld [vmem:[#allocation62_spill] sm:$0xff]  ;;  %v972_v18 = vsel %vm968_vm4, %v908_v55, 0.0  ;;  %v6982_v16 = vld [vmem:[#allocation40_spill] sm:$0xff] }
  0xd0   : > { %6972 = vst [vmem:[#allocation8_spill] sm:$0xff] %v5040_v29  ;;  %6975 = vst [vmem:[#allocation106_spill] sm:$0xff] %v5046_v23  ;;  %v1620_v19 = vadd.f32 %v6978_v61, %v1531_v7  ;;  %v6979_v29 = vld [vmem:[#allocation126_spill] sm:$0xff]  ;;  %v1416_v5 = vmul.f32 %v6918_v45, %v912_v50  ;;  %v5060_v62 = vmul.f32 %v4956_v30, %v2529_v60  ;;  %v2535_v40 = vld [vmem:[#allocation2 + $0x2c8] sm:$0x3f] }
  0xd1   : > { %6976 = vst [vmem:[#allocation35_spill] sm:$0xff] %v5049_v32  ;;  %6977 = vst [vmem:[#allocation107_spill] sm:$0xff] %v5053_v24  ;;  %v2061_v52 = vadd.f32 %v6979_v29, %v1973_v9  ;;  %v2562_v59 = vmul.f32 %v4912_v28, %v4956_v30  ;;  %v5065_v42 = vmul.f32 %v4956_v30, %v2531_v13  ;;  %v1288_v61 = vld [vmem:[#allocation2 + $0x388] sm:$0x3f]  ;;  %v6983_v7 = vld [vmem:[#allocation120_spill] sm:$0xff] }
  0xd2   : > { %6980 = vst [vmem:[#allocation61_spill] sm:$0xff] %v5060_v62  ;;  %v2412_v51 = vadd.f32 %v6982_v16, %v2323_v11  ;;  %991 = vst [vmem:[#allocation2 + $0x4d8] sm:$0x3f] %v972_v18  ;;  %v1444_v29 = vadd.f32 %v1416_v5, %v6983_v7  ;;  %v1709_v55 = vadd.f32 %v4916_v31, %v1620_v19  ;;  %v6985_v11 = vld [vmem:[#allocation127_spill] sm:$0xff]  ;;  %v2976_v5 = vld [vmem:[#allocation2 + $0x2b8] sm:$0x3f] }
  0xd3   : > { %6981 = vst [vmem:[#allocation119_spill] sm:$0xff] %v5065_v42  ;;  %v1859_v54 = vmul.f32 %v6919_v56, %v912_v50  ;;  %v2149_v9 = vadd.f32 %v2121_v48, %v2061_v52  ;;  %v5073_v60 = vmul.f32 %v4923_v20, %v4956_v30  ;;  %v5076_v28 = vmul.f32 %v4956_v30, %v2533_v2  ;;  %v2551_v16 = vld [vmem:[#allocation2 + $0x348] sm:$0x3f]  ;;  %v6986_v7 = vld [vmem:[#allocation42_spill] sm:$0xff]  ;;  %v6987_v19 = vld [vmem:[#allocation116_spill] sm:$0xff] }
  0xd4   : > { %v5080_v13 = vmul.f32 %v4935_v57, %v4956_v30  ;;  %v2501_v18 = vadd.f32 %v6985_v11, %v2412_v51  ;;  %v1533_v31 = vadd.f32 %v6986_v7, %v1444_v29  ;;  %v1798_v24 = vadd.f32 %v6987_v19, %v1709_v55  ;;  %v6988_v48 = vld [vmem:[#allocation117_spill] sm:$0xff]  ;;  %v5090_v2 = vld [vmem:[#allocation2] sm:$0xff]  ;;  %v2978_v42 = vld [vmem:[#allocation2 + $0x2c8] sm:$0x3f] }
  0xd5   : > { %6984 = vst [vmem:[#allocation38_spill] sm:$0xff] %v5076_v28  ;;  %v2237_v52 = vadd.f32 %v6988_v48, %v2149_v9  ;;  %v2297_v32 = vmul.f32 %v4810_v58, %v912_v50  ;;  %v5088_v23 = vmul.f32 %v4956_v30, %v2535_v40  ;;  %6990 = vst [vmem:[#allocation62_spill] sm:$0xff] %v5090_v2  ;;  %v6992_v29 = vld [vmem:[#allocation64_spill] sm:$0xff]  ;;  %v2172_v62 = vld [vmem:[#allocation2 + $0x398] sm:$0x3f] }
  0xd6   : > { %v5094_v28 = vmul.f32 %v5090_v2, %v4956_v30  ;;  %v1320_v51 = vmul.f32 %v4011_v49, %v1288_v61  ;;  %v2590_v11 = vadd.f32 %v2562_v59, %v2501_v18  ;;  %v1622_v7 = vadd.f32 %v6992_v29, %v1533_v31  ;;  %v1377_v59 = vld [vmem:[#allocation2 + $0x4a8] sm:$0x3f]  ;;  %v6996_v61 = vld [vmem:[#allocation118_spill] sm:$0xff] }
  0xd7   : > { %6989 = vst [vmem:[#allocation39_spill] sm:$0xff] %v5088_v23  ;;  %v1887_v55 = vadd.f32 %v1859_v54, %v1798_v24  ;;  %v2325_v19 = vadd.f32 %v2297_v32, %v2237_v52  ;;  %v2740_v9 = vmul.f32 %v5002_v47, %v912_v50  ;;  %v5100_v40 = vmul.f32 %v4956_v30, %v2551_v16  ;;  %v1731_v31 = vld [vmem:[#allocation2 + $0x388] sm:$0x3f]  ;;  %v6997_v24 = vld [vmem:[#allocation121_spill] sm:$0xff] }
  0xd8   : > { %6991 = vst [vmem:[#allocation126_spill] sm:$0xff] %v5094_v28  ;;  %v5104_v48 = vmul.f32 %v4923_v20, %v4965_v21  ;;  %v5107_v28 = vmul.f32 %v4965_v21, %v2976_v5  ;;  %v2679_v18 = vadd.f32 %v6996_v61, %v2590_v11  ;;  %v1772_v32 = vmul.f32 %v4058_v6, %v6997_v24  ;;  %v6998_v54 = vld [vmem:[#allocation43_spill] sm:$0xff]  ;;  %v6999_v52 = vld [vmem:[#allocation45_spill] sm:$0xff] }
  0xd9   : > { %6993 = vst [vmem:[#allocation40_spill] sm:$0xff] %v5100_v40  ;;  %v1975_v50 = vadd.f32 %v6998_v54, %v1887_v55  ;;  %v2414_v29 = vadd.f32 %v6999_v52, %v2325_v19  ;;  %v1711_v16 = vadd.f32 %v4927_v4, %v1622_v7  ;;  %v5117_v40 = vmul.f32 %v4935_v57, %v4965_v21  ;;  %v2640_v55 = vld [vmem:[#allocation2 + $0x468] sm:$0x3f]  ;;  %v7004_v7 = vld [vmem:[#allocation65_spill] sm:$0xff]  ;;  %v7005_v52 = vld [vmem:[#allocation66_spill] sm:$0xff] }
  0xda   : > { %6994 = vst [vmem:[#allocation120_spill] sm:$0xff] %v5104_v48  ;;  %6995 = vst [vmem:[#allocation127_spill] sm:$0xff] %v5107_v28  ;;  %v5120_v5 = vmul.f32 %v4965_v21, %v2978_v42  ;;  %v5124_v11 = vmul.f32 %v5090_v2, %v4965_v21  ;;  %v1348_v61 = vadd.f32 %v1320_v51, %v4800_v8  ;;  %v450_v28 = vld [vmem:[%s3974_s20 + $0xb0] sm:$0xff]  ;;  %v5129_v48 = vld [vmem:[%s3974_s20 + $0xb8] sm:$0x3f] }
  0xdb   : > { %7000 = vst [vmem:[#allocation42_spill] sm:$0xff] %v5117_v40  ;;  %7003 = vst [vmem:[#allocation64_spill] sm:$0xff] %v5129_v48  ;;  %v2170_v19 = vld [vmem:[#allocation2 + $0x388] sm:$0x3f]  ;;  %v1409_v4 = vmul.f32 %v6918_v45, %v1377_v59  ;;  %v2063_v54 = vadd.f32 %v7004_v7, %v1975_v50  ;;  %v2503_v40 = vadd.f32 %v7005_v52, %v2414_v29  ;;  %v7009_v51 = vld [vmem:[#allocation101_spill] sm:$0xff]  ;;  %v7010_v59 = vrot.slane %v4070_v14, 2 }
  0xdc   : > { %7001 = vst [vmem:[#allocation116_spill] sm:$0xff] %v5120_v5  ;;  %7002 = vst [vmem:[#allocation117_spill] sm:$0xff] %v5124_v11  ;;  %v5134_v23 = vadd.f32 %v2740_v9, %v2679_v18  ;;  %v1763_v42 = vmul.f32 %v4058_v6, %v1731_v31  ;;  %v7007_v5 = vld [vmem:[#allocation102_spill] sm:$0xff]  ;;  %v2211_v11 = vmul.f32 %v7009_v51, %v6997_v24  ;;  %v1290_v7 = vld [vmem:[#allocation2 + $0x398] sm:$0x3f]  ;;  %v913_v18 = vrot.slane %v4923_v20, 2 }
  0xdd   : > { %776 = vst [vmem:[#allocation2 + $0x310] sm:$0xff] %v450_v28  ;;  %777 = vst [vmem:[#allocation2 + $0x318] sm:$0x3f] %v5129_v48  ;;  %v5140_v8 = vmul.f32 %v5090_v2, %v7007_v5  ;;  %v973_v50 = vsel %vm968_vm4, %v7010_v59, 0.0  ;;  %v2653_v9 = vmul.f32 %v7007_v5, %v6997_v24  ;;  %v1213_v28 = vld [vmem:[#allocation2 + $0x2d8] sm:$0x3f]  ;;  %v1800_v52 = vadd.f32 %v1772_v32, %v1711_v16 }
  0xde   : > { %7006 = vst [vmem:[#allocation118_spill] sm:$0xff] %v5134_v23  ;;  %993 = vst [vmem:[#allocation2 + $0x4e8] sm:$0x3f] %v973_v50  ;;  %v7011_v31 = vld [vmem:[#allocation23_spill] sm:$0xff]  ;;  %v5152_v23 = vadd.f32 %v1763_v42, %v4952_v46  ;;  %v1733_v48 = vld [vmem:[#allocation2 + $0x398] sm:$0x3f]  ;;  %v5156_v14 = vmul.f32 %v7007_v5, %v2640_v55  ;;  %v2151_v59 = vadd.f32 %v5011_v33, %v2063_v54 }
  0xdf   : > { %7008 = vst [vmem:[#allocation121_spill] sm:$0xff] %v5140_v8  ;;  %v914_v29 = vrot.slane %v7011_v31, 2  ;;  %v2202_v8 = vmul.f32 %v7009_v51, %v2170_v19  ;;  %v1292_v24 = vld [vmem:[#allocation2 + $0x3a8] sm:$0x3f]  ;;  %v1437_v22 = vadd.f32 %v1409_v4, %v1348_v61  ;;  %v2592_v20 = vadd.f32 %v5073_v60, %v2503_v40  ;;  %v7017_v31 = vld [vmem:[#allocation128_spill] sm:$0xff] }
  0xe0   : > { %7012 = vst [vmem:[#allocation43_spill] sm:$0xff] %v5156_v14  ;;  %v1322_v16 = vmul.f32 %v4011_v49, %v1290_v7  ;;  %v7014_v19 = vld [vmem:[#allocation11_spill] sm:$0xff]  ;;  %v2239_v4 = vadd.f32 %v2211_v11, %v2151_v59  ;;  %v5173_v54 = vmul.f32 %v4058_v6, %v1733_v48 }
  0xe1   : > { %v915_v50 = vsel %vm897_vm5, %v913_v18, %v914_v29  ;;  %v974_v32 = vsel %vm968_vm4, %v914_v29, 0.0  ;;  %v5163_v46 = vadd.f32 %v2202_v8, %v5037_v15  ;;  %v5167_v42 = vmul.f32 %v7014_v19, %v1213_v28  ;;  %v1735_v55 = vld [vmem:[#allocation2 + $0x3a8] sm:$0x3f]  ;;  %v1294_v18 = vld [vmem:[#allocation2 + $0x3b8] sm:$0x3f] }
  0xe2   : > { %994 = vst [vmem:[#allocation2 + $0x4f0] sm:$0xff] %v915_v50  ;;  %v1418_v33 = vmul.f32 %v6918_v45, %v915_v50  ;;  %995 = vst [vmem:[#allocation2 + $0x4f8] sm:$0x3f] %v974_v32  ;;  %v1861_v61 = vmul.f32 %v6919_v56, %v915_v50  ;;  %v2299_v60 = vmul.f32 %v4810_v58, %v915_v50  ;;  %v2174_v7 = vld [vmem:[#allocation2 + $0x3a8] sm:$0x3f]  ;;  %v7018_v32 = vld [vmem:[#allocation74_spill] sm:$0xff] }
  0xe3   : > { %7013 = vst [vmem:[#allocation45_spill] sm:$0xff] %v5163_v46  ;;  %7015 = vst [vmem:[#allocation65_spill] sm:$0xff] %v5167_v42  ;;  %v2681_v40 = vadd.f32 %v2653_v9, %v2592_v20  ;;  %v5176_v15 = vmul.f32 %v7009_v51, %v2172_v62  ;;  %v1324_v8 = vmul.f32 %v4011_v49, %v1292_v24  ;;  %v2616_v28 = vld [vmem:[#allocation2 + $0x3a8] sm:$0x3f]  ;;  %v7019_v62 = vld [vmem:[#allocation16_spill] sm:$0xff]  ;;  %v916_v19 = vrot.slane %v4935_v57, 2 }
  0xe4   : > { %v1446_v29 = vadd.f32 %v1418_v33, %v7017_v31  ;;  %v1526_v14 = vadd.f32 %v7018_v32, %v1437_v22  ;;  %v1889_v46 = vadd.f32 %v1861_v61, %v1800_v52  ;;  %v2327_v11 = vadd.f32 %v2299_v60, %v2239_v4  ;;  %v1379_v24 = vld [vmem:[#allocation2 + $0x4b8] sm:$0x3f]  ;;  %v7021_v42 = vld [vmem:[#allocation47_spill] sm:$0xff]  ;;  %v7024_v31 = vld [vmem:[#allocation68_spill] sm:$0xff] }
  0xe5   : > { %7016 = vst [vmem:[#allocation66_spill] sm:$0xff] %v5176_v15  ;;  %v2742_v59 = vmul.f32 %v5002_v47, %v915_v50  ;;  %v1350_v9 = vadd.f32 %v1322_v16, %v4848_v26  ;;  %v5184_v48 = vmul.f32 %v4058_v6, %v1735_v55  ;;  %v5188_v20 = vmul.f32 %v5090_v2, %v7019_v62  ;;  %v1737_v50 = vld [vmem:[#allocation2 + $0x3b8] sm:$0x3f]  ;;  %v7023_v16 = vld [vmem:[#allocation48_spill] sm:$0xff]  ;;  %v1381_v4 = vld [vmem:[#allocation2 + $0x4c8] sm:$0x3f] }
  0xe6   : > { %v1535_v15 = vadd.f32 %v7021_v42, %v1446_v29  ;;  %v5192_v33 = vmul.f32 %v7009_v51, %v2174_v7  ;;  %v5195_v22 = vmul.f32 %v7007_v5, %v2616_v28  ;;  %v1326_v52 = vmul.f32 %v4011_v49, %v1294_v18  ;;  %v2176_v26 = vld [vmem:[#allocation2 + $0x3b8] sm:$0x3f]  ;;  %v7032_v57 = vld [vmem:[#allocation26_spill] sm:$0xff] }
  0xe7   : > { %7020 = vst [vmem:[#allocation23_spill] sm:$0xff] %v5188_v20  ;;  %v1977_v55 = vadd.f32 %v7023_v16, %v1889_v46  ;;  %v1352_v61 = vadd.f32 %v1324_v8, %v4852_v12  ;;  %v1383_v60 = vld [vmem:[#allocation2 + $0x4d8] sm:$0x3f]  ;;  %v2770_v29 = vadd.f32 %v2742_v59, %v2681_v40  ;;  %v1615_v28 = vadd.f32 %v7026_v44, %v1526_v14  ;;  %v7029_v8 = vld [vmem:[#allocation70_spill] sm:$0xff]  ;;  %v1296_v14 = vld [vmem:[#allocation2 + $0x3c8] sm:$0x3f] }
  0xe8   : > { %7022 = vst [vmem:[#allocation128_spill] sm:$0xff] %v5195_v22  ;;  %v1624_v32 = vadd.f32 %v7024_v31, %v1535_v15  ;;  %v7025_v20 = vld [vmem:[#allocation49_spill] sm:$0xff]  ;;  %v1411_v22 = vmul.f32 %v6918_v45, %v1379_v24  ;;  %v5207_v46 = vmul.f32 %v4058_v6, %v1737_v50  ;;  %v5210_v12 = vmul.f32 %v7009_v51, %v2176_v26  ;;  %v7030_v40 = vld [vmem:[#allocation50_spill] sm:$0xff]  ;;  %v1739_v26 = vld [vmem:[#allocation2 + $0x3c8] sm:$0x3f] }
  0xe9   : > { %v2416_v42 = vadd.f32 %v7025_v20, %v2327_v11  ;;  %v2618_v7 = vld [vmem:[#allocation2 + $0x3b8] sm:$0x3f]  ;;  %v5214_v59 = vadd.f32 %v7030_v40, %v2770_v29  ;;  %v1354_v44 = vadd.f32 %v1326_v52, %v4864_v41  ;;  %v1413_v20 = vmul.f32 %v6918_v45, %v1381_v4  ;;  %v2178_v52 = vld [vmem:[#allocation2 + $0x3c8] sm:$0x3f] }
  0xea   : > { %v7027_v18 = vld [vmem:[#allocation69_spill] sm:$0xff]  ;;  %7028 = vst [vmem:[#allocation74_spill] sm:$0xff] %v5210_v12  ;;  %v1415_v24 = vmul.f32 %v6918_v45, %v1383_v60  ;;  %v917_v16 = vrot.slane %v7032_v57, 2  ;;  %v5221_v50 = vmul.f32 %v7007_v5, %v2618_v7  ;;  %v1439_v60 = vadd.f32 %v1411_v22, %v1350_v9  ;;  %v7037_v22 = vld [vmem:[#allocation136_spill] sm:$0xff] }
  0xeb   : > { %v2065_v1 = vadd.f32 %v7027_v18, %v1977_v55  ;;  %v2096_v15 = vld [vmem:[#allocation2 + $0x2d8] sm:$0x3f]  ;;  %v2505_v11 = vadd.f32 %v7029_v8, %v2416_v42  ;;  %7031 = vst [vmem:[#allocation47_spill] sm:$0xff] %v5214_v59  ;;  %v5223_v55 = vld [vmem:[#allocation2 + $0x2d0] sm:$0xff]  ;;  %v5230_v42 = vmul.f32 %v6925_v34, %v1656_v3  ;;  %v1704_v29 = vadd.f32 %v4888_v25, %v1615_v28  ;;  %v2620_v8 = vld [vmem:[#allocation2 + $0x3c8] sm:$0x3f] }
  0xec   : > { %7033 = vst [vmem:[#allocation48_spill] sm:$0xff] %v5221_v50  ;;  %v5227_v31 = vmul.f32 %v5223_v55, %v6925_v34  ;;  %v5234_v41 = vmul.f32 %v5223_v55, %v4867_v43  ;;  %v5237_v4 = vmul.f32 %v4867_v43, %v2096_v15  ;;  %v918_v7 = vsel %vm897_vm5, %v916_v19, %v917_v16  ;;  %v1822_v19 = vld [vmem:[#allocation2 + $0x4b8] sm:$0x3f] }
  0xed   : > { %7034 = vst [vmem:[#allocation68_spill] sm:$0xff] %v5230_v42  ;;  %v1328_v18 = vmul.f32 %v4011_v49, %v1296_v14  ;;  %v1420_v40 = vmul.f32 %v6918_v45, %v918_v7  ;;  %v1713_v3 = vadd.f32 %v4939_v27, %v1624_v32  ;;  %v1863_v57 = vmul.f32 %v6919_v56, %v918_v7  ;;  %v7038_v14 = vld [vmem:[#allocation132_spill] sm:$0xff]  ;;  %v5268_v12 = vld [vmem:[%s3966_s17 + $0x18] ss:$0 sm:$0xff] }
  0xee   : > { %7035 = vst [vmem:[#allocation49_spill] sm:$0xff] %v5237_v4  ;;  %v5246_v59 = vmul.f32 %v4058_v6, %v1739_v26  ;;  %v1441_v42 = vadd.f32 %v1413_v20, %v1352_v61  ;;  %v1443_v15 = vadd.f32 %v1415_v24, %v1354_v44  ;;  %v2153_v9 = vadd.f32 %v5028_v37, %v2065_v1  ;;  %v7040_v26 = vld [vmem:[#allocation78_spill] sm:$0xff]  ;;  %v7041_v44 = vld [vmem:[#allocation133_spill] sm:$0xff]  ;;  %v7042_v37 = vld [vmem:[#allocation92_spill] sm:$0xff] }
  0xef   : > { %v5250_v25 = vmul.f32 %v7009_v51, %v2178_v52  ;;  %v1448_v28 = vadd.f32 %v1420_v40, %v7037_v22  ;;  %v1802_v4 = vadd.f32 %v7038_v14, %v1713_v3  ;;  %v2301_v27 = vmul.f32 %v4810_v58, %v918_v7  ;;  %v2537_v22 = vld [vmem:[#allocation2 + $0x2d8] sm:$0x3f]  ;;  %7045 = vst [vmem:[#allocation70_spill] sm:$0xff] %v5268_v12 }
  0xf0   : > { %v5256_v32 = vmul.f32 %v7007_v5, %v2620_v8  ;;  %v1528_v50 = vadd.f32 %v7040_v26, %v1439_v60  ;;  %v1793_v61 = vadd.f32 %v5173_v54, %v1704_v29  ;;  %v2241_v1 = vadd.f32 %v7041_v44, %v2153_v9  ;;  %v7043_v14 = vld [vmem:[#allocation81_spill] sm:$0xff]  ;;  %v7044_v8 = vld [vmem:[#allocation87_spill] sm:$0xff]  ;;  %v7050_v26 = vld [vmem:[#allocation94_spill] sm:$0xff] }
  0xf1   : > { %7036 = vst [vmem:[#allocation114_spill] sm:$0xff] %v5250_v25  ;;  %v1537_v20 = vadd.f32 %v7042_v37, %v1448_v28  ;;  %v1891_v24 = vadd.f32 %v1863_v57, %v1802_v4  ;;  %v2594_v52 = vadd.f32 %v5080_v13, %v2505_v11  ;;  %v2744_v40 = vmul.f32 %v5002_v47, %v918_v7  ;;  %v1298_v29 = vld [vmem:[#allocation2 + $0x3d8] sm:$0x3f]  ;;  %v7047_v57 = vld [vmem:[#allocation134_spill] sm:$0xff] }
  0xf2   : > { %7039 = vst [vmem:[#allocation69_spill] sm:$0xff] %v5256_v32  ;;  %v1854_v3 = vmul.f32 %v6919_v56, %v1822_v19  ;;  %v1530_v25 = vadd.f32 %v7043_v14, %v1441_v42  ;;  %v1532_v32 = vadd.f32 %v7044_v8, %v1443_v15  ;;  %v2329_v60 = vadd.f32 %v2301_v27, %v2241_v1  ;;  %v7046_v9 = vld [vmem:[#allocation93_spill] sm:$0xff]  ;;  %v1820_v15 = vld [vmem:[#allocation2 + $0x4a8] sm:$0x3f] }
  0xf3   : > { %v5271_v54 = vadd.f32 %v1328_v18, %v4874_v39  ;;  %v1979_v4 = vadd.f32 %v7046_v9, %v1891_v24  ;;  %v2683_v13 = vadd.f32 %v7047_v57, %v2594_v52  ;;  %v5276_v11 = vmul.f32 %v5268_v12, %v918_v7  ;;  %v7049_v19 = vld [vmem:[#allocation123_spill] sm:$0xff]  ;;  %v7052_v24 = vld [vmem:[#allocation129_spill] sm:$0xff] }
  0xf4   : > { %v2568_v42 = vmul.f32 %v5223_v55, %v4956_v30  ;;  %v1617_v28 = vadd.f32 %v7049_v19, %v1528_v50  ;;  %v1882_v27 = vadd.f32 %v1854_v3, %v1793_v61  ;;  %v2418_v39 = vadd.f32 %v7050_v26, %v2329_v60  ;;  %v7053_v14 = vld [vmem:[#allocation135_spill] sm:$0xff]  ;;  %v452_v61 = vld [vmem:[%s3974_s20 + $0xc0] sm:$0xff]  ;;  %v7059_v19 = vld [vmem:[#allocation97_spill] sm:$0xff] }
  0xf5   : > { %7048 = vst [vmem:[#allocation50_spill] sm:$0xff] %v5276_v11  ;;  %v5283_v18 = vmul.f32 %v4956_v30, %v2537_v22  ;;  %v3011_v44 = vmul.f32 %v5223_v55, %v4965_v21  ;;  %v2772_v1 = vadd.f32 %v2744_v40, %v2683_v13  ;;  %v975_v7 = vsel %vm968_vm4, %v917_v16, 0.0  ;;  %v5296_v3 = vld [vmem:[%s3974_s20 + $0xc8] sm:$0x3f]  ;;  %v7056_v40 = vld [vmem:[#allocation44_spill] sm:$0xff]  ;;  %778 = vst [vmem:[#allocation2 + $0x320] sm:$0xff] %v452_v61 }
  0xf6   : > { %v5289_v37 = vmul.f32 %v4011_v49, %v1298_v29  ;;  %v1619_v52 = vadd.f32 %v7052_v24, %v1530_v25  ;;  %v1621_v8 = vadd.f32 %v7053_v14, %v1532_v32  ;;  %997 = vst [vmem:[#allocation2 + $0x508] sm:$0x3f] %v975_v7  ;;  %v804_v50 = vrot.slane %v5223_v55, 1  ;;  %7054 = vst [vmem:[#allocation136_spill] sm:$0xff] %v5296_v3  ;;  %v7055_v60 = vld [vmem:[#allocation95_spill] sm:$0xff]  ;;  %v7057_v16 = vld [vmem:[#allocation96_spill] sm:$0xff] }
  0xf7   : > { %7051 = vst [vmem:[#allocation26_spill] sm:$0xff] %v5283_v18  ;;  %v1852_v22 = vmul.f32 %v6919_v56, %v1820_v15  ;;  %v2861_v9 = vadd.f32 %v7055_v60, %v2772_v1  ;;  %v805_v57 = vrot.slane %v7056_v40, 1  ;;  %v1626_v13 = vadd.f32 %v7057_v16, %v1537_v20  ;;  %779 = vst [vmem:[#allocation2 + $0x328] sm:$0x3f] %v5296_v3  ;;  %v7058_v25 = vld [vmem:[#allocation79_spill] sm:$0xff]  ;;  %v7060_v7 = vld [vmem:[#allocation98_spill] sm:$0xff] }
  0xf8   : > { %v1970_v29 = vadd.f32 %v7058_v25, %v1882_v27  ;;  %v1706_v32 = vadd.f32 %v4893_v38, %v1617_v28  ;;  %v2067_v26 = vadd.f32 %v7059_v19, %v1979_v4  ;;  %v2507_v24 = vadd.f32 %v7060_v7, %v2418_v39  ;;  %v7061_v1 = vld [vmem:[#allocation100_spill] sm:$0xff]  ;;  %v1824_v4 = vld [vmem:[#allocation2 + $0x4c8] sm:$0x3f]  ;;  %v1826_v28 = vld [vmem:[#allocation2 + $0x4d8] sm:$0x3f] }
  0xf9   : > { %v806_v14 = vsel %vm782_vm2, %v804_v50, %v805_v57  ;;  %v1715_v15 = vadd.f32 %v5227_v31, %v1626_v13  ;;  %v2950_v60 = vadd.f32 %v7061_v1, %v2861_v9  ;;  %v861_v11 = vsel %vm853_vm3, %v805_v57, 0.0  ;;  %v2980_v16 = vld [vmem:[#allocation2 + $0x2d8] sm:$0x3f]  ;;  %v1385_v57 = vld [vmem:[#allocation2 + $0x4e8] sm:$0x3f]  ;;  %v7063_v19 = vld [vmem:[#allocation124_spill] sm:$0xff] }
  0xfa   : > { %v1708_v20 = vadd.f32 %v4906_v63, %v1619_v52  ;;  %v1710_v61 = vadd.f32 %v4919_v53, %v1621_v8  ;;  %v1333_v27 = vmul.f32 %v4011_v49, %v806_v14  ;;  %v1776_v38 = vmul.f32 %v4058_v6, %v806_v14  ;;  %884 = vst [vmem:[#allocation2 + $0x3f8] sm:$0x3f] %v861_v11  ;;  %v7062_v13 = vld [vmem:[#allocation25_spill] sm:$0xff]  ;;  %v1828_v1 = vld [vmem:[#allocation2 + $0x4e8] sm:$0x3f] }
  0xfb   : > { %v2155_v39 = vadd.f32 %v5234_v41, %v2067_v26  ;;  %v2215_v50 = vmul.f32 %v7009_v51, %v806_v14  ;;  %v2596_v31 = vadd.f32 %v2568_v42, %v2507_v24  ;;  %v2657_v9 = vmul.f32 %v7007_v5, %v806_v14  ;;  %v1741_v25 = vld [vmem:[#allocation2 + $0x3d8] sm:$0x3f] }
  0xfc   : > { %v1361_v63 = vadd.f32 %v1333_v27, %v7062_v13  ;;  %v1804_v52 = vadd.f32 %v1776_v38, %v1715_v15  ;;  %v3039_v53 = vadd.f32 %v3011_v44, %v2950_v60  ;;  %v3100_v8 = vmul.f32 %v7019_v62, %v806_v14  ;;  %v2180_v3 = vld [vmem:[#allocation2 + $0x3d8] sm:$0x3f] }
  0xfd   : > { %v2058_v11 = vadd.f32 %v7063_v19, %v1970_v29  ;;  %v1795_v7 = vadd.f32 %v5184_v48, %v1706_v32  ;;  %v2243_v41 = vadd.f32 %v2215_v50, %v2155_v39  ;;  %v2685_v26 = vadd.f32 %v2657_v9, %v2596_v31  ;;  %v2622_v42 = vld [vmem:[#allocation2 + $0x3d8] sm:$0x3f] }
  0xfe   : > { %v1856_v24 = vmul.f32 %v6919_v56, %v1824_v4  ;;  %v1797_v18 = vadd.f32 %v5207_v46, %v1708_v20  ;;  %v1858_v27 = vmul.f32 %v6919_v56, %v1826_v28  ;;  %v3128_v15 = vadd.f32 %v3100_v8, %v3039_v53  ;;  %v3065_v44 = vld [vmem:[#allocation2 + $0x3d8] sm:$0x3f] }
  0xff   : > { %v5326_v14 = vmul.f32 %v4965_v21, %v2980_v16  ;;  %v1417_v29 = vmul.f32 %v6918_v45, %v1385_v57  ;;  %v919_v48 = vrot.slane %v5223_v55, 2  ;;  %v920_v32 = vrot.slane %v7056_v40, 2  ;;  %v1035_v38 = vld [vmem:[#allocation2 + $0x98] sm:$0x3f] }
 0x100   : > { %v5332_v60 = vmul.f32 %v4058_v6, %v1741_v25  ;;  %v1478_v4 = vld [vmem:[#allocation2 + $0x98] sm:$0x3f]  ;;  %v1880_v46 = vadd.f32 %v1852_v22, %v5152_v23  ;;  %v1799_v20 = vadd.f32 %v5246_v59, %v1710_v61  ;;  %v1860_v28 = vmul.f32 %v6919_v56, %v1828_v1  ;;  %v2262_v22 = vld [vmem:[#allocation2 + $0x4c8] sm:$0x3f] }
 0x101   : > { %7064 = vst [vmem:[#allocation132_spill] sm:$0xff] %v5326_v14  ;;  %v5338_v39 = vmul.f32 %v7009_v51, %v2180_v3  ;;  %v5341_v50 = vmul.f32 %v7007_v5, %v2622_v42  ;;  %v1920_v55 = vld [vmem:[#allocation2 + $0x98] sm:$0x3f]  ;;  %v2146_v40 = vadd.f32 %v4983_v10, %v2058_v11  ;;  %v921_v9 = vsel %vm897_vm5, %v919_v48, %v920_v32  ;;  %v7073_v42 = vld [vmem:[#allocation84_spill] sm:$0xff] }
 0x102   : > { %v2359_v31 = vld [vmem:[#allocation2 + $0x98] sm:$0x3f]  ;;  %v5347_v16 = vadd.f32 %v5289_v37, %v4884_v36  ;;  %v5350_v23 = vmul.f32 %v7019_v62, %v3065_v44  ;;  %v1884_v59 = vadd.f32 %v1856_v24, %v1795_v7  ;;  %v1886_v3 = vadd.f32 %v1858_v27, %v1797_v18  ;;  %v7072_v18 = vld [vmem:[#allocation76_spill] sm:$0xff]  ;;  %v7074_v27 = vld [vmem:[#allocation90_spill] sm:$0xff] }
 0x103   : > { %7065 = vst [vmem:[#allocation78_spill] sm:$0xff] %v5341_v50  ;;  %v7067_v61 = vld [vmem:[#allocation9_spill] sm:$0xff]  ;;  %v5356_v13 = vmul.f32 %v4044_v0, %v1478_v4  ;;  %v5360_v10 = vmul.f32 %v5090_v2, %v5002_v47  ;;  %v1445_v53 = vadd.f32 %v1417_v29, %v5271_v54  ;;  %v5364_v37 = vmul.f32 %v4080_v17, %v1920_v55  ;;  %v454_v14 = vld [vmem:[%s3974_s20 + $0xd0] sm:$0xff]  ;;  %v7084_v2 = vld [vmem:[#allocation51_spill] sm:$0xff] }
 0x104   : > { %7066 = vst [vmem:[#allocation133_spill] sm:$0xff] %v5350_v23  ;;  %v5353_v57 = vmul.f32 %v7067_v61, %v1035_v38  ;;  %v1387_v36 = vld [vmem:[#allocation2 + $0x4f8] sm:$0x3f]  ;;  %v5367_v8 = vmul.f32 %v4113_v35, %v2359_v31  ;;  %v5370_v25 = vadd.f32 %v7072_v18, %v1880_v46  ;;  %v1888_v19 = vadd.f32 %v1860_v28, %v1799_v20  ;;  %v7076_v28 = vld [vmem:[#allocation110_spill] sm:$0xff] }
 0x105   : > { %7068 = vst [vmem:[#allocation92_spill] sm:$0xff] %v5356_v13  ;;  %7069 = vst [vmem:[#allocation81_spill] sm:$0xff] %v5360_v10  ;;  %v5373_v11 = vadd.f32 %v5192_v33, %v2146_v40  ;;  %v5376_v7 = vmul.f32 %v4810_v58, %v2262_v22  ;;  %v1422_v1 = vmul.f32 %v6918_v45, %v921_v9  ;;  %v7075_v33 = vld [vmem:[#allocation109_spill] sm:$0xff]  ;;  %v5395_v40 = vld [vmem:[#allocation2 + $0x2e0] sm:$0xff] }
 0x106   : > { %7070 = vst [vmem:[#allocation87_spill] sm:$0xff] %v5364_v37  ;;  %7071 = vst [vmem:[#allocation93_spill] sm:$0xff] %v5367_v8  ;;  %v1865_v54 = vmul.f32 %v6919_v56, %v921_v9  ;;  %v5381_v24 = vadd.f32 %v7073_v42, %v1884_v59  ;;  %v5384_v44 = vadd.f32 %v7074_v27, %v1886_v3  ;;  %v550_v59 = vrot.slane %v5395_v40, 6  ;;  %v7077_v22 = vld [vmem:[#allocation11_spill] sm:$0xff]  ;;  %v7081_v10 = vld [vmem:[#allocation10_spill] sm:$0xff] }
 0x107   : > { %v5387_v29 = vmul.f32 %v6918_v45, %v1387_v36  ;;  %v2303_v48 = vmul.f32 %v4810_v58, %v921_v9  ;;  %v1534_v38 = vadd.f32 %v7075_v33, %v1445_v53  ;;  %v1450_v4 = vadd.f32 %v1422_v1, %v1361_v63  ;;  %v5421_v50 = vld [vmem:[%s3974_s20 + $0xd8] sm:$0x3f]  ;;  %780 = vst [vmem:[#allocation2 + $0x330] sm:$0xff] %v454_v14 }
 0x108   : > { %v1893_v46 = vadd.f32 %v1865_v54, %v1804_v52  ;;  %v2746_v20 = vmul.f32 %v5002_v47, %v921_v9  ;;  %v5393_v55 = vadd.f32 %v7076_v28, %v1888_v19  ;;  %v1246_v3 = vmul.f32 %v5395_v40, %v7077_v22  ;;  %v7078_v19 = vld [vmem:[#allocation72_spill] sm:$0xff]  ;;  %7083 = vst [vmem:[#allocation123_spill] sm:$0xff] %v5421_v50  ;;  %v7087_v22 = vld [vmem:[#allocation141_spill] sm:$0xff] }
 0x109   : > { %v2331_v31 = vadd.f32 %v2303_v48, %v2243_v41  ;;  %v3189_v18 = vmul.f32 %v5268_v12, %v921_v9  ;;  %v976_v53 = vsel %vm968_vm4, %v920_v32, 0.0  ;;  %v1689_v63 = vmul.f32 %v5395_v40, %v6925_v34  ;;  %v7080_v48 = vld [vmem:[#allocation37_spill] sm:$0xff]  ;;  %v7085_v34 = vld [vmem:[#allocation55_spill] sm:$0xff]  ;;  %781 = vst [vmem:[#allocation2 + $0x338] sm:$0x3f] %v5421_v50 }
 0x10a   : > { %v2774_v36 = vadd.f32 %v2746_v20, %v2685_v26  ;;  %999 = vst [vmem:[#allocation2 + $0x518] sm:$0x3f] %v976_v53  ;;  %v604_v52 = vsel %vm525_vm0, 0.0, %v550_v59  ;;  %v551_v41 = vrot.slane %v7078_v19, 6  ;;  %v664_v1 = vrot.slane %v5395_v40, 7 }
 0x10b   : > { %v665_v54 = vrot.slane %v7078_v19, 7  ;;  %v5408_v42 = vadd.f32 %v3189_v18, %v3128_v15  ;;  %v1068_v26 = vmul.f32 %v7067_v61, %v604_v52  ;;  %v1511_v32 = vmul.f32 %v4044_v0, %v604_v52  ;;  %v7082_v18 = vld [vmem:[#allocation19_spill] sm:$0xff]  ;;  %v2008_v14 = vld [vmem:[#allocation2 + $0x1b8] sm:$0x3f] }
 0x10c   : > { %v1953_v9 = vmul.f32 %v4080_v17, %v604_v52  ;;  %v2392_v27 = vmul.f32 %v4113_v35, %v604_v52  ;;  %v2835_v33 = vmul.f32 %v7080_v48, %v604_v52  ;;  %v552_v20 = vsel %vm525_vm0, %v550_v59, %v551_v41  ;;  %v1124_v59 = vld [vmem:[#allocation2 + $0x1b8] sm:$0x3f]  ;;  %v7086_v41 = vld [vmem:[#allocation63_spill] sm:$0xff] }
 0x10d   : > { %7079 = vst [vmem:[#allocation134_spill] sm:$0xff] %v5408_v42  ;;  %v718_v28 = vsel %vm639_vm1, 0.0, %v664_v1  ;;  %v1539_v53 = vadd.f32 %v1511_v32, %v1450_v4  ;;  %628 = vst [vmem:[#allocation2 + $0xa8] sm:$0x3f] %v552_v20  ;;  %v2802_v20 = vld [vmem:[#allocation2 + $0x98] sm:$0x3f]  ;;  %v1623_v35 = vadd.f32 %v7087_v22, %v1534_v38 }
 0x10e   : > { %v1981_v23 = vadd.f32 %v1953_v9, %v1893_v46  ;;  %v1157_v15 = vmul.f32 %v7081_v10, %v718_v28  ;;  %v1600_v42 = vmul.f32 %v7082_v18, %v718_v28  ;;  %v2420_v8 = vadd.f32 %v2392_v27, %v2331_v31  ;;  %v1567_v27 = vld [vmem:[#allocation2 + $0x1b8] sm:$0x3f] }
 0x10f   : > { %v2863_v37 = vadd.f32 %v2835_v33, %v2774_v36  ;;  %v2041_v13 = vmul.f32 %v7084_v2, %v718_v28  ;;  %v2481_v52 = vmul.f32 %v7085_v34, %v718_v28  ;;  %v2924_v32 = vmul.f32 %v7086_v41, %v718_v28  ;;  %v1300_v33 = vld [vmem:[#allocation2 + $0x3e8] sm:$0x3f]  ;;  %v2448_v38 = vld [vmem:[#allocation2 + $0x1b8] sm:$0x3f]  ;;  %v7091_v28 = vld [vmem:[#allocation138_spill] sm:$0xff] }
 0x110   : > { %v1185_v4 = vadd.f32 %v1157_v15, %v1068_v26  ;;  %v1628_v46 = vadd.f32 %v1600_v42, %v1539_v53  ;;  %v666_v9 = vsel %vm639_vm1, %v664_v1, %v665_v54  ;;  %v2129_v36 = vmul.f32 %v5395_v40, %v4867_v43 }
 0x111   : > { %v2069_v17 = vadd.f32 %v2041_v13, %v1981_v23  ;;  %v2509_v31 = vadd.f32 %v2481_v52, %v2420_v8  ;;  %742 = vst [vmem:[#allocation2 + $0x1c8] sm:$0x3f] %v666_v9  ;;  %v2952_v50 = vadd.f32 %v2924_v32, %v2863_v37  ;;  %v2570_v1 = vmul.f32 %v5395_v40, %v4956_v30  ;;  %v7088_v23 = vld [vmem:[#allocation115_spill] sm:$0xff] }
 0x112   : > { %v5431_v0 = vadd.f32 %v1246_v3, %v1185_v4  ;;  %v5433_v42 = vadd.f32 %v1689_v63, %v1628_v46  ;;  %v1156_v54 = vmul.f32 %v7081_v10, %v1124_v59  ;;  %v2056_v13 = vadd.f32 %v7088_v23, %v5370_v25  ;;  %v2891_v3 = vld [vmem:[#allocation2 + $0x1b8] sm:$0x3f]  ;;  %v7090_v63 = vld [vmem:[#allocation130_spill] sm:$0xff]  ;;  %v2258_v4 = vld [vmem:[#allocation2 + $0x4a8] sm:$0x3f] }
 0x113   : > { %v2322_v8 = vadd.f32 %v5376_v7, %v5373_v11  ;;  %v5442_v22 = vadd.f32 %v2129_v36, %v2069_v17  ;;  %v5445_v37 = vmul.f32 %v7080_v48, %v2802_v20  ;;  %v2060_v26 = vadd.f32 %v7090_v63, %v5381_v24  ;;  %v1743_v11 = vld [vmem:[#allocation2 + $0x3e8] sm:$0x3f]  ;;  %v2260_v46 = vld [vmem:[#allocation2 + $0x4b8] sm:$0x3f]  ;;  %v7095_v20 = vld [vmem:[#allocation30_spill] sm:$0xff] }
 0x114   : > { %v2062_v53 = vadd.f32 %v7091_v28, %v5384_v44  ;;  %v2598_v15 = vadd.f32 %v2570_v1, %v2509_v31  ;;  %v5452_v52 = vmul.f32 %v7082_v18, %v1567_v27  ;;  %v5455_v25 = vmul.f32 %v7084_v2, %v2008_v14  ;;  %v2182_v24 = vld [vmem:[#allocation2 + $0x3e8] sm:$0x3f]  ;;  %v7094_v44 = vld [vmem:[#allocation142_spill] sm:$0xff]  ;;  %v7097_v14 = vld [vmem:[#allocation57_spill] sm:$0xff] }
 0x115   : > { %7089 = vst [vmem:[#allocation94_spill] sm:$0xff] %v5445_v37  ;;  %v1332_v17 = vmul.f32 %v4011_v49, %v1300_v33  ;;  %v3013_v7 = vmul.f32 %v5395_v40, %v4965_v21  ;;  %v5461_v59 = vmul.f32 %v7085_v34, %v2448_v38  ;;  %v2064_v32 = vadd.f32 %v7094_v44, %v5393_v55  ;;  %v7098_v1 = vld [vmem:[#allocation85_spill] sm:$0xff]  ;;  %v7100_v44 = vld [vmem:[#allocation32_spill] sm:$0xff] }
 0x116   : > { %7092 = vst [vmem:[#allocation129_spill] sm:$0xff] %v5455_v25  ;;  %v1447_v9 = vadd.f32 %v5387_v29, %v5347_v16  ;;  %v1712_v31 = vadd.f32 %v7095_v20, %v1623_v35  ;;  %v5469_v36 = vadd.f32 %v1156_v54, %v5353_v57  ;;  %v5472_v27 = vmul.f32 %v7086_v41, %v2891_v3  ;;  %v1830_v23 = vld [vmem:[#allocation2 + $0x4f8] sm:$0x3f]  ;;  %v2266_v3 = vld [vmem:[#allocation2 + $0x4e8] sm:$0x3f]  ;;  %v7112_v25 = vld [vmem:[#allocation24_spill] sm:$0xff] }
 0x117   : > { %7093 = vst [vmem:[#allocation135_spill] sm:$0xff] %v5461_v59  ;;  %v2144_v33 = vadd.f32 %v7097_v14, %v2056_v13  ;;  %v2411_v38 = vadd.f32 %v7098_v1, %v2322_v8  ;;  %v5477_v63 = vmul.f32 %v4058_v6, %v1743_v11  ;;  %v7099_v55 = vld [vmem:[#allocation33_spill] sm:$0xff]  ;;  %v2150_v16 = vadd.f32 %v7100_v44, %v2062_v53  ;;  %v7103_v53 = vld [vmem:[#allocation104_spill] sm:$0xff] }
 0x118   : > { %7096 = vst [vmem:[#allocation95_spill] sm:$0xff] %v5472_v27  ;;  %v2148_v28 = vadd.f32 %v7099_v55, %v2060_v26  ;;  %v3041_v29 = vadd.f32 %v3013_v7, %v2952_v50  ;;  %v7101_v35 = vld [vmem:[#allocation29_spill] sm:$0xff]  ;;  %v5485_v57 = vmul.f32 %v7009_v51, %v2182_v24  ;;  %v5488_v54 = vmul.f32 %v4810_v58, %v2258_v4  ;;  %v7104_v7 = vld [vmem:[#allocation66_spill] sm:$0xff]  ;;  %v7105_v24 = vld [vmem:[#allocation131_spill] sm:$0xff] }
 0x119   : > { %v5482_v20 = vadd.f32 %v1332_v17, %v7101_v35  ;;  %v5491_v13 = vmul.f32 %v4810_v58, %v2260_v46  ;;  %v2264_v8 = vld [vmem:[#allocation2 + $0x4d8] sm:$0x3f]  ;;  %v1801_v26 = vadd.f32 %v5332_v60, %v1712_v31  ;;  %v1862_v50 = vmul.f32 %v6919_v56, %v1830_v23  ;;  %v7106_v35 = vld [vmem:[#allocation74_spill] sm:$0xff] }
 0x11a   : > { %v7102_v11 = vld [vmem:[#allocation145_spill] sm:$0xff]  ;;  %v2152_v17 = vadd.f32 %v7103_v53, %v2064_v32  ;;  %v5498_v1 = vadd.f32 %v7104_v7, %v2144_v33  ;;  %v5501_v55 = vadd.f32 %v7105_v24, %v2411_v38  ;;  %v807_v46 = vrot.slane %v5395_v40, 1  ;;  %v7107_v60 = vld [vmem:[#allocation114_spill] sm:$0xff]  ;;  %v7108_v53 = vld [vmem:[#allocation28_spill] sm:$0xff] }
 0x11b   : > { %v1536_v14 = vadd.f32 %v7102_v11, %v1447_v9  ;;  %v2268_v4 = vld [vmem:[#allocation2 + $0x4f8] sm:$0x3f]  ;;  %v808_v44 = vrot.slane %v7078_v19, 1  ;;  %v2236_v27 = vadd.f32 %v7106_v35, %v2148_v28  ;;  %v2296_v9 = vmul.f32 %v4810_v58, %v2264_v8 }
 0x11c   : > { %v2238_v31 = vadd.f32 %v7107_v60, %v2150_v16  ;;  %v922_v23 = vrot.slane %v5395_v40, 2  ;;  %v2298_v32 = vmul.f32 %v4810_v58, %v2266_v3  ;;  %v923_v11 = vrot.slane %v7078_v19, 2 }
 0x11d   : > { %v809_v33 = vsel %vm782_vm2, %v807_v46, %v808_v44  ;;  %v862_v38 = vsel %vm853_vm3, %v808_v44, 0.0  ;;  %v1625_v7 = vadd.f32 %v7108_v53, %v1536_v14  ;;  %v1890_v24 = vadd.f32 %v1862_v50, %v1801_v26  ;;  %v5523_v26 = vld [vmem:[#allocation2 + $0x2f0] sm:$0xff] }
 0x11e   : > { %v2240_v37 = vadd.f32 %v5338_v39, %v2152_v17  ;;  %v2300_v28 = vmul.f32 %v4810_v58, %v2268_v4  ;;  %886 = vst [vmem:[#allocation2 + $0x408] sm:$0x3f] %v862_v38  ;;  %v1335_v16 = vmul.f32 %v4011_v49, %v809_v33  ;;  %v1778_v40 = vmul.f32 %v4058_v6, %v809_v33  ;;  %v7109_v38 = vld [vmem:[#allocation146_spill] sm:$0xff]  ;;  %v7113_v49 = vld [vmem:[#allocation27_spill] sm:$0xff] }
 0x11f   : > { %v2217_v8 = vmul.f32 %v7009_v51, %v809_v33  ;;  %v2659_v3 = vmul.f32 %v7007_v5, %v809_v33  ;;  %v3102_v46 = vmul.f32 %v7019_v62, %v809_v33  ;;  %v924_v19 = vsel %vm897_vm5, %v922_v23, %v923_v11 }
 0x120   : > { %v977_v14 = vsel %vm968_vm4, %v923_v11, 0.0  ;;  %v553_v39 = vrot.slane %v5523_v26, 6  ;;  %v1363_v50 = vadd.f32 %v1335_v16, %v5431_v0  ;;  %v1806_v17 = vadd.f32 %v1778_v40, %v5433_v42  ;;  %v1389_v42 = vld [vmem:[#allocation2 + $0x508] sm:$0x3f] }
 0x121   : > { %v2245_v4 = vadd.f32 %v2217_v8, %v5442_v22  ;;  %v2687_v44 = vadd.f32 %v2659_v3, %v2598_v15  ;;  %1001 = vst [vmem:[#allocation2 + $0x528] sm:$0x3f] %v977_v14  ;;  %v3130_v35 = vadd.f32 %v3102_v46, %v3041_v29  ;;  %v1424_v60 = vmul.f32 %v6918_v45, %v924_v19  ;;  %v2624_v40 = vld [vmem:[#allocation2 + $0x3e8] sm:$0x3f]  ;;  %v7111_v46 = vld [vmem:[#allocation17_spill] sm:$0xff] }
 0x122   : > { %v1867_v33 = vmul.f32 %v6919_v56, %v924_v19  ;;  %v2305_v23 = vmul.f32 %v4810_v58, %v924_v19  ;;  %v1978_v11 = vadd.f32 %v7109_v38, %v1890_v24  ;;  %v2748_v53 = vmul.f32 %v5002_v47, %v924_v19  ;;  %v3067_v38 = vld [vmem:[#allocation2 + $0x3e8] sm:$0x3f] }
 0x123   : > { %v3191_v59 = vmul.f32 %v5268_v12, %v924_v19  ;;  %v605_v0 = vsel %vm525_vm0, 0.0, %v553_v39  ;;  %v1452_v16 = vadd.f32 %v1424_v60, %v1363_v50  ;;  %v2324_v51 = vadd.f32 %v2296_v9, %v2236_v27  ;;  %v7114_v60 = vld [vmem:[#allocation113_spill] sm:$0xff] }
 0x124   : > { %v1895_v22 = vadd.f32 %v1867_v33, %v1806_v17  ;;  %v2333_v15 = vadd.f32 %v2305_v23, %v2245_v4  ;;  %v1070_v29 = vmul.f32 %v7067_v61, %v605_v0  ;;  %v2776_v8 = vadd.f32 %v2748_v53, %v2687_v44  ;;  %v7116_v23 = vld [vmem:[#allocation56_spill] sm:$0xff] }
 0x125   : > { %v5537_v3 = vadd.f32 %v3191_v59, %v3130_v35  ;;  %v1513_v14 = vmul.f32 %v7111_v46, %v605_v0  ;;  %v1955_v24 = vmul.f32 %v7112_v25, %v605_v0  ;;  %v2326_v6 = vadd.f32 %v2298_v32, %v2238_v31  ;;  %v7115_v59 = vld [vmem:[#allocation149_spill] sm:$0xff] }
 0x126   : > { %v2328_v19 = vadd.f32 %v2300_v28, %v2240_v37  ;;  %v2394_v12 = vmul.f32 %v7113_v49, %v605_v0  ;;  %v1421_v50 = vmul.f32 %v6918_v45, %v1389_v42  ;;  %v554_v33 = vrot.slane %v7114_v60, 6  ;;  %v7118_v37 = vld [vmem:[#allocation65_spill] sm:$0xff]  ;;  %v1832_v42 = vld [vmem:[#allocation2 + $0x508] sm:$0x3f] }
 0x127   : > { %7110 = vst [vmem:[#allocation44_spill] sm:$0xff] %v5537_v3  ;;  %v1541_v17 = vadd.f32 %v1513_v14, %v1452_v16  ;;  %v1983_v4 = vadd.f32 %v1955_v24, %v1895_v22  ;;  %v5545_v44 = vmul.f32 %v7007_v5, %v2624_v40  ;;  %v2066_v35 = vadd.f32 %v7115_v59, %v1978_v11  ;;  %v7119_v31 = vld [vmem:[#allocation45_spill] sm:$0xff]  ;;  %v7121_v16 = vld [vmem:[#allocation91_spill] sm:$0xff] }
 0x128   : > { %v1714_v53 = vadd.f32 %v7116_v23, %v1625_v7  ;;  %v2422_v3 = vadd.f32 %v2394_v12, %v2333_v15  ;;  %v5550_v27 = vmul.f32 %v7019_v62, %v3067_v38  ;;  %v5554_v9 = vadd.f32 %v7118_v37, %v5469_v36  ;;  %v7122_v7 = vld [vmem:[#allocation61_spill] sm:$0xff]  ;;  %v7123_v22 = vld [vmem:[#allocation111_spill] sm:$0xff] }
 0x129   : > { %v5558_v32 = vadd.f32 %v5488_v54, %v7119_v31  ;;  %v2320_v28 = vadd.f32 %v5491_v13, %v5498_v1  ;;  %v2413_v11 = vadd.f32 %v7121_v16, %v2324_v51  ;;  %v2589_v12 = vadd.f32 %v7122_v7, %v5501_v55  ;;  %v7124_v14 = vld [vmem:[#allocation147_spill] sm:$0xff]  ;;  %v7125_v51 = vld [vmem:[#allocation13_spill] sm:$0xff] }
 0x12a   : > { %7117 = vst [vmem:[#allocation96_spill] sm:$0xff] %v5550_v27  ;;  %v2415_v15 = vadd.f32 %v7123_v22, %v2326_v6  ;;  %v2837_v40 = vmul.f32 %v7080_v48, %v605_v0  ;;  %v2417_v36 = vadd.f32 %v7124_v14, %v2328_v19  ;;  %v1449_v24 = vadd.f32 %v1421_v50, %v5482_v20  ;;  %v7126_v0 = vld [vmem:[#allocation11_spill] sm:$0xff]  ;;  %v7127_v20 = vld [vmem:[#allocation20_spill] sm:$0xff] }
 0x12b   : > { %7120 = vst [vmem:[#allocation79_spill] sm:$0xff] %v5558_v32  ;;  %v555_v54 = vsel %vm525_vm0, %v553_v39, %v554_v33  ;;  %v667_v38 = vrot.slane %v5523_v26, 7  ;;  %v1803_v13 = vadd.f32 %v5477_v63, %v1714_v53  ;;  %v1864_v1 = vmul.f32 %v6919_v56, %v1832_v42  ;;  %v2270_v16 = vld [vmem:[#allocation2 + $0x508] sm:$0x3f] }
 0x12c   : > { %v2154_v59 = vadd.f32 %v7125_v51, %v2066_v35  ;;  %v2865_v23 = vadd.f32 %v2837_v40, %v2776_v8  ;;  %630 = vst [vmem:[#allocation2 + $0xb8] sm:$0x3f] %v555_v54  ;;  %v668_v55 = vrot.slane %v7114_v60, 7  ;;  %v1248_v19 = vmul.f32 %v5523_v26, %v7126_v0  ;;  %v7128_v8 = vld [vmem:[#allocation92_spill] sm:$0xff]  ;;  %v7129_v54 = vld [vmem:[#allocation150_spill] sm:$0xff] }
 0x12d   : > { %v719_v6 = vsel %vm639_vm1, 0.0, %v667_v38  ;;  %v1691_v39 = vmul.f32 %v5523_v26, %v7127_v20  ;;  %v1538_v53 = vadd.f32 %v7128_v8, %v1449_v24  ;;  %v2131_v42 = vmul.f32 %v5523_v26, %v4867_v43 }
 0x12e   : > { %v1159_v50 = vmul.f32 %v7081_v10, %v719_v6  ;;  %v1602_v63 = vmul.f32 %v7082_v18, %v719_v6  ;;  %v2043_v33 = vmul.f32 %v7084_v2, %v719_v6  ;;  %v2483_v35 = vmul.f32 %v7085_v34, %v719_v6 }
 0x12f   : > { %v2926_v37 = vmul.f32 %v7086_v41, %v719_v6  ;;  %v669_v31 = vsel %vm639_vm1, %v667_v38, %v668_v55  ;;  %v2506_v51 = vadd.f32 %v7129_v54, %v2417_v36  ;;  %v2572_v32 = vmul.f32 %v5523_v26, %v4956_v30  ;;  %v2705_v6 = vld [vmem:[#allocation2 + $0x4c8] sm:$0x3f] }
 0x130   : > { %v1187_v7 = vadd.f32 %v1159_v50, %v1070_v29  ;;  %v1630_v22 = vadd.f32 %v1602_v63, %v1541_v17  ;;  %v2071_v40 = vadd.f32 %v2043_v33, %v1983_v4  ;;  %v2511_v14 = vadd.f32 %v2483_v35, %v2422_v3  ;;  %744 = vst [vmem:[#allocation2 + $0x1d8] sm:$0x3f] %v669_v31  ;;  %v7130_v38 = vld [vmem:[#allocation139_spill] sm:$0xff]  ;;  %v2707_v29 = vld [vmem:[#allocation2 + $0x4d8] sm:$0x3f] }
 0x131   : > { %v2954_v27 = vadd.f32 %v2926_v37, %v2865_v23  ;;  %v3015_v24 = vmul.f32 %v5523_v26, %v4965_v21  ;;  %v2502_v55 = vadd.f32 %v7130_v38, %v2413_v11  ;;  %v2242_v17 = vadd.f32 %v5485_v57, %v2154_v59  ;;  %v7131_v23 = vld [vmem:[#allocation80_spill] sm:$0xff]  ;;  %v2711_v63 = vld [vmem:[#allocation2 + $0x4f8] sm:$0x3f]  ;;  %v7135_v57 = vld [vmem:[#allocation39_spill] sm:$0xff] }
 0x132   : > { %v1276_v8 = vadd.f32 %v1248_v19, %v1187_v7  ;;  %v1719_v43 = vadd.f32 %v1691_v39, %v1630_v22  ;;  %v2159_v41 = vadd.f32 %v2131_v42, %v2071_v40  ;;  %v2302_v3 = vmul.f32 %v4810_v58, %v2270_v16  ;;  %v1302_v35 = vld [vmem:[#allocation2 + $0x3f8] sm:$0x3f]  ;;  %v7134_v39 = vld [vmem:[#allocation143_spill] sm:$0xff]  ;;  %v7139_v16 = vld [vmem:[#allocation62_spill] sm:$0xff] }
 0x133   : > { %v2600_v4 = vadd.f32 %v2572_v32, %v2511_v14  ;;  %v3043_v36 = vadd.f32 %v3015_v24, %v2954_v27  ;;  %v5598_v50 = vadd.f32 %v7131_v23, %v2320_v28  ;;  %v1892_v33 = vadd.f32 %v1864_v1, %v1803_v13  ;;  %v1745_v42 = vld [vmem:[#allocation2 + $0x3f8] sm:$0x3f]  ;;  %v7136_v32 = vld [vmem:[#allocation48_spill] sm:$0xff]  ;;  %v7137_v1 = vld [vmem:[#allocation119_spill] sm:$0xff] }
 0x134   : > { %v1627_v37 = vadd.f32 %v5452_v52, %v1538_v53  ;;  %v810_v11 = vrot.slane %v5523_v26, 1  ;;  %v5603_v19 = vmul.f32 %v5002_v47, %v2705_v6  ;;  %v2504_v31 = vadd.f32 %v7134_v39, %v2415_v15  ;;  %v7138_v53 = vld [vmem:[#allocation70_spill] sm:$0xff]  ;;  %v2713_v40 = vld [vmem:[#allocation2 + $0x508] sm:$0x3f]  ;;  %v7141_v14 = vld [vmem:[#allocation12_spill] sm:$0xff] }
 0x135   : > { %7132 = vst [vmem:[#allocation97_spill] sm:$0xff] %v5598_v50  ;;  %v2595_v59 = vadd.f32 %v7135_v57, %v2506_v51  ;;  %v811_v27 = vrot.slane %v7114_v60, 1  ;;  %v5609_v28 = vadd.f32 %v7136_v32, %v2589_v12  ;;  %v5612_v13 = vmul.f32 %v5002_v47, %v2707_v29  ;;  %v7142_v51 = vld [vmem:[#allocation87_spill] sm:$0xff]  ;;  %v7143_v6 = vld [vmem:[#allocation68_spill] sm:$0xff]  ;;  %v7144_v29 = vld [vmem:[#allocation21_spill] sm:$0xff] }
 0x136   : > { %7133 = vst [vmem:[#allocation98_spill] sm:$0xff] %v5603_v19  ;;  %v5615_v52 = vadd.f32 %v7137_v1, %v2502_v55  ;;  %v5619_v7 = vmul.f32 %v7139_v16, %v7138_v53  ;;  %v5622_v15 = vmul.f32 %v5002_v47, %v2711_v63  ;;  %v2330_v22 = vadd.f32 %v2302_v3, %v2242_v17  ;;  %v7145_v39 = vld [vmem:[#allocation38_spill] sm:$0xff]  ;;  %v7146_v17 = vld [vmem:[#allocation101_spill] sm:$0xff] }
 0x137   : > { %v1334_v54 = vmul.f32 %v7141_v14, %v1302_v35  ;;  %v812_v12 = vsel %vm782_vm2, %v810_v11, %v811_v27  ;;  %v1980_v24 = vadd.f32 %v7142_v51, %v1892_v33  ;;  %v1716_v38 = vadd.f32 %v7143_v6, %v1627_v37  ;;  %v1391_v1 = vld [vmem:[#allocation2 + $0x518] sm:$0x3f]  ;;  %v5641_v50 = vld [vmem:[#allocation2 + $0x300] sm:$0xff] }
 0x138   : > { %7140 = vst [vmem:[#allocation100_spill] sm:$0xff] %v5619_v7  ;;  %v1777_v55 = vmul.f32 %v7144_v29, %v1745_v42  ;;  %v1337_v23 = vmul.f32 %v7141_v14, %v812_v12  ;;  %v2593_v57 = vadd.f32 %v7145_v39, %v2504_v31  ;;  %v2684_v32 = vadd.f32 %v5545_v44, %v2595_v59  ;;  %v1834_v11 = vld [vmem:[#allocation2 + $0x518] sm:$0x3f] }
 0x139   : > { %v1780_v63 = vmul.f32 %v7144_v29, %v812_v12  ;;  %v2219_v3 = vmul.f32 %v7146_v17, %v812_v12  ;;  %v2745_v35 = vmul.f32 %v5002_v47, %v2713_v40  ;;  %v925_v33 = vrot.slane %v5523_v26, 2  ;;  %v7147_v42 = vld [vmem:[#allocation93_spill] sm:$0xff] }
 0x13a   : > { %v1365_v16 = vadd.f32 %v1337_v23, %v1276_v8  ;;  %v926_v37 = vrot.slane %v7114_v60, 2  ;;  %v2419_v51 = vadd.f32 %v7147_v42, %v2330_v22  ;;  %v1362_v6 = vadd.f32 %v1334_v54, %v5554_v9  ;;  %v7148_v59 = vld [vmem:[#allocation129_spill] sm:$0xff] }
 0x13b   : > { %v1808_v31 = vadd.f32 %v1780_v63, %v1719_v43  ;;  %v2247_v39 = vadd.f32 %v2219_v3, %v2159_v41  ;;  %v1805_v44 = vadd.f32 %v1777_v55, %v1716_v38  ;;  %v2068_v19 = vadd.f32 %v7148_v59, %v1980_v24 }
 0x13c   : > { %v2661_v7 = vmul.f32 %v7007_v5, %v812_v12  ;;  %v556_v40 = vrot.slane %v5641_v50, 6  ;;  %v1423_v8 = vmul.f32 %v6918_v45, %v1391_v1  ;;  %v1866_v26 = vmul.f32 %v6919_v56, %v1834_v11  ;;  %v2184_v11 = vld [vmem:[#allocation2 + $0x3f8] sm:$0x3f] }
 0x13d   : > { %v3104_v60 = vmul.f32 %v7019_v62, %v812_v12  ;;  %v863_v22 = vsel %vm853_vm3, %v811_v27, 0.0  ;;  %v927_v43 = vsel %vm897_vm5, %v925_v33, %v926_v37  ;;  %v978_v41 = vsel %vm968_vm4, %v926_v37, 0.0 }
 0x13e   : > { %v2689_v9 = vadd.f32 %v2661_v7, %v2600_v4  ;;  %888 = vst [vmem:[#allocation2 + $0x418] sm:$0x3f] %v863_v22  ;;  %v606_v54 = vsel %vm525_vm0, 0.0, %v556_v40  ;;  %v1426_v38 = vmul.f32 %v6918_v45, %v927_v43  ;;  %v1869_v55 = vmul.f32 %v6919_v56, %v927_v43  ;;  %1003 = vst [vmem:[#allocation2 + $0x538] sm:$0x3f] %v978_v41 }
 0x13f   : > { %v3132_v24 = vadd.f32 %v3104_v60, %v3043_v36  ;;  %v2307_v23 = vmul.f32 %v4810_v58, %v927_v43  ;;  %v2750_v12 = vmul.f32 %v5002_v47, %v927_v43  ;;  %v3193_v27 = vmul.f32 %v7138_v53, %v927_v43  ;;  %v1480_v60 = vld [vmem:[#allocation2 + $0xa8] sm:$0x3f]  ;;  %v7150_v43 = vld [vmem:[#allocation54_spill] sm:$0xff]  ;;  %v2626_v56 = vld [vmem:[#allocation2 + $0x3f8] sm:$0x3f] }
 0x140   : > { %v5657_v4 = vmul.f32 %v7067_v61, %v606_v54  ;;  %v1515_v7 = vmul.f32 %v7111_v46, %v606_v54  ;;  %v1454_v63 = vadd.f32 %v1426_v38, %v1365_v16  ;;  %v1897_v3 = vadd.f32 %v1869_v55, %v1808_v31  ;;  %v7151_v31 = vld [vmem:[#allocation78_spill] sm:$0xff]  ;;  %v1922_v38 = vld [vmem:[#allocation2 + $0xa8] sm:$0x3f] }
 0x141   : > { %v2335_v1 = vadd.f32 %v2307_v23, %v2247_v39  ;;  %v1957_v36 = vmul.f32 %v7112_v25, %v606_v54  ;;  %v2778_v33 = vadd.f32 %v2750_v12, %v2689_v9  ;;  %v5661_v37 = vadd.f32 %v3193_v27, %v3132_v24  ;;  %v2709_v24 = vld [vmem:[#allocation2 + $0x4e8] sm:$0x3f] }
 0x142   : > { %v2396_v42 = vmul.f32 %v7113_v49, %v606_v54  ;;  %v2839_v59 = vmul.f32 %v7080_v48, %v606_v54  ;;  %v1543_v53 = vadd.f32 %v1515_v7, %v1454_v63  ;;  %v557_v41 = vrot.slane %v7150_v43, 6  ;;  %v7152_v27 = vld [vmem:[#allocation135_spill] sm:$0xff] }
 0x143   : > { %7149 = vst [vmem:[#allocation25_spill] sm:$0xff] %v5661_v37  ;;  %v5665_v22 = vadd.f32 %v1957_v36, %v1897_v3  ;;  %v670_v16 = vrot.slane %v5641_v50, 7  ;;  %v2682_v39 = vadd.f32 %v7151_v31, %v2593_v57  ;;  %v671_v9 = vrot.slane %v7150_v43, 7  ;;  %v1215_v63 = vld [vmem:[#allocation2 + $0x2e8] sm:$0x3f]  ;;  %v7153_v37 = vld [vmem:[#allocation49_spill] sm:$0xff] }
 0x144   : > { %v2424_v55 = vadd.f32 %v2396_v42, %v2335_v1  ;;  %v5670_v23 = vadd.f32 %v2839_v59, %v2778_v33  ;;  %v2773_v12 = vadd.f32 %v2745_v35, %v2684_v32  ;;  %v2216_v54 = vmul.f32 %v7146_v17, %v2184_v11  ;;  %v1658_v3 = vld [vmem:[#allocation2 + $0x2e8] sm:$0x3f]  ;;  %v7155_v35 = vld [vmem:[#allocation69_spill] sm:$0xff] }
 0x145   : > { %v2508_v7 = vadd.f32 %v7152_v27, %v2419_v51  ;;  %v558_v36 = vsel %vm525_vm0, %v556_v40, %v557_v41  ;;  %v2156_v48 = vadd.f32 %v7153_v37, %v2068_v19  ;;  %v1451_v57 = vadd.f32 %v1423_v8, %v1362_v6  ;;  %v1037_v31 = vld [vmem:[#allocation2 + $0xa8] sm:$0x3f]  ;;  %v2715_v27 = vld [vmem:[#allocation2 + $0x518] sm:$0x3f] }
 0x146   : > { %v1512_v1 = vmul.f32 %v7111_v46, %v1480_v60  ;;  %v1126_v33 = vld [vmem:[#allocation2 + $0x1c8] sm:$0x3f]  ;;  %632 = vst [vmem:[#allocation2 + $0xc8] sm:$0x3f] %v558_v36  ;;  %v672_v42 = vsel %vm639_vm1, %v670_v16, %v671_v9  ;;  %v5681_v32 = vadd.f32 %v5612_v13, %v5609_v28  ;;  %v2680_v51 = vadd.f32 %v7155_v35, %v5615_v52  ;;  %v7156_v60 = vld [vmem:[#allocation26_spill] sm:$0xff] }
 0x147   : > { %v1894_v11 = vadd.f32 %v1866_v26, %v1805_v44  ;;  %v1954_v40 = vmul.f32 %v7112_v25, %v1922_v38  ;;  %746 = vst [vmem:[#allocation2 + $0x1e8] sm:$0x3f] %v672_v42  ;;  %v2741_v19 = vmul.f32 %v5002_v47, %v2709_v24  ;;  %v2771_v6 = vadd.f32 %v5622_v15, %v2682_v39  ;;  %v1569_v8 = vld [vmem:[#allocation2 + $0x1c8] sm:$0x3f]  ;;  %v7157_v26 = vld [vmem:[#allocation94_spill] sm:$0xff] }
 0x148   : > { %7154 = vst [vmem:[#allocation124_spill] sm:$0xff] %v5681_v32  ;;  %v1247_v37 = vmul.f32 %v7126_v0, %v1215_v63  ;;  %v1690_v59 = vmul.f32 %v7127_v20, %v1658_v3  ;;  %v2597_v41 = vadd.f32 %v7156_v60, %v2508_v7  ;;  %v2658_v28 = vmul.f32 %v7007_v5, %v2626_v56  ;;  %v2010_v44 = vld [vmem:[#allocation2 + $0x1c8] sm:$0x3f]  ;;  %v2272_v39 = vld [vmem:[#allocation2 + $0x518] sm:$0x3f] }
 0x149   : > { %v1069_v13 = vmul.f32 %v7067_v61, %v1037_v31  ;;  %v1158_v52 = vmul.f32 %v7081_v10, %v1126_v33  ;;  %v2862_v38 = vadd.f32 %v7157_v26, %v2773_v12  ;;  %v2244_v9 = vadd.f32 %v2216_v54, %v2156_v48  ;;  %v2098_v36 = vld [vmem:[#allocation2 + $0x2e8] sm:$0x3f]  ;;  %v3069_v26 = vld [vmem:[#allocation2 + $0x3f8] sm:$0x3f] }
 0x14a   : > { %v1540_v24 = vadd.f32 %v1512_v1, %v1451_v57  ;;  %v720_v15 = vsel %vm639_vm1, 0.0, %v670_v16  ;;  %v1982_v63 = vadd.f32 %v1954_v40, %v1894_v11  ;;  %v1601_v3 = vmul.f32 %v7082_v18, %v1569_v8  ;;  %v7158_v48 = vld [vmem:[#allocation63_spill] sm:$0xff]  ;;  %v7159_v40 = vld [vmem:[#allocation14_spill] sm:$0xff] }
 0x14b   : > { %v1161_v7 = vmul.f32 %v7081_v10, %v720_v15  ;;  %v1604_v56 = vmul.f32 %v7082_v18, %v720_v15  ;;  %v2042_v31 = vmul.f32 %v7084_v2, %v2010_v44  ;;  %v2045_v33 = vmul.f32 %v7084_v2, %v720_v15  ;;  %v1304_v60 = vld [vmem:[#allocation2 + $0x408] sm:$0x3f] }
 0x14c   : > { %v2485_v12 = vmul.f32 %v7085_v34, %v720_v15  ;;  %v2928_v54 = vmul.f32 %v7158_v48, %v720_v15  ;;  %v2686_v57 = vadd.f32 %v2658_v28, %v2597_v41  ;;  %v1186_v16 = vadd.f32 %v1158_v52, %v1069_v13 }
 0x14d   : > { %v1189_v1 = vadd.f32 %v1161_v7, %v5657_v4  ;;  %v1632_v42 = vadd.f32 %v1604_v56, %v1543_v53  ;;  %v2304_v35 = vmul.f32 %v4810_v58, %v2272_v39  ;;  %v2747_v11 = vmul.f32 %v5002_v47, %v2715_v27  ;;  %v2361_v39 = vld [vmem:[#allocation2 + $0xa8] sm:$0x3f] }
 0x14e   : > { %v2130_v8 = vmul.f32 %v7159_v40, %v2098_v36  ;;  %v1250_v44 = vmul.f32 %v5641_v50, %v7126_v0  ;;  %v2073_v32 = vadd.f32 %v2045_v33, %v5665_v22  ;;  %v2513_v2 = vadd.f32 %v2485_v12, %v2424_v55  ;;  %v7161_v36 = vld [vmem:[#allocation148_spill] sm:$0xff]  ;;  %v7163_v56 = vld [vmem:[#allocation95_spill] sm:$0xff] }
 0x14f   : > { %v1693_v41 = vmul.f32 %v5641_v50, %v7127_v20  ;;  %v2133_v4 = vmul.f32 %v5641_v50, %v7159_v40  ;;  %v1629_v53 = vadd.f32 %v1601_v3, %v1540_v24  ;;  %v2070_v28 = vadd.f32 %v2042_v31, %v1982_v63  ;;  %v1747_v63 = vld [vmem:[#allocation2 + $0x408] sm:$0x3f]  ;;  %v1039_v31 = vld [vmem:[#allocation2 + $0xb8] sm:$0x3f] }
 0x150   : > { %v2956_v13 = vadd.f32 %v2928_v54, %v5670_v23  ;;  %v2574_v52 = vmul.f32 %v5641_v50, %v4956_v30  ;;  %v5717_v15 = vadd.f32 %v2741_v19, %v2680_v51  ;;  %v1275_v27 = vadd.f32 %v1247_v37, %v1186_v16  ;;  %v1393_v37 = vld [vmem:[#allocation2 + $0x528] sm:$0x3f]  ;;  %v1128_v16 = vld [vmem:[#allocation2 + $0x1d8] sm:$0x3f] }
 0x151   : > { %v1336_v22 = vmul.f32 %v7141_v14, %v1304_v60  ;;  %v3017_v55 = vmul.f32 %v5641_v50, %v4965_v21  ;;  %v5723_v7 = vadd.f32 %v7161_v36, %v2771_v6  ;;  %v5726_v24 = vadd.f32 %v7163_v56, %v2862_v38 }
 0x152   : > { %7160 = vst [vmem:[#allocation76_spill] sm:$0xff] %v5717_v15  ;;  %v5729_v23 = vmul.f32 %v7019_v62, %v3069_v26  ;;  %v1278_v3 = vadd.f32 %v1250_v44, %v1189_v1  ;;  %v5731_v51 = vadd.f32 %v2304_v35, %v2244_v9  ;;  %v5733_v19 = vadd.f32 %v2747_v11, %v2686_v57  ;;  %v5777_v15 = vld [vmem:[%s3966_s17 + $0x18] ss:$0 sm:$0xff] }
 0x153   : > { %7162 = vst [vmem:[#allocation84_spill] sm:$0xff] %v5723_v7  ;;  %v1721_v33 = vadd.f32 %v1693_v41, %v1632_v42  ;;  %v2161_v12 = vadd.f32 %v2133_v4, %v2073_v32  ;;  %v5736_v54 = vmul.f32 %v7113_v49, %v2361_v39  ;;  %v5738_v6 = vadd.f32 %v1690_v59, %v1629_v53  ;;  %v7164_v41 = vld [vmem:[#allocation64_spill] sm:$0xff] }
 0x154   : > { %v5740_v38 = vadd.f32 %v2130_v8, %v2070_v28  ;;  %v2602_v60 = vadd.f32 %v2574_v52, %v2513_v2  ;;  %v5742_v26 = vadd.f32 %v1336_v22, %v1275_v27  ;;  %v1779_v9 = vmul.f32 %v7144_v29, %v1747_v63  ;;  %v5756_v8 = vld [vmem:[#allocation2 + $0x310] sm:$0xff] }
 0x155   : > { %v3045_v1 = vadd.f32 %v3017_v55, %v2956_v13  ;;  %v813_v57 = vrot.slane %v5641_v50, 1  ;;  %v5747_v35 = vmul.f32 %v6918_v45, %v1393_v37  ;;  %v5750_v32 = vmul.f32 %v7067_v61, %v1039_v31  ;;  %v7165_v13 = vld [vmem:[#allocation22_spill] sm:$0xff] }
 0x156   : > { %v814_v59 = vrot.slane %v7150_v43, 1  ;;  %v928_v42 = vrot.slane %v5641_v50, 2  ;;  %v1160_v11 = vmul.f32 %v7081_v10, %v1128_v16  ;;  %v929_v2 = vrot.slane %v7150_v43, 2 }
 0x157   : > { %v559_v44 = vrot.slane %v5756_v8, 6  ;;  %v560_v4 = vrot.slane %v7164_v41, 6  ;;  %v674_v52 = vrot.slane %v7164_v41, 7  ;;  %v2539_v41 = vld [vmem:[#allocation2 + $0x2e8] sm:$0x3f] }
 0x158   : > { %v815_v53 = vsel %vm782_vm2, %v813_v57, %v814_v59  ;;  %v864_v28 = vsel %vm853_vm3, %v814_v59, 0.0  ;;  %v930_v55 = vsel %vm897_vm5, %v928_v42, %v929_v2  ;;  %v979_v36 = vsel %vm968_vm4, %v929_v2, 0.0 }
 0x159   : > { %v1339_v50 = vmul.f32 %v7141_v14, %v815_v53  ;;  %v1782_v39 = vmul.f32 %v7144_v29, %v815_v53  ;;  %v2221_v43 = vmul.f32 %v7146_v17, %v815_v53  ;;  %v2663_v27 = vmul.f32 %v7007_v5, %v815_v53  ;;  %890 = vst [vmem:[#allocation2 + $0x428] sm:$0x3f] %v864_v28 }
 0x15a   : > { %v3106_v22 = vmul.f32 %v7019_v62, %v815_v53  ;;  %v607_v56 = vsel %vm525_vm0, 0.0, %v559_v44  ;;  %1005 = vst [vmem:[#allocation2 + $0x548] sm:$0x3f] %v979_v36  ;;  %v1428_v59 = vmul.f32 %v6918_v45, %v930_v55  ;;  %v1871_v7 = vmul.f32 %v7165_v13, %v930_v55  ;;  %v7167_v62 = vld [vmem:[#allocation37_spill] sm:$0xff] }
 0x15b   : > { %v1367_v63 = vadd.f32 %v1339_v50, %v1278_v3  ;;  %v1810_v37 = vadd.f32 %v1782_v39, %v1721_v33  ;;  %v2249_v31 = vadd.f32 %v2221_v43, %v2161_v12  ;;  %v2691_v16 = vadd.f32 %v2663_v27, %v2602_v60  ;;  %v2186_v33 = vld [vmem:[#allocation2 + $0x408] sm:$0x3f]  ;;  %v1217_v27 = vld [vmem:[#allocation2 + $0x2f8] sm:$0x3f] }
 0x15c   : > { %v3134_v57 = vadd.f32 %v3106_v22, %v3045_v1  ;;  %v2309_v28 = vmul.f32 %v4810_v58, %v930_v55  ;;  %v2752_v53 = vmul.f32 %v5002_v47, %v930_v55  ;;  %v3195_v42 = vmul.f32 %v5777_v15, %v930_v55  ;;  %v1836_v12 = vld [vmem:[#allocation2 + $0x528] sm:$0x3f] }
 0x15d   : > { %v1074_v2 = vmul.f32 %v7067_v61, %v607_v56  ;;  %v1517_v3 = vmul.f32 %v7111_v46, %v607_v56  ;;  %v1456_v60 = vadd.f32 %v1428_v59, %v1367_v63  ;;  %v1899_v1 = vadd.f32 %v1871_v7, %v1810_v37  ;;  %v2804_v43 = vld [vmem:[#allocation2 + $0xa8] sm:$0x3f]  ;;  %v1482_v61 = vld [vmem:[#allocation2 + $0xb8] sm:$0x3f] }
 0x15e   : > { %v2337_v50 = vadd.f32 %v2309_v28, %v2249_v31  ;;  %v1959_v39 = vmul.f32 %v7112_v25, %v607_v56  ;;  %v2780_v22 = vadd.f32 %v2752_v53, %v2691_v16  ;;  %v5783_v36 = vadd.f32 %v3195_v42, %v3134_v57  ;;  %v2450_v37 = vld [vmem:[#allocation2 + $0x1c8] sm:$0x3f] }
 0x15f   : > { %v2398_v47 = vmul.f32 %v7113_v49, %v607_v56  ;;  %v2841_v55 = vmul.f32 %v7167_v62, %v607_v56  ;;  %v1545_v29 = vadd.f32 %v1517_v3, %v1456_v60  ;;  %v561_v5 = vsel %vm525_vm0, %v559_v44, %v560_v4  ;;  %v2893_v31 = vld [vmem:[#allocation2 + $0x1c8] sm:$0x3f]  ;;  %v1924_v60 = vld [vmem:[#allocation2 + $0xb8] sm:$0x3f] }
 0x160   : > { %7166 = vst [vmem:[#allocation90_spill] sm:$0xff] %v5783_v36  ;;  %v1987_v40 = vadd.f32 %v1959_v39, %v1899_v1  ;;  %v7168_v7 = vrot.slane %v5756_v8, 7  ;;  %v1807_v16 = vadd.f32 %v1779_v9, %v5738_v6  ;;  %v2218_v57 = vmul.f32 %v7146_v17, %v2186_v33  ;;  %634 = vst [vmem:[#allocation2 + $0xd8] sm:$0x3f] %v561_v5  ;;  %v2274_v53 = vld [vmem:[#allocation2 + $0x528] sm:$0x3f] }
 0x161   : > { %v1868_v59 = vmul.f32 %v7165_v13, %v1836_v12  ;;  %v2426_v28 = vadd.f32 %v2398_v47, %v2337_v50  ;;  %v2836_v56 = vmul.f32 %v7167_v62, %v2804_v43  ;;  %v1188_v44 = vadd.f32 %v1160_v11, %v5750_v32  ;;  %v1306_v5 = vld [vmem:[#allocation2 + $0x418] sm:$0x3f] }
 0x162   : > { %v675_v63 = vsel %vm639_vm1, %v7168_v7, %v674_v52  ;;  %v1249_v4 = vmul.f32 %v7126_v0, %v1217_v27  ;;  %v2869_v42 = vadd.f32 %v2841_v55, %v2780_v22  ;;  %v7169_v52 = vld [vmem:[#allocation132_spill] sm:$0xff]  ;;  %v2571_v6 = vmul.f32 %v4956_v30, %v2539_v41  ;;  %v1571_v50 = vld [vmem:[#allocation2 + $0x1d8] sm:$0x3f] }
 0x163   : > { %748 = vst [vmem:[#allocation2 + $0x1f8] sm:$0x3f] %v675_v63  ;;  %v3040_v3 = vadd.f32 %v7169_v52, %v5726_v24  ;;  %v1453_v9 = vadd.f32 %v5747_v35, %v5742_v26  ;;  %v1514_v47 = vmul.f32 %v7111_v46, %v1482_v61  ;;  %v2421_v33 = vadd.f32 %v5736_v54, %v5731_v51  ;;  %v1395_v54 = vld [vmem:[#allocation2 + $0x538] sm:$0x3f] }
 0x164   : > { %v2864_v12 = vadd.f32 %v2836_v56, %v5733_v19  ;;  %v2482_v32 = vmul.f32 %v7085_v34, %v2450_v37  ;;  %v2925_v11 = vmul.f32 %v7158_v48, %v2893_v31  ;;  %v2246_v24 = vadd.f32 %v2218_v57, %v5740_v38  ;;  %v7171_v38 = vld [vmem:[#allocation51_spill] sm:$0xff]  ;;  %v2363_v63 = vld [vmem:[#allocation2 + $0xb8] sm:$0x3f] }
 0x165   : > { %v1896_v1 = vadd.f32 %v1868_v59, %v1807_v16  ;;  %v2306_v41 = vmul.f32 %v4810_v58, %v2274_v53  ;;  %v7170_v26 = vmov %v7168_v7  ;;  %v1277_v35 = vadd.f32 %v1249_v4, %v1188_v44  ;;  %v2982_v7 = vld [vmem:[#allocation2 + $0x2e8] sm:$0x3f]  ;;  %v2012_v53 = vld [vmem:[#allocation2 + $0x1d8] sm:$0x3f] }
 0x166   : > { %v721_v61 = vsel %vm639_vm1, 0.0, %v7170_v26  ;;  %v1338_v51 = vmul.f32 %v7141_v14, %v1306_v5  ;;  %v1542_v43 = vadd.f32 %v1514_v47, %v1453_v9  ;;  %v1956_v27 = vmul.f32 %v7112_v25, %v1924_v60  ;;  %v1660_v44 = vld [vmem:[#allocation2 + $0x2f8] sm:$0x3f] }
 0x167   : > { %v1163_v19 = vmul.f32 %v7081_v10, %v721_v61  ;;  %v1606_v39 = vmul.f32 %v7082_v18, %v721_v61  ;;  %v2047_v22 = vmul.f32 %v7171_v38, %v721_v61  ;;  %v2487_v55 = vmul.f32 %v7085_v34, %v721_v61  ;;  %v3158_v9 = vld [vmem:[#allocation2 + $0x518] sm:$0x3f] }
 0x168   : > { %v1603_v37 = vmul.f32 %v7082_v18, %v1571_v50  ;;  %v2930_v57 = vmul.f32 %v7158_v48, %v721_v61  ;;  %v2510_v59 = vadd.f32 %v2482_v32, %v2421_v33  ;;  %v2953_v56 = vadd.f32 %v2925_v11, %v2864_v12  ;;  %v1484_v12 = vld [vmem:[#allocation2 + $0xc8] sm:$0x3f] }
 0x169   : > { %v1191_v31 = vadd.f32 %v1163_v19, %v1074_v2  ;;  %v1634_v16 = vadd.f32 %v1606_v39, %v1545_v29  ;;  %v1427_v4 = vmul.f32 %v6918_v45, %v1395_v54  ;;  %v1252_v52 = vmul.f32 %v5756_v8, %v7126_v0  ;;  %v2628_v11 = vld [vmem:[#allocation2 + $0x408] sm:$0x3f] }
 0x16a   : > { %v1366_v47 = vadd.f32 %v1338_v51, %v1277_v35  ;;  %v2075_v5 = vadd.f32 %v2047_v22, %v1987_v40  ;;  %v2515_v60 = vadd.f32 %v2487_v55, %v2426_v28  ;;  %v1695_v50 = vmul.f32 %v5756_v8, %v7127_v20  ;;  %v2100_v35 = vld [vmem:[#allocation2 + $0x2f8] sm:$0x3f]  ;;  %v7172_v22 = vld [vmem:[#allocation102_spill] sm:$0xff] }
 0x16b   : > { %v3014_v29 = vmul.f32 %v4965_v21, %v2982_v7  ;;  %v2334_v2 = vadd.f32 %v2306_v41, %v2246_v24  ;;  %v2395_v33 = vmul.f32 %v7113_v49, %v2363_v63  ;;  %v2958_v32 = vadd.f32 %v2930_v57, %v2869_v42  ;;  %v2452_v24 = vld [vmem:[#allocation2 + $0x1d8] sm:$0x3f]  ;;  %v1041_v63 = vld [vmem:[#allocation2 + $0xc8] sm:$0x3f] }
 0x16c   : > { %v1984_v26 = vadd.f32 %v1956_v27, %v1896_v1  ;;  %v1631_v61 = vadd.f32 %v1603_v37, %v1542_v43  ;;  %v2044_v54 = vmul.f32 %v7171_v38, %v2012_v53  ;;  %v1692_v19 = vmul.f32 %v7127_v20, %v1660_v44  ;;  %v1749_v42 = vld [vmem:[#allocation2 + $0x418] sm:$0x3f] }
 0x16d   : > { %v5831_v40 = vadd.f32 %v5729_v23, %v3040_v3  ;;  %v5834_v28 = vmul.f32 %v5777_v15, %v3158_v9  ;;  %v5836_v51 = vadd.f32 %v2571_v6, %v2510_v59  ;;  %v1280_v41 = vadd.f32 %v1252_v52, %v1191_v31  ;;  %v7173_v23 = vld [vmem:[#allocation14_spill] sm:$0xff]  ;;  %v7175_v9 = vld [vmem:[#allocation9_spill] sm:$0xff] }
 0x16e   : > { %v5838_v39 = vadd.f32 %v3014_v29, %v2953_v56  ;;  %v1455_v1 = vadd.f32 %v1427_v4, %v1366_v47  ;;  %v1516_v43 = vmul.f32 %v7111_v46, %v1484_v12  ;;  %v1723_v27 = vadd.f32 %v1695_v50, %v1634_v16  ;;  %v1130_v16 = vld [vmem:[#allocation2 + $0x1e8] sm:$0x3f]  ;;  %v7174_v56 = vld [vmem:[#allocation21_spill] sm:$0xff] }
 0x16f   : > { %v5842_v55 = vmul.f32 %v7172_v22, %v2628_v11  ;;  %v5844_v7 = vadd.f32 %v2395_v33, %v2334_v2  ;;  %v5847_v3 = vmul.f32 %v7173_v23, %v2100_v35  ;;  %v2135_v6 = vmul.f32 %v5756_v8, %v7173_v23  ;;  %v7176_v2 = vld [vmem:[#allocation64_spill] sm:$0xff] }
 0x170   : > { %v5851_v37 = vadd.f32 %v2044_v54, %v1984_v26  ;;  %v5854_v31 = vmul.f32 %v7085_v34, %v2452_v24  ;;  %v5856_v57 = vadd.f32 %v1692_v19, %v1631_v61  ;;  %v2576_v59 = vmul.f32 %v5756_v8, %v4956_v30  ;;  %v5877_v19 = vld [vmem:[#allocation2 + $0x320] sm:$0xff]  ;;  %v7177_v24 = vld [vmem:[#allocation136_spill] sm:$0xff] }
 0x171   : > { %v5861_v53 = vmul.f32 %v7174_v56, %v1749_v42  ;;  %v2163_v44 = vadd.f32 %v2135_v6, %v2075_v5  ;;  %v3019_v4 = vmul.f32 %v5756_v8, %v4965_v21  ;;  %v816_v52 = vrot.slane %v5756_v8, 1 }
 0x172   : > { %v5867_v47 = vmul.f32 %v7175_v9, %v1041_v63  ;;  %v5869_v50 = vadd.f32 %v1516_v43, %v1455_v1  ;;  %v2604_v29 = vadd.f32 %v2576_v59, %v2515_v60  ;;  %v817_v33 = vrot.slane %v7176_v2, 1  ;;  %v7178_v43 = vld [vmem:[#allocation16_spill] sm:$0xff] }
 0x173   : > { %v1162_v12 = vmul.f32 %v7081_v10, %v1130_v16  ;;  %v3047_v11 = vadd.f32 %v3019_v4, %v2958_v32  ;;  %v931_v26 = vrot.slane %v5756_v8, 2  ;;  %v932_v5 = vrot.slane %v7176_v2, 2 }
 0x174   : > { %v818_v61 = vsel %vm782_vm2, %v816_v52, %v817_v33  ;;  %v865_v54 = vsel %vm853_vm3, %v817_v33, 0.0  ;;  %v562_v35 = vrot.slane %v5877_v19, 6  ;;  %v563_v42 = vrot.slane %v7177_v24, 6 }
 0x175   : > { %v1341_v60 = vmul.f32 %v7141_v14, %v818_v61  ;;  %v1784_v1 = vmul.f32 %v7174_v56, %v818_v61  ;;  %v2223_v32 = vmul.f32 %v7146_v17, %v818_v61  ;;  %v2665_v8 = vmul.f32 %v7172_v22, %v818_v61  ;;  %892 = vst [vmem:[#allocation2 + $0x438] sm:$0x3f] %v865_v54  ;;  %v1573_v22 = vld [vmem:[#allocation2 + $0x1e8] sm:$0x3f] }
 0x176   : > { %v3108_v63 = vmul.f32 %v7178_v43, %v818_v61  ;;  %v933_v6 = vsel %vm897_vm5, %v931_v26, %v932_v5  ;;  %v980_v16 = vsel %vm968_vm4, %v932_v5, 0.0  ;;  %v608_v59 = vsel %vm525_vm0, 0.0, %v562_v35  ;;  %v7179_v61 = vld [vmem:[#allocation59_spill] sm:$0xff] }
 0x177   : > { %v1369_v4 = vadd.f32 %v1341_v60, %v1280_v41  ;;  %v1812_v52 = vadd.f32 %v1784_v1, %v1723_v27  ;;  %v2251_v2 = vadd.f32 %v2223_v32, %v2163_v44  ;;  %v2693_v33 = vadd.f32 %v2665_v8, %v2604_v29  ;;  %1007 = vst [vmem:[#allocation2 + $0x558] sm:$0x3f] %v980_v16  ;;  %v3071_v27 = vld [vmem:[#allocation2 + $0x408] sm:$0x3f]  ;;  %v2541_v32 = vld [vmem:[#allocation2 + $0x2f8] sm:$0x3f] }
 0x178   : > { %v3136_v36 = vadd.f32 %v3108_v63, %v3047_v11  ;;  %v1430_v10 = vmul.f32 %v6918_v45, %v933_v6  ;;  %v1873_v21 = vmul.f32 %v7165_v13, %v933_v6  ;;  %v2311_v54 = vmul.f32 %v4810_v58, %v933_v6  ;;  %v2717_v44 = vld [vmem:[#allocation2 + $0x528] sm:$0x3f]  ;;  %v2188_v45 = vld [vmem:[#allocation2 + $0x418] sm:$0x3f] }
 0x179   : > { %v2754_v9 = vmul.f32 %v7179_v61, %v933_v6  ;;  %v3197_v26 = vmul.f32 %v5777_v15, %v933_v6  ;;  %v1519_v5 = vmul.f32 %v7111_v46, %v608_v59  ;;  %v1961_v41 = vmul.f32 %v7112_v25, %v608_v59  ;;  %v1219_v8 = vld [vmem:[#allocation2 + $0x308] sm:$0x3f]  ;;  %v1838_v46 = vld [vmem:[#allocation2 + $0x538] sm:$0x3f] }
 0x17a   : > { %v1458_v29 = vadd.f32 %v1430_v10, %v1369_v4  ;;  %v1901_v60 = vadd.f32 %v1873_v21, %v1812_v52  ;;  %v2339_v11 = vadd.f32 %v2311_v54, %v2251_v2  ;;  %v2400_v1 = vmul.f32 %v7113_v49, %v608_v59 }
 0x17b   : > { %v2782_v63 = vadd.f32 %v2754_v9, %v2693_v33  ;;  %v5897_v16 = vadd.f32 %v3197_v26, %v3136_v36  ;;  %v2843_v48 = vmul.f32 %v7167_v62, %v608_v59  ;;  %v564_v6 = vsel %vm525_vm0, %v562_v35, %v563_v42  ;;  %v1662_v9 = vld [vmem:[#allocation2 + $0x308] sm:$0x3f]  ;;  %v2806_v33 = vld [vmem:[#allocation2 + $0xb8] sm:$0x3f] }
 0x17c   : > { %v1605_v34 = vmul.f32 %v7082_v18, %v1573_v22  ;;  %v1547_v56 = vadd.f32 %v1519_v5, %v1458_v29  ;;  %v1989_v23 = vadd.f32 %v1961_v41, %v1901_v60  ;;  %v2428_v10 = vadd.f32 %v2400_v1, %v2339_v11  ;;  %636 = vst [vmem:[#allocation2 + $0xe8] sm:$0x3f] %v564_v6  ;;  %v3156_v59 = vld [vmem:[#allocation2 + $0x508] sm:$0x3f]  ;;  %v7181_v5 = vld [vmem:[#allocation76_spill] sm:$0xff] }
 0x17d   : > { %7180 = vst [vmem:[#allocation109_spill] sm:$0xff] %v5897_v16  ;;  %v2688_v21 = vadd.f32 %v5842_v55, %v5836_v51  ;;  %v3103_v4 = vmul.f32 %v7178_v43, %v3071_v27  ;;  %v2749_v36 = vmul.f32 %v7179_v61, %v2717_v44  ;;  %v2871_v52 = vadd.f32 %v2843_v48, %v2782_v63  ;;  %v1308_v26 = vld [vmem:[#allocation2 + $0x428] sm:$0x3f]  ;;  %v7184_v41 = vld [vmem:[#allocation84_spill] sm:$0xff]  ;;  %v2276_v27 = vld [vmem:[#allocation2 + $0x538] sm:$0x3f] }
 0x17e   : > { %v2512_v35 = vadd.f32 %v5854_v31, %v5844_v7  ;;  %v2573_v42 = vmul.f32 %v4956_v30, %v2541_v32  ;;  %v1190_v22 = vadd.f32 %v1162_v12, %v5867_v47  ;;  %v1251_v2 = vmul.f32 %v7126_v0, %v1219_v8  ;;  %v7182_v7 = vld [vmem:[#allocation112_spill] sm:$0xff]  ;;  %v7185_v47 = vld [vmem:[#allocation53_spill] sm:$0xff]  ;;  %v1397_v63 = vld [vmem:[#allocation2 + $0x548] sm:$0x3f] }
 0x17f   : > { %v2160_v51 = vadd.f32 %v5847_v3, %v5851_v37  ;;  %v1809_v55 = vadd.f32 %v5861_v53, %v5856_v57  ;;  %v2220_v54 = vmul.f32 %v7146_v17, %v2188_v45  ;;  %v1870_v48 = vmul.f32 %v7165_v13, %v1838_v46  ;;  %v1926_v53 = vld [vmem:[#allocation2 + $0xc8] sm:$0x3f] }
 0x180   : > { %v5919_v31 = vadd.f32 %v7182_v7, %v7181_v5  ;;  %v5923_v12 = vadd.f32 %v7185_v47, %v7184_v41  ;;  %v1633_v44 = vadd.f32 %v1605_v34, %v5869_v50  ;;  %v1694_v3 = vmul.f32 %v7127_v20, %v1662_v9  ;;  %v7194_v41 = vld [vmem:[#allocation63_spill] sm:$0xff] }
 0x181   : > { %v5928_v37 = vmul.f32 %v5777_v15, %v3156_v59  ;;  %v5932_v45 = vadd.f32 %v5834_v28, %v5831_v40  ;;  %v5935_v46 = vadd.f32 %v3103_v4, %v5838_v39  ;;  %v5937_v57 = vadd.f32 %v2749_v36, %v2688_v21  ;;  %v1751_v39 = vld [vmem:[#allocation2 + $0x428] sm:$0x3f]  ;;  %v1043_v4 = vld [vmem:[#allocation2 + $0xd8] sm:$0x3f] }
 0x182   : > { %7183 = vst [vmem:[#allocation110_spill] sm:$0xff] %v5919_v31  ;;  %7186 = vst [vmem:[#allocation72_spill] sm:$0xff] %v5923_v12  ;;  %v5940_v29 = vmul.f32 %v7167_v62, %v2806_v33  ;;  %v1279_v60 = vadd.f32 %v1251_v2, %v1190_v22  ;;  %v1340_v34 = vmul.f32 %v7141_v14, %v1308_v26  ;;  %v676_v50 = vrot.slane %v5877_v19, 7  ;;  %v7191_v2 = vld [vmem:[#allocation21_spill] sm:$0xff] }
 0x183   : > { %7187 = vst [vmem:[#allocation19_spill] sm:$0xff] %v5928_v37  ;;  %7188 = vst [vmem:[#allocation141_spill] sm:$0xff] %v5932_v45  ;;  %v5944_v11 = vadd.f32 %v2573_v42, %v2512_v35  ;;  %v5946_v1 = vadd.f32 %v2220_v54, %v2160_v51  ;;  %v5948_v40 = vadd.f32 %v1870_v48, %v1809_v55  ;;  %v677_v21 = vrot.slane %v7177_v24, 7  ;;  %v7190_v35 = vld [vmem:[#allocation14_spill] sm:$0xff]  ;;  %v7192_v51 = vld [vmem:[#allocation55_spill] sm:$0xff] }
 0x184   : > { %7189 = vst [vmem:[#allocation115_spill] sm:$0xff] %v5935_v46  ;;  %v2308_v28 = vmul.f32 %v4810_v58, %v2276_v27  ;;  %v5952_v32 = vmul.f32 %v7112_v25, %v1926_v53  ;;  %v5954_v8 = vadd.f32 %v1694_v3, %v1633_v44  ;;  %v722_v6 = vsel %vm639_vm1, 0.0, %v676_v50  ;;  %v7193_v48 = vld [vmem:[#allocation18_spill] sm:$0xff]  ;;  %v7195_v27 = vld [vmem:[#allocation9_spill] sm:$0xff] }
 0x185   : > { %v1608_v36 = vmul.f32 %v7082_v18, %v722_v6  ;;  %v2049_v9 = vmul.f32 %v7171_v38, %v722_v6  ;;  %v1697_v59 = vmul.f32 %v5877_v19, %v7127_v20  ;;  %v2137_v42 = vmul.f32 %v5877_v19, %v7190_v35  ;;  %v1132_v3 = vld [vmem:[#allocation2 + $0x1f8] sm:$0x3f] }
 0x186   : > { %v5964_v22 = vadd.f32 %v1340_v34, %v1279_v60  ;;  %v5967_v33 = vmul.f32 %v7191_v2, %v1751_v39  ;;  %v2489_v55 = vmul.f32 %v7192_v51, %v722_v6  ;;  %v2578_v54 = vmul.f32 %v5877_v19, %v4956_v30  ;;  %v7196_v34 = vld [vmem:[#allocation7_spill] sm:$0xff] }
 0x187   : > { %v5973_v26 = vmul.f32 %v7193_v48, %v1397_v63  ;;  %v1636_v5 = vadd.f32 %v1608_v36, %v1547_v56  ;;  %v2077_v7 = vadd.f32 %v2049_v9, %v1989_v23  ;;  %v2932_v47 = vmul.f32 %v7194_v41, %v722_v6 }
 0x188   : > { %v1075_v44 = vmul.f32 %v7195_v27, %v1043_v4  ;;  %v2517_v53 = vadd.f32 %v2489_v55, %v2428_v10  ;;  %v678_v60 = vsel %vm639_vm1, %v676_v50, %v677_v21  ;;  %v3021_v39 = vmul.f32 %v5877_v19, %v7196_v34  ;;  %v7197_v4 = vld [vmem:[#allocation10_spill] sm:$0xff]  ;;  %v5985_v50 = vld [vmem:[#allocation2 + $0x330] sm:$0xff]  ;;  %v1486_v34 = vld [vmem:[#allocation2 + $0xd8] sm:$0x3f] }
 0x189   : > { %v2960_v16 = vadd.f32 %v2932_v47, %v2871_v52  ;;  %750 = vst [vmem:[#allocation2 + $0x208] sm:$0x3f] %v678_v60  ;;  %v1725_v45 = vadd.f32 %v1697_v59, %v1636_v5  ;;  %v2165_v46 = vadd.f32 %v2137_v42, %v2077_v7  ;;  %v819_v63 = vrot.slane %v5877_v19, 1  ;;  %v7198_v52 = vld [vmem:[#allocation123_spill] sm:$0xff]  ;;  %v7199_v7 = vld [vmem:[#allocation102_spill] sm:$0xff] }
 0x18a   : > { %v2606_v37 = vadd.f32 %v2578_v54, %v2517_v53  ;;  %v820_v23 = vrot.slane %v7177_v24, 1  ;;  %v934_v56 = vrot.slane %v5877_v19, 2  ;;  %v935_v6 = vrot.slane %v7177_v24, 2  ;;  %v2630_v19 = vld [vmem:[#allocation2 + $0x418] sm:$0x3f] }
 0x18b   : > { %v1164_v10 = vmul.f32 %v7197_v4, %v1132_v3  ;;  %v3049_v36 = vadd.f32 %v3021_v39, %v2960_v16  ;;  %v565_v21 = vrot.slane %v5985_v50, 6  ;;  %v566_v9 = vrot.slane %v7198_v52, 6  ;;  %v2365_v5 = vld [vmem:[#allocation2 + $0xc8] sm:$0x3f]  ;;  %v1221_v53 = vld [vmem:[#allocation2 + $0x318] sm:$0x3f] }
 0x18c   : > { %v821_v59 = vsel %vm782_vm2, %v819_v63, %v820_v23  ;;  %v866_v42 = vsel %vm853_vm3, %v820_v23, 0.0  ;;  %v936_v55 = vsel %vm897_vm5, %v934_v56, %v935_v6  ;;  %v981_v54 = vsel %vm968_vm4, %v935_v6, 0.0  ;;  %v2014_v3 = vld [vmem:[#allocation2 + $0x1e8] sm:$0x3f] }
 0x18d   : > { %v1786_v24 = vmul.f32 %v7191_v2, %v821_v59  ;;  %v2225_v16 = vmul.f32 %v7146_v17, %v821_v59  ;;  %v2667_v47 = vmul.f32 %v7199_v7, %v821_v59  ;;  %v3110_v27 = vmul.f32 %v7178_v43, %v821_v59  ;;  %894 = vst [vmem:[#allocation2 + $0x448] sm:$0x3f] %v866_v42 }
 0x18e   : > { %1009 = vst [vmem:[#allocation2 + $0x568] sm:$0x3f] %v981_v54  ;;  %v1875_v60 = vmul.f32 %v7165_v13, %v936_v55  ;;  %v2313_v39 = vmul.f32 %v4810_v58, %v936_v55  ;;  %v2756_v63 = vmul.f32 %v7179_v61, %v936_v55  ;;  %v3199_v23 = vmul.f32 %v5777_v15, %v936_v55  ;;  %v1840_v54 = vld [vmem:[#allocation2 + $0x548] sm:$0x3f] }
 0x18f   : > { %v1814_v56 = vadd.f32 %v1786_v24, %v1725_v45  ;;  %v2253_v6 = vadd.f32 %v2225_v16, %v2165_v46  ;;  %v2695_v4 = vadd.f32 %v2667_v47, %v2606_v37  ;;  %v3138_v12 = vadd.f32 %v3110_v27, %v3049_v36  ;;  %v3160_v37 = vld [vmem:[#allocation2 + $0x528] sm:$0x3f]  ;;  %v2895_v36 = vld [vmem:[#allocation2 + $0x1d8] sm:$0x3f] }
 0x190   : > { %v2662_v31 = vmul.f32 %v7199_v7, %v2630_v19  ;;  %v2336_v59 = vadd.f32 %v2308_v28, %v5946_v1  ;;  %v2397_v42 = vmul.f32 %v7113_v49, %v2365_v5  ;;  %v567_v2 = vsel %vm525_vm0, %v565_v21, %v566_v9  ;;  %v2102_v55 = vld [vmem:[#allocation2 + $0x308] sm:$0x3f]  ;;  %v2719_v16 = vld [vmem:[#allocation2 + $0x538] sm:$0x3f] }
 0x191   : > { %v1986_v58 = vadd.f32 %v5952_v32, %v5948_v40  ;;  %v2046_v43 = vmul.f32 %v7171_v38, %v2014_v3  ;;  %v1253_v45 = vmul.f32 %v7126_v0, %v1221_v53  ;;  %v1903_v46 = vadd.f32 %v1875_v60, %v1814_v56  ;;  %638 = vst [vmem:[#allocation2 + $0xf8] sm:$0x3f] %v567_v2  ;;  %v2543_v24 = vld [vmem:[#allocation2 + $0x308] sm:$0x3f]  ;;  %v1310_v0 = vld [vmem:[#allocation2 + $0x438] sm:$0x3f] }
 0x192   : > { %v1192_v19 = vadd.f32 %v1164_v10, %v1075_v44  ;;  %v2341_v1 = vadd.f32 %v2313_v39, %v2253_v6  ;;  %v2784_v28 = vadd.f32 %v2756_v63, %v2695_v4  ;;  %v6009_v5 = vadd.f32 %v3199_v23, %v3138_v12  ;;  %v7200_v47 = vld [vmem:[#allocation17_spill] sm:$0xff] }
 0x193   : > { %v1811_v9 = vadd.f32 %v5967_v33, %v5954_v8  ;;  %v1457_v40 = vadd.f32 %v5973_v26, %v5964_v22  ;;  %v1872_v32 = vmul.f32 %v7165_v13, %v1840_v54  ;;  %v609_v2 = vsel %vm525_vm0, 0.0, %v565_v21  ;;  %v1928_v44 = vld [vmem:[#allocation2 + $0xd8] sm:$0x3f]  ;;  %v2454_v26 = vld [vmem:[#allocation2 + $0x1e8] sm:$0x3f] }
 0x194   : > { %v1518_v27 = vmul.f32 %v7200_v47, %v1486_v34  ;;  %v1963_v10 = vmul.f32 %v7112_v25, %v609_v2  ;;  %v2402_v12 = vmul.f32 %v7113_v49, %v609_v2  ;;  %v2845_v3 = vmul.f32 %v7167_v62, %v609_v2  ;;  %v1575_v21 = vld [vmem:[#allocation2 + $0x1f8] sm:$0x3f]  ;;  %v1488_v2 = vld [vmem:[#allocation2 + $0xe8] sm:$0x3f] }
 0x195   : > { %v6022_v8 = vmul.f32 %v5777_v15, %v3160_v37  ;;  %v6026_v22 = vadd.f32 %v5940_v29, %v5937_v57  ;;  %v6029_v33 = vmul.f32 %v7194_v41, %v2895_v36  ;;  %v2134_v34 = vmul.f32 %v7190_v35, %v2102_v55  ;;  %v2190_v29 = vld [vmem:[#allocation2 + $0x428] sm:$0x3f]  ;;  %v1399_v4 = vld [vmem:[#allocation2 + $0x558] sm:$0x3f] }
 0x196   : > { %v2074_v53 = vadd.f32 %v2046_v43, %v1986_v58  ;;  %v6033_v60 = vmul.f32 %v4956_v30, %v2543_v24  ;;  %v1281_v39 = vadd.f32 %v1253_v45, %v1192_v19  ;;  %v1342_v63 = vmul.f32 %v7141_v14, %v1310_v0  ;;  %v2016_v45 = vld [vmem:[#allocation2 + $0x1f8] sm:$0x3f] }
 0x197   : > { %v6037_v23 = vadd.f32 %v2662_v31, %v5944_v11  ;;  %v6040_v57 = vmul.f32 %v7179_v61, %v2719_v16  ;;  %v1900_v56 = vadd.f32 %v1872_v32, %v1811_v9  ;;  %v1960_v6 = vmul.f32 %v7112_v25, %v1928_v44  ;;  %v1664_v24 = vld [vmem:[#allocation2 + $0x318] sm:$0x3f] }
 0x198   : > { %v2425_v54 = vadd.f32 %v2397_v42, %v2336_v59  ;;  %v2486_v58 = vmul.f32 %v7192_v51, %v2454_v26  ;;  %v1546_v43 = vadd.f32 %v1518_v27, %v1457_v40  ;;  %v1607_v37 = vmul.f32 %v7082_v18, %v1575_v21 }
 0x199   : > { %v1991_v36 = vadd.f32 %v1963_v10, %v1903_v46  ;;  %v2430_v14 = vadd.f32 %v2402_v12, %v2341_v1  ;;  %v2873_v55 = vadd.f32 %v2845_v3, %v2784_v28  ;;  %v679_v31 = vrot.slane %v5985_v50, 7 }
 0x19a   : > { %v2162_v11 = vadd.f32 %v2134_v34, %v2074_v53  ;;  %v2222_v19 = vmul.f32 %v7146_v17, %v2190_v29  ;;  %v1370_v9 = vadd.f32 %v1342_v63, %v1281_v39  ;;  %v1431_v32 = vmul.f32 %v7193_v48, %v1399_v4  ;;  %v7201_v34 = vld [vmem:[#allocation7_spill] sm:$0xff] }
 0x19b   : > { %v1988_v0 = vadd.f32 %v1960_v6, %v1900_v56  ;;  %v2048_v59 = vmul.f32 %v7171_v38, %v2016_v45  ;;  %v723_v42 = vsel %vm639_vm1, 0.0, %v679_v31  ;;  %v680_v40 = vrot.slane %v7198_v52, 7 }
 0x19c   : > { %v2051_v46 = vmul.f32 %v7171_v38, %v723_v42  ;;  %v2491_v1 = vmul.f32 %v7192_v51, %v723_v42  ;;  %v2139_v28 = vmul.f32 %v5985_v50, %v7190_v35  ;;  %v2580_v16 = vmul.f32 %v5985_v50, %v4956_v30 }
 0x19d   : > { %v1635_v27 = vadd.f32 %v1607_v37, %v1546_v43  ;;  %v1696_v48 = vmul.f32 %v7127_v20, %v1664_v24  ;;  %v2934_v44 = vmul.f32 %v7194_v41, %v723_v42  ;;  %v681_v10 = vsel %vm639_vm1, %v679_v31, %v680_v40  ;;  %v7203_v31 = vld [vmem:[#allocation52_spill] sm:$0xff]  ;;  %v2278_v40 = vld [vmem:[#allocation2 + $0x548] sm:$0x3f] }
 0x19e   : > { %v1459_v12 = vadd.f32 %v1431_v32, %v1370_v9  ;;  %v2079_v3 = vadd.f32 %v2051_v46, %v1991_v36  ;;  %v2519_v26 = vadd.f32 %v2491_v1, %v2430_v14  ;;  %752 = vst [vmem:[#allocation2 + $0x218] sm:$0x3f] %v681_v10  ;;  %v3023_v21 = vmul.f32 %v5985_v50, %v7201_v34  ;;  %v7202_v14 = vld [vmem:[#allocation36_spill] sm:$0xff] }
 0x19f   : > { %v1520_v53 = vmul.f32 %v7200_v47, %v1488_v2  ;;  %v2962_v39 = vadd.f32 %v2934_v44, %v2873_v55  ;;  %v822_v63 = vrot.slane %v5985_v50, 1  ;;  %v823_v29 = vrot.slane %v7198_v52, 1  ;;  %v7204_v9 = vld [vmem:[#allocation16_spill] sm:$0xff] }
 0x1a0   : > { %v2167_v56 = vadd.f32 %v2139_v28, %v2079_v3  ;;  %v2608_v6 = vadd.f32 %v2580_v16, %v2519_v26  ;;  %v937_v4 = vrot.slane %v5985_v50, 2  ;;  %v938_v43 = vrot.slane %v7198_v52, 2  ;;  %v2257_v50 = vld [vmem:[#allocation2 + $0x4a0] sm:$0xff]  ;;  %v7205_v52 = vld [vmem:[#allocation15_spill] sm:$0xff]  ;;  %v2104_v16 = vld [vmem:[#allocation2 + $0x318] sm:$0x3f] }
 0x1a1   : > { %v3051_v37 = vadd.f32 %v3023_v21, %v2962_v39  ;;  %v824_v45 = vsel %vm782_vm2, %v822_v63, %v823_v29  ;;  %v867_v36 = vsel %vm853_vm3, %v823_v29, 0.0  ;;  %v2053_v24 = vadd.f32 %v7203_v31, %v7202_v14  ;;  %v7206_v26 = vld [vmem:[#allocation31_spill] sm:$0xff]  ;;  %v1753_v29 = vld [vmem:[#allocation2 + $0x438] sm:$0x3f] }
 0x1a2   : > { %v2227_v47 = vmul.f32 %v7146_v17, %v824_v45  ;;  %v2669_v55 = vmul.f32 %v7199_v7, %v824_v45  ;;  %v3112_v32 = vmul.f32 %v7204_v9, %v824_v45  ;;  %896 = vst [vmem:[#allocation2 + $0x458] sm:$0x3f] %v867_v36  ;;  %v939_v42 = vsel %vm897_vm5, %v937_v4, %v938_v43  ;;  %v1577_v4 = vld [vmem:[#allocation2 + $0x208] sm:$0x3f]  ;;  %v3792_v45 = vld [vmem:[#allocation2 + $0x380] sm:$0xff] }
 0x1a3   : > { %v2315_v2 = vmul.f32 %v7205_v52, %v939_v42  ;;  %v2758_v46 = vmul.f32 %v7179_v61, %v939_v42  ;;  %v3201_v1 = vmul.f32 %v5777_v15, %v939_v42  ;;  %v982_v28 = vsel %vm968_vm4, %v938_v43, 0.0 }
 0x1a4   : > { %v2255_v44 = vadd.f32 %v2227_v47, %v2167_v56  ;;  %v2697_v10 = vadd.f32 %v2669_v55, %v2608_v6  ;;  %v3140_v3 = vadd.f32 %v3112_v32, %v3051_v37  ;;  %1011 = vst [vmem:[#allocation2 + $0x578] sm:$0x3f] %v982_v28  ;;  %v2141_v21 = vadd.f32 %v7206_v26, %v2053_v24  ;;  %v2367_v56 = vld [vmem:[#allocation2 + $0xd8] sm:$0x3f] }
 0x1a5   : > { %v2514_v39 = vadd.f32 %v2486_v58, %v2425_v54  ;;  %v2250_v63 = vadd.f32 %v2222_v19, %v2162_v11  ;;  %v2201_v36 = vmul.f32 %v3792_v45, %v7146_v17  ;;  %v2289_v14 = vmul.f32 %v7205_v52, %v2257_v50  ;;  %v2346_v58 = vld [vmem:[#allocation2 + $0x30] sm:$0xff]  ;;  %v7207_v11 = vld [vmem:[#allocation21_spill] sm:$0xff] }
 0x1a6   : > { %v2310_v15 = vmul.f32 %v7205_v52, %v2278_v40  ;;  %v2076_v31 = vadd.f32 %v2048_v59, %v1988_v0  ;;  %v1724_v43 = vadd.f32 %v1696_v48, %v1635_v27  ;;  %v2343_v42 = vadd.f32 %v2315_v2, %v2255_v44  ;;  %v2192_v24 = vld [vmem:[#allocation2 + $0x438] sm:$0x3f]  ;;  %v1666_v40 = vld [vmem:[#allocation2 + $0x328] sm:$0x3f]  ;;  %v7209_v0 = vld [vmem:[#allocation82_spill] sm:$0xff] }
 0x1a7   : > { %v2136_v6 = vmul.f32 %v7190_v35, %v2104_v16  ;;  %v2786_v37 = vadd.f32 %v2758_v46, %v2697_v10  ;;  %v6084_v47 = vadd.f32 %v3201_v1, %v3140_v3  ;;  %v2229_v54 = vadd.f32 %v2201_v36, %v2141_v21  ;;  %v7208_v50 = vld [vmem:[#allocation73_spill] sm:$0xff]  ;;  %v7210_v48 = vld [vmem:[#allocation79_spill] sm:$0xff]  ;;  %v2435_v46 = vld [vmem:[#allocation2 + $0x150] sm:$0xff] }
 0x1a8   : > { %v1785_v19 = vmul.f32 %v7207_v11, %v1753_v29  ;;  %v1548_v55 = vadd.f32 %v1520_v53, %v1459_v12  ;;  %v1609_v32 = vmul.f32 %v7082_v18, %v1577_v4  ;;  %v2432_v28 = vadd.f32 %v7208_v50, %v2343_v42  ;;  %v7211_v2 = vld [vmem:[#allocation77_spill] sm:$0xff]  ;;  %v7212_v1 = vld [vmem:[#allocation103_spill] sm:$0xff]  ;;  %v7213_v44 = vld [vmem:[#allocation58_spill] sm:$0xff] }
 0x1a9   : > { %v2875_v59 = vadd.f32 %v7209_v0, %v2786_v37  ;;  %v2317_v27 = vadd.f32 %v2289_v14, %v2229_v54  ;;  %v2407_v16 = vadd.f32 %v7211_v2, %v7210_v48  ;;  %v2497_v10 = vadd.f32 %v7213_v44, %v7212_v1  ;;  %v1842_v29 = vld [vmem:[#allocation2 + $0x558] sm:$0x3f]  ;;  %v7214_v4 = vld [vmem:[#allocation86_spill] sm:$0xff]  ;;  %v2524_v42 = vld [vmem:[#allocation2 + $0x270] sm:$0xff] }
 0x1aa   : > { %v6096_v3 = vadd.f32 %v6040_v57, %v6037_v23  ;;  %v2338_v12 = vadd.f32 %v2310_v15, %v2250_v63  ;;  %v2399_v18 = vmul.f32 %v7113_v49, %v2367_v56  ;;  %v2378_v53 = vmul.f32 %v7113_v49, %v2346_v58  ;;  %v7215_v36 = vld [vmem:[#allocation89_spill] sm:$0xff]  ;;  %v1755_v15 = vld [vmem:[#allocation2 + $0x448] sm:$0x3f]  ;;  %v7216_v56 = vld [vmem:[#allocation126_spill] sm:$0xff] }
 0x1ab   : > { %v2164_v26 = vadd.f32 %v2136_v6, %v2076_v31  ;;  %v2224_v21 = vmul.f32 %v7146_v17, %v2192_v24  ;;  %v2521_v45 = vadd.f32 %v7214_v4, %v2432_v28  ;;  %v2964_v14 = vadd.f32 %v7215_v36, %v2875_v59  ;;  %v7217_v6 = vld [vmem:[#allocation117_spill] sm:$0xff]  ;;  %v7218_v24 = vld [vmem:[#allocation122_spill] sm:$0xff]  ;;  %v1930_v44 = vld [vmem:[#allocation2 + $0xe8] sm:$0x3f] }
 0x1ac   : > { %v6104_v37 = vadd.f32 %v6033_v60, %v2514_v39  ;;  %v1637_v54 = vadd.f32 %v1609_v32, %v1548_v55  ;;  %v1698_v23 = vmul.f32 %v7127_v20, %v1666_v40  ;;  %v2467_v57 = vmul.f32 %v7192_v51, %v2435_v46  ;;  %v2280_v59 = vld [vmem:[#allocation2 + $0x558] sm:$0x3f]  ;;  %v7222_v40 = vld [vmem:[#allocation23_spill] sm:$0xff] }
 0x1ad   : > { %v1813_v63 = vadd.f32 %v1785_v19, %v1724_v43  ;;  %v2610_v31 = vadd.f32 %v7216_v56, %v2521_v45  ;;  %v3053_v58 = vadd.f32 %v7217_v6, %v2964_v14  ;;  %v2496_v50 = vadd.f32 %v7218_v24, %v2407_v16  ;;  %v7219_v2 = vld [vmem:[#allocation97_spill] sm:$0xff]  ;;  %v7223_v45 = vld [vmem:[#allocation106_spill] sm:$0xff]  ;;  %v1844_v24 = vld [vmem:[#allocation2 + $0x568] sm:$0x3f] }
 0x1ae   : > { %v1874_v28 = vmul.f32 %v7165_v13, %v1842_v29  ;;  %v2406_v48 = vadd.f32 %v2378_v53, %v2317_v27  ;;  %v7220_v60 = vld [vmem:[#allocation125_spill] sm:$0xff]  ;;  %v2556_v55 = vmul.f32 %v4956_v30, %v2524_v42  ;;  %v6115_v20 = vadd.f32 %v2399_v18, %v2338_v12  ;;  %v2613_v53 = vld [vmem:[#allocation2 + $0x390] sm:$0xff] }
 0x1af   : > { %v2498_v39 = vadd.f32 %v7220_v60, %v7219_v2  ;;  %v2252_v32 = vadd.f32 %v2224_v21, %v2164_v26  ;;  %v7221_v43 = vld [vmem:[#allocation121_spill] sm:$0xff]  ;;  %v3142_v46 = vadd.f32 %v7222_v40, %v3053_v58  ;;  %v1726_v4 = vadd.f32 %v1698_v23, %v1637_v54  ;;  %v7225_v18 = vld [vmem:[#allocation100_spill] sm:$0xff]  ;;  %v7227_v54 = vld [vmem:[#allocation35_spill] sm:$0xff] }
 0x1b0   : > { %v2699_v19 = vadd.f32 %v7221_v43, %v2610_v31  ;;  %v2614_v1 = vld [vmem:[#allocation2 + $0x398] sm:$0x3f]  ;;  %v1787_v16 = vmul.f32 %v7207_v11, %v1755_v15  ;;  %v2495_v29 = vadd.f32 %v2467_v57, %v2406_v48  ;;  %v2586_v27 = vadd.f32 %v7223_v45, %v2497_v10  ;;  %v7226_v21 = vld [vmem:[#allocation8_spill] sm:$0xff]  ;;  %v7229_v57 = vld [vmem:[#allocation107_spill] sm:$0xff] }
 0x1b1   : > { %v2456_v14 = vld [vmem:[#allocation2 + $0x1f8] sm:$0x3f]  ;;  %v2312_v56 = vmul.f32 %v7205_v52, %v2280_v59  ;;  %v6124_v26 = vadd.f32 %v7225_v18, %v3142_v46  ;;  %v2585_v31 = vadd.f32 %v7226_v21, %v2496_v50  ;;  %v1902_v58 = vadd.f32 %v1874_v28, %v1813_v63  ;;  %v7228_v11 = vld [vmem:[#allocation60_spill] sm:$0xff] }
 0x1b2   : > { %v7224_v42 = vld [vmem:[#allocation81_spill] sm:$0xff]  ;;  %v2584_v2 = vadd.f32 %v2556_v55, %v2495_v29  ;;  %v2587_v23 = vadd.f32 %v7227_v54, %v2498_v39  ;;  %v2588_v15 = vadd.f32 %v7229_v57, %v7228_v11  ;;  %v1962_v10 = vmul.f32 %v7112_v25, %v1930_v44  ;;  %v2702_v43 = vld [vmem:[#allocation2 + $0x4b0] sm:$0xff]  ;;  %v2018_v29 = vld [vmem:[#allocation2 + $0x208] sm:$0x3f] }
 0x1b3   : > { %v2788_v12 = vadd.f32 %v7224_v42, %v2699_v19  ;;  %v2645_v59 = vmul.f32 %v7199_v7, %v2613_v53  ;;  %v2646_v60 = vmul.f32 %v7199_v7, %v2614_v1  ;;  %v2703_v19 = vld [vmem:[#allocation2 + $0x4b8] sm:$0x3f]  ;;  %v6135_v50 = vmul.f32 %v7192_v51, %v2456_v14  ;;  %v7231_v39 = vld [vmem:[#allocation108_spill] sm:$0xff]  ;;  %v3793_v54 = vld [vmem:[#allocation2 + $0x4c0] sm:$0xff] }
 0x1b4   : > { %v1815_v63 = vadd.f32 %v1787_v16, %v1726_v4  ;;  %v7230_v28 = vld [vmem:[#allocation105_spill] sm:$0xff]  ;;  %v2677_v46 = vadd.f32 %v7231_v39, %v2588_v15  ;;  %v1876_v45 = vmul.f32 %v7165_v13, %v1844_v24  ;;  %v2734_v21 = vmul.f32 %v7179_v61, %v2702_v43  ;;  %v2791_v16 = vld [vmem:[#allocation2 + $0x40] sm:$0xff]  ;;  %v2369_v57 = vld [vmem:[#allocation2 + $0xe8] sm:$0x3f] }
 0x1b5   : > { %v2877_v48 = vadd.f32 %v7209_v0, %v2788_v12  ;;  %v2675_v55 = vadd.f32 %v7230_v28, %v2586_v27  ;;  %v2673_v0 = vadd.f32 %v2645_v59, %v2584_v2  ;;  %v2674_v42 = vadd.f32 %v2646_v60, %v2585_v31  ;;  %v1932_v53 = vld [vmem:[#allocation2 + $0xf8] sm:$0x3f]  ;;  %v7232_v12 = vld [vmem:[#allocation128_spill] sm:$0xff]  ;;  %v7233_v24 = vld [vmem:[#allocation34_spill] sm:$0xff] }
 0x1b6   : > { %v2676_v1 = vadd.f32 %v7232_v12, %v2587_v23  ;;  %v2735_v14 = vmul.f32 %v7179_v61, %v2703_v19  ;;  %v2736_v4 = vmul.f32 %v3793_v54, %v7179_v61  ;;  %v6145_v27 = vadd.f32 %v2312_v56, %v2252_v32  ;;  %v2792_v2 = vld [vmem:[#allocation2 + $0x48] sm:$0x3f]  ;;  %v2793_v31 = vld [vmem:[#allocation2 + $0x50] sm:$0xff]  ;;  %v2794_v43 = vld [vmem:[#allocation2 + $0x58] sm:$0x3f] }
 0x1b7   : > { %v2966_v44 = vadd.f32 %v7215_v36, %v2877_v48  ;;  %v1990_v11 = vadd.f32 %v1962_v10, %v1902_v58  ;;  %v2766_v36 = vadd.f32 %v7233_v24, %v2677_v46  ;;  %v2050_v23 = vmul.f32 %v7171_v38, %v2018_v29  ;;  %v2106_v15 = vld [vmem:[#allocation2 + $0x328] sm:$0x3f]  ;;  %v7235_v46 = vld [vmem:[#allocation41_spill] sm:$0xff] }
 0x1b8   : > { %v2762_v48 = vadd.f32 %v2734_v21, %v2673_v0  ;;  %v2763_v59 = vadd.f32 %v2735_v14, %v2674_v42  ;;  %v2764_v60 = vadd.f32 %v2736_v4, %v2675_v55  ;;  %v1904_v19 = vadd.f32 %v1876_v45, %v1815_v63  ;;  %v2882_v0 = vld [vmem:[#allocation2 + $0x170] sm:$0xff]  ;;  %v2881_v42 = vld [vmem:[#allocation2 + $0x168] sm:$0x3f]  ;;  %v2108_v54 = vld [vmem:[#allocation2 + $0x338] sm:$0x3f] }
 0x1b9   : > { %v3055_v13 = vadd.f32 %v7217_v6, %v2966_v44  ;;  %v1964_v28 = vmul.f32 %v7112_v25, %v1932_v53  ;;  %v2823_v56 = vmul.f32 %v7167_v62, %v2791_v16  ;;  %v7234_v6 = vld [vmem:[#allocation98_spill] sm:$0xff]  ;;  %v2824_v10 = vmul.f32 %v7167_v62, %v2792_v2  ;;  %v2020_v25 = vld [vmem:[#allocation2 + $0x218] sm:$0x3f] }
 0x1ba   : > { %v2765_v58 = vadd.f32 %v7234_v6, %v2676_v1  ;;  %v2825_v39 = vmul.f32 %v7167_v62, %v2793_v31  ;;  %v2855_v29 = vadd.f32 %v7235_v46, %v2766_v36  ;;  %v2880_v44 = vld [vmem:[#allocation2 + $0x160] sm:$0xff]  ;;  %v6158_v55 = vmul.f32 %v7113_v49, %v2369_v57  ;;  %v2883_v24 = vld [vmem:[#allocation2 + $0x178] sm:$0x3f]  ;;  %v2970_v6 = vld [vmem:[#allocation2 + $0x288] sm:$0x3f] }
 0x1bb   : > { %v3144_v32 = vadd.f32 %v7222_v40, %v3055_v13  ;;  %v2138_v63 = vmul.f32 %v7190_v35, %v2106_v15  ;;  %v2851_v45 = vadd.f32 %v2823_v56, %v2762_v48  ;;  %v2078_v53 = vadd.f32 %v2050_v23, %v1990_v11  ;;  %v7236_v4 = vld [vmem:[#allocation118_spill] sm:$0xff]  ;;  %v2971_v48 = vld [vmem:[#allocation2 + $0x290] sm:$0xff] }
 0x1bc   : > { %v2826_v12 = vmul.f32 %v7167_v62, %v2794_v43  ;;  %v2852_v1 = vadd.f32 %v2824_v10, %v2763_v59  ;;  %v2853_v21 = vadd.f32 %v2825_v39, %v2764_v60  ;;  %v1992_v14 = vadd.f32 %v1964_v28, %v1904_v19  ;;  %v7237_v16 = vld [vmem:[#allocation46_spill] sm:$0xff]  ;;  %v7238_v59 = vld [vmem:[#allocation124_spill] sm:$0xff]  ;;  %v7239_v60 = vld [vmem:[#allocation99_spill] sm:$0xff] }
 0x1bd   : > { %v6162_v40 = vadd.f32 %v7225_v18, %v3144_v32  ;;  %v2857_v13 = vadd.f32 %v7237_v16, %v7236_v4  ;;  %v2912_v36 = vmul.f32 %v7194_v41, %v2880_v44  ;;  %v2914_v2 = vmul.f32 %v7194_v41, %v2882_v0  ;;  %v3794_v11 = vld [vmem:[#allocation2 + $0x180] sm:$0xff]  ;;  %v7240_v32 = vld [vmem:[#allocation67_spill] sm:$0xff]  ;;  %v2972_v4 = vld [vmem:[#allocation2 + $0x298] sm:$0x3f] }
 0x1be   : > { %v2052_v18 = vmul.f32 %v7171_v38, %v2020_v25  ;;  %v2854_v31 = vadd.f32 %v2826_v12, %v2765_v58  ;;  %v2913_v57 = vmul.f32 %v7194_v41, %v2881_v42  ;;  %v2916_v23 = vmul.f32 %v3794_v11, %v7194_v41  ;;  %v2969_v15 = vld [vmem:[#allocation2 + $0x280] sm:$0xff]  ;;  %v2194_v0 = vld [vmem:[#allocation2 + $0x448] sm:$0x3f] }
 0x1bf   : > { %v2856_v43 = vadd.f32 %v7239_v60, %v7238_v59  ;;  %v2940_v19 = vadd.f32 %v2912_v36, %v2851_v45  ;;  %v2942_v28 = vadd.f32 %v2914_v2, %v2853_v21  ;;  %v2946_v56 = vadd.f32 %v7240_v32, %v2857_v13  ;;  %v2973_v10 = vld [vmem:[#allocation2 + $0x2a0] sm:$0xff]  ;;  %v7241_v25 = vld [vmem:[#allocation47_spill] sm:$0xff]  ;;  %v3060_v59 = vld [vmem:[#allocation2 + $0x3b0] sm:$0xff] }
 0x1c0   : > { %v2140_v39 = vmul.f32 %v7190_v35, %v2108_v54  ;;  %v2915_v38 = vmul.f32 %v7194_v41, %v2883_v24  ;;  %v2941_v58 = vadd.f32 %v2913_v57, %v2852_v1  ;;  %v2944_v46 = vadd.f32 %v2916_v23, %v2855_v29  ;;  %v7242_v42 = vld [vmem:[#allocation71_spill] sm:$0xff]  ;;  %v3058_v29 = vld [vmem:[#allocation2 + $0x3a0] sm:$0xff]  ;;  %v7244_v57 = vld [vmem:[#allocation120_spill] sm:$0xff] }
 0x1c1   : > { %v6177_v44 = vadd.f32 %v2138_v63, %v2078_v53  ;;  %v2948_v12 = vadd.f32 %v7242_v42, %v7241_v25  ;;  %v3001_v45 = vmul.f32 %v7201_v34, %v2969_v15  ;;  %v3003_v21 = vmul.f32 %v7201_v34, %v2971_v48  ;;  %v2974_v16 = vld [vmem:[#allocation2 + $0x2a8] sm:$0x3f]  ;;  %v7243_v63 = vld [vmem:[#allocation140_spill] sm:$0xff]  ;;  %v3062_v15 = vld [vmem:[#allocation2 + $0x3c0] sm:$0xff] }
 0x1c2   : > { %v2282_v13 = vld [vmem:[#allocation2 + $0x568] sm:$0x3f]  ;;  %v2080_v36 = vadd.f32 %v2052_v18, %v1992_v14  ;;  %v2943_v2 = vadd.f32 %v2915_v38, %v2854_v31  ;;  %v3002_v35 = vmul.f32 %v7201_v34, %v2970_v6  ;;  %v3005_v1 = vmul.f32 %v7201_v34, %v2973_v10  ;;  %v7245_v6 = vld [vmem:[#allocation42_spill] sm:$0xff]  ;;  %v3795_v42 = vld [vmem:[#allocation2 + $0x3d0] sm:$0xff] }
 0x1c3   : > { %v2945_v53 = vadd.f32 %v7243_v63, %v2856_v43  ;;  %v3029_v54 = vadd.f32 %v3001_v45, %v2940_v19  ;;  %v3031_v24 = vadd.f32 %v3003_v21, %v2942_v28  ;;  %v3035_v11 = vadd.f32 %v7244_v57, %v2946_v56  ;;  %v3059_v23 = vld [vmem:[#allocation2 + $0x3a8] sm:$0x3f]  ;;  %v3061_v19 = vld [vmem:[#allocation2 + $0x3b8] sm:$0x3f]  ;;  %v3147_v21 = vld [vmem:[#allocation2 + $0x4c0] sm:$0xff] }
 0x1c4   : > { %v2226_v48 = vmul.f32 %v7146_v17, %v2194_v0  ;;  %v3004_v60 = vmul.f32 %v7201_v34, %v2972_v4  ;;  %v3030_v14 = vadd.f32 %v3002_v35, %v2941_v58  ;;  %v3033_v18 = vadd.f32 %v3005_v1, %v2944_v46  ;;  %v3063_v10 = vld [vmem:[#allocation2 + $0x3c8] sm:$0x3f]  ;;  %v3151_v63 = vld [vmem:[#allocation2 + $0x4e0] sm:$0xff]  ;;  %v3153_v57 = vld [vmem:[#allocation2 + $0x4f0] sm:$0xff] }
 0x1c5   : > { %v6190_v31 = vmul.f32 %v7205_v52, %v2282_v13  ;;  %v3006_v32 = vmul.f32 %v7201_v34, %v2974_v16  ;;  %v3037_v43 = vadd.f32 %v7245_v6, %v2948_v12  ;;  %v3090_v28 = vmul.f32 %v7204_v9, %v3058_v29  ;;  %v3148_v12 = vld [vmem:[#allocation2 + $0x4c8] sm:$0x3f]  ;;  %v3149_v16 = vld [vmem:[#allocation2 + $0x4d0] sm:$0xff]  ;;  %v2196_v13 = vld [vmem:[#allocation2 + $0x458] sm:$0x3f] }
 0x1c6   : > { %v3032_v56 = vadd.f32 %v3004_v60, %v2943_v2  ;;  %v3091_v38 = vmul.f32 %v7204_v9, %v3059_v23  ;;  %v3092_v0 = vmul.f32 %v7204_v9, %v3060_v59  ;;  %v3094_v25 = vmul.f32 %v7204_v9, %v3062_v15  ;;  %v7246_v23 = vld [vmem:[#allocation110_spill] sm:$0xff]  ;;  %v7247_v59 = vld [vmem:[#allocation144_spill] sm:$0xff]  ;;  %v7248_v15 = vld [vmem:[#allocation137_spill] sm:$0xff] }
 0x1c7   : > { %v2168_v58 = vadd.f32 %v2140_v39, %v2080_v36  ;;  %v3034_v46 = vadd.f32 %v3006_v32, %v2945_v53  ;;  %v3096_v4 = vmul.f32 %v3795_v42, %v7204_v9  ;;  %v3118_v45 = vadd.f32 %v3090_v28, %v3029_v54  ;;  %v3150_v60 = vld [vmem:[#allocation2 + $0x4d8] sm:$0x3f] }
 0x1c8   : > { %v3093_v2 = vmul.f32 %v7204_v9, %v3061_v19  ;;  %v3119_v35 = vadd.f32 %v3091_v38, %v3030_v14  ;;  %v3120_v1 = vadd.f32 %v3092_v0, %v3031_v24  ;;  %v3122_v29 = vadd.f32 %v3094_v25, %v3033_v18  ;;  %v6205_v6 = vld [vmem:[%s3966_s17 + $0x18] ss:$0 sm:$0xff]  ;;  %v3152_v38 = vld [vmem:[#allocation2 + $0x4e8] sm:$0x3f] }
 0x1c9   : > { %v2947_v39 = vadd.f32 %v7247_v59, %v7246_v23  ;;  %v3095_v36 = vmul.f32 %v7204_v9, %v3063_v10  ;;  %v3124_v53 = vadd.f32 %v3096_v4, %v3035_v11  ;;  %v3126_v54 = vadd.f32 %v7248_v15, %v3037_v43  ;;  %v2632_v10 = vld [vmem:[#allocation2 + $0x428] sm:$0x3f]  ;;  %v2545_v43 = vld [vmem:[#allocation2 + $0x318] sm:$0x3f] }
 0x1ca   : > { %v3121_v32 = vadd.f32 %v3093_v2, %v3032_v56  ;;  %v3179_v28 = vmul.f32 %v6205_v6, %v3147_v21  ;;  %v3180_v14 = vmul.f32 %v6205_v6, %v3148_v12  ;;  %v3181_v24 = vmul.f32 %v6205_v6, %v3149_v16  ;;  %v2808_v21 = vld [vmem:[#allocation2 + $0xc8] sm:$0x3f]  ;;  %v2371_v59 = vld [vmem:[#allocation2 + $0xf8] sm:$0x3f] }
 0x1cb   : > { %v2228_v18 = vmul.f32 %v7146_v17, %v2196_v13  ;;  %v3123_v19 = vadd.f32 %v3095_v36, %v3034_v46  ;;  %v3183_v0 = vmul.f32 %v6205_v6, %v3151_v63  ;;  %v3185_v11 = vmul.f32 %v6205_v6, %v3153_v57  ;;  %v2284_v17 = vld [vmem:[#allocation2 + $0x578] sm:$0x3f]  ;;  %v7249_v46 = vld [vmem:[#allocation127_spill] sm:$0xff] }
 0x1cc   : > { %v3182_v56 = vmul.f32 %v6205_v6, %v3150_v60  ;;  %v6214_v25 = vadd.f32 %v3179_v28, %v3118_v45  ;;  %v6216_v42 = vadd.f32 %v3180_v14, %v3119_v35  ;;  %v6218_v4 = vadd.f32 %v3181_v24, %v3120_v1  ;;  %v2458_v63 = vld [vmem:[#allocation2 + $0x208] sm:$0x3f]  ;;  %v7250_v45 = vld [vmem:[#allocation50_spill] sm:$0xff]  ;;  %v2634_v28 = vld [vmem:[#allocation2 + $0x438] sm:$0x3f] }
 0x1cd   : > { %v2254_v12 = vadd.f32 %v2226_v48, %v6177_v44  ;;  %v3036_v16 = vadd.f32 %v7249_v46, %v2947_v39  ;;  %v6222_v13 = vadd.f32 %v3183_v0, %v3122_v29  ;;  %v6224_v2 = vadd.f32 %v3185_v11, %v3124_v53  ;;  %v2721_v53 = vld [vmem:[#allocation2 + $0x548] sm:$0x3f]  ;;  %v7251_v11 = vld [vmem:[#allocation72_spill] sm:$0xff] }
 0x1ce   : > { %v3184_v57 = vmul.f32 %v6205_v6, %v3152_v38  ;;  %v6227_v23 = vadd.f32 %v3182_v56, %v3121_v32  ;;  %v6230_v35 = vadd.f32 %v7250_v45, %v3126_v54  ;;  %v3235_v1 = vsel %vm897_vm5, %v6216_v42, 0.0  ;;  %v3154_v32 = vld [vmem:[#allocation2 + $0x4f8] sm:$0x3f]  ;;  %v2547_v38 = vld [vmem:[#allocation2 + $0x328] sm:$0x3f] }
 0x1cf   : > { %v2664_v44 = vmul.f32 %v7199_v7, %v2632_v10  ;;  %v2516_v48 = vadd.f32 %v6135_v50, %v6115_v20  ;;  %v2577_v29 = vmul.f32 %v4956_v30, %v2545_v43  ;;  %v3236_v39 = vadd.f32 %v3235_v1, %v6214_v25  ;;  %v2460_v56 = vld [vmem:[#allocation2 + $0x218] sm:$0x3f] }
 0x1d0   : > { %v2840_v36 = vmul.f32 %v7167_v62, %v2808_v21  ;;  %v2256_v15 = vadd.f32 %v2228_v18, %v2168_v58  ;;  %v2316_v54 = vmul.f32 %v7205_v52, %v2284_v17  ;;  %v6241_v60 = vadd.f32 %v3184_v57, %v3123_v19  ;;  %v7252_v58 = vld [vmem:[#allocation116_spill] sm:$0xff]  ;;  %v7253_v52 = vld [vmem:[#allocation133_spill] sm:$0xff]  ;;  %v2897_v21 = vld [vmem:[#allocation2 + $0x1e8] sm:$0x3f] }
 0x1d1   : > { %v2429_v14 = vadd.f32 %v6158_v55, %v6145_v27  ;;  %v2490_v20 = vmul.f32 %v7192_v51, %v2458_v63  ;;  %v2342_v50 = vadd.f32 %v6190_v31, %v2254_v12  ;;  %v3237_v24 = vadd.f32 %v3236_v39, %v6218_v4  ;;  %v2810_v63 = vld [vmem:[#allocation2 + $0xd8] sm:$0x3f]  ;;  %v7254_v39 = vld [vmem:[#allocation96_spill] sm:$0xff] }
 0x1d2   : > { %v2403_v0 = vmul.f32 %v7113_v49, %v2371_v59  ;;  %v3038_v18 = vadd.f32 %v7252_v58, %v7251_v11  ;;  %v3125_v19 = vadd.f32 %v7253_v52, %v3036_v16  ;;  %v3238_v10 = vsel %vm897_vm5, %v6227_v23, 0.0  ;;  %v2723_v57 = vld [vmem:[#allocation2 + $0x558] sm:$0x3f]  ;;  %v2725_v52 = vld [vmem:[#allocation2 + $0x568] sm:$0x3f] }
 0x1d3   : > { %v2692_v43 = vadd.f32 %v2664_v44, %v6104_v37  ;;  %v2753_v27 = vmul.f32 %v7179_v61, %v2721_v53  ;;  %v2605_v55 = vadd.f32 %v2577_v29, %v2516_v48  ;;  %v3239_v31 = vadd.f32 %v3238_v10, %v3237_v24  ;;  %v2984_v44 = vld [vmem:[#allocation2 + $0x2f8] sm:$0x3f]  ;;  %v2636_v48 = vld [vmem:[#allocation2 + $0x448] sm:$0x3f] }
 0x1d4   : > { %v2666_v12 = vmul.f32 %v7199_v7, %v2634_v28  ;;  %v2344_v17 = vadd.f32 %v2316_v54, %v2256_v15  ;;  %v3186_v49 = vmul.f32 %v6205_v6, %v3154_v32  ;;  %v3241_v46 = vsel %vm897_vm5, %v6241_v60, 0.0  ;;  %v2549_v32 = vld [vmem:[#allocation2 + $0x338] sm:$0x3f] }
 0x1d5   : > { %v2955_v16 = vadd.f32 %v6029_v33, %v6026_v22  ;;  %v2518_v37 = vadd.f32 %v2490_v20, %v2429_v14  ;;  %v2579_v45 = vmul.f32 %v4956_v30, %v2547_v38  ;;  %v3240_v1 = vadd.f32 %v3239_v31, %v6222_v13  ;;  %v2986_v14 = vld [vmem:[#allocation2 + $0x308] sm:$0x3f]  ;;  %v2899_v11 = vld [vmem:[#allocation2 + $0x1f8] sm:$0x3f] }
 0x1d6   : > { %v2431_v29 = vadd.f32 %v2403_v0, %v2342_v50  ;;  %v2492_v59 = vmul.f32 %v7192_v51, %v2460_v56  ;;  %v3127_v53 = vadd.f32 %v7254_v39, %v3038_v18  ;;  %v6266_v15 = vadd.f32 %v3186_v49, %v3125_v19  ;;  %v7255_v50 = vld [vmem:[#allocation75_spill] sm:$0xff]  ;;  %v3073_v31 = vld [vmem:[#allocation2 + $0x418] sm:$0x3f] }
 0x1d7   : > { %v2868_v54 = vadd.f32 %v2840_v36, %v6096_v3  ;;  %v2929_v22 = vmul.f32 %v7194_v41, %v2897_v21  ;;  %v2781_v33 = vadd.f32 %v2753_v27, %v2692_v43  ;;  %v3242_v28 = vadd.f32 %v3241_v46, %v3240_v1  ;;  %v2812_v36 = vld [vmem:[#allocation2 + $0xe8] sm:$0x3f]  ;;  %v2988_v1 = vld [vmem:[#allocation2 + $0x318] sm:$0x3f] }
 0x1d8   : > { %v2842_v20 = vmul.f32 %v7167_v62, %v2810_v63  ;;  %v2694_v24 = vadd.f32 %v2666_v12, %v2605_v55  ;;  %v2755_v38 = vmul.f32 %v7179_v61, %v2723_v57  ;;  %v2433_v0 = vadd.f32 %v7255_v50, %v2344_v17  ;;  %v7256_v43 = vld [vmem:[#allocation19_spill] sm:$0xff]  ;;  %v2638_v17 = vld [vmem:[#allocation2 + $0x458] sm:$0x3f] }
 0x1d9   : > { %v3016_v51 = vmul.f32 %v7201_v34, %v2984_v44  ;;  %v2607_v58 = vadd.f32 %v2579_v45, %v2518_v37  ;;  %v2668_v18 = vmul.f32 %v7199_v7, %v2636_v48  ;;  %v3243_v3 = vadd.f32 %v3242_v28, %v6224_v2  ;;  %v3075_v46 = vld [vmem:[#allocation2 + $0x428] sm:$0x3f]  ;;  %v7257_v45 = vld [vmem:[#allocation88_spill] sm:$0xff] }
 0x1da   : > { %v2520_v19 = vadd.f32 %v2492_v59, %v2431_v29  ;;  %v2581_v10 = vmul.f32 %v4956_v30, %v2549_v32  ;;  %v6278_v27 = vadd.f32 %v7256_v43, %v3127_v53  ;;  %v3244_v55 = vsel %vm897_vm5, %v6266_v15, 0.0  ;;  %v2901_v39 = vld [vmem:[#allocation2 + $0x208] sm:$0x3f] }
 0x1db   : > { %v3044_v56 = vadd.f32 %v3016_v51, %v2955_v16  ;;  %v2957_v21 = vadd.f32 %v2929_v22, %v2868_v54  ;;  %v3018_v12 = vmul.f32 %v7201_v34, %v2986_v14  ;;  %v3245_v49 = vadd.f32 %v3244_v55, %v3243_v3  ;;  %v2729_v50 = vld [vmem:[#allocation2 + $0x588] sm:$0x3f]  ;;  %v3162_v51 = vld [vmem:[#allocation2 + $0x538] sm:$0x3f] }
 0x1dc   : > { %v2870_v63 = vadd.f32 %v2842_v20, %v2781_v33  ;;  %v2931_v57 = vmul.f32 %v7194_v41, %v2899_v11  ;;  %v2783_v37 = vadd.f32 %v2755_v38, %v2694_v24  ;;  %v2522_v30 = vadd.f32 %v7257_v45, %v2433_v0  ;;  %v7258_v33 = vld [vmem:[#allocation115_spill] sm:$0xff]  ;;  %v2814_v20 = vld [vmem:[#allocation2 + $0xf8] sm:$0x3f] }
 0x1dd   : > { %v2844_v44 = vmul.f32 %v7167_v62, %v2812_v36  ;;  %v2696_v48 = vadd.f32 %v2668_v18, %v2607_v58  ;;  %v2757_v29 = vmul.f32 %v7179_v61, %v2725_v52  ;;  %v3246_v16 = vadd.f32 %v3245_v49, %v6230_v35  ;;  %v2727_v24 = vld [vmem:[#allocation2 + $0x578] sm:$0x3f]  ;;  %v3164_v3 = vld [vmem:[#allocation2 + $0x548] sm:$0x3f] }
 0x1de   : > { %v3105_v59 = vmul.f32 %v7204_v9, %v3073_v31  ;;  %v2609_v53 = vadd.f32 %v2581_v10, %v2520_v19  ;;  %v2670_v54 = vmul.f32 %v7199_v7, %v2638_v17  ;;  %v3247_v22 = vsel %vm897_vm5, %v6278_v27, 0.0  ;;  %v7259_v7 = vld [vmem:[#allocation40_spill] sm:$0xff]  ;;  %v3077_v36 = vld [vmem:[#allocation2 + $0x438] sm:$0x3f]  ;;  %v7260_v10 = vld [vmem:[#allocation134_spill] sm:$0xff] }
 0x1df   : > { %v6294_v32 = vadd.f32 %v6022_v8, %v7258_v33  ;;  %v3046_v28 = vadd.f32 %v3018_v12, %v2957_v21  ;;  %v3107_v14 = vmul.f32 %v7204_v9, %v3075_v46  ;;  %v3248_v38 = vadd.f32 %v3247_v22, %v3246_v16  ;;  %v2990_v55 = vld [vmem:[#allocation2 + $0x328] sm:$0x3f]  ;;  %v7261_v12 = vld [vmem:[#allocation141_spill] sm:$0xff] }
 0x1e0   : > { %v3133_v0 = vadd.f32 %v3105_v59, %v3044_v56  ;;  %v2959_v11 = vadd.f32 %v2931_v57, %v2870_v63  ;;  %v3020_v58 = vmul.f32 %v7201_v34, %v2988_v1  ;;  %v2611_v18 = vadd.f32 %v7259_v7, %v2522_v30  ;;  %v2903_v57 = vld [vmem:[#allocation2 + $0x218] sm:$0x3f]  ;;  %v2905_v16 = vld [vmem:[#allocation2 + $0x228] sm:$0x3f] }
 0x1e1   : > { %v2872_v52 = vadd.f32 %v2844_v44, %v2783_v37  ;;  %v2933_v8 = vmul.f32 %v7194_v41, %v2901_v39  ;;  %v2785_v19 = vadd.f32 %v2757_v29, %v2696_v48  ;;  %v3249_v43 = vadd.f32 %v3248_v38, %v7260_v10  ;;  %v2818_v45 = vld [vmem:[#allocation2 + $0x118] sm:$0x3f]  ;;  %v7262_v48 = vld [vmem:[#allocation43_spill] sm:$0xff] }
 0x1e2   : > { %v2846_v31 = vmul.f32 %v7167_v62, %v2814_v20  ;;  %v2698_v21 = vadd.f32 %v2670_v54, %v2609_v53  ;;  %v2759_v56 = vmul.f32 %v7179_v61, %v2727_v24  ;;  %v3250_v17 = vsel %vm897_vm5, %v7261_v12, 0.0  ;;  %v3166_v22 = vld [vmem:[#allocation2 + $0x558] sm:$0x3f]  ;;  %v3079_v33 = vld [vmem:[#allocation2 + $0x448] sm:$0x3f] }
 0x1e3   : > { %v2761_v49 = vmul.f32 %v7179_v61, %v2729_v50  ;;  %v3194_v46 = vmul.f32 %v6205_v6, %v3162_v51  ;;  %v3135_v63 = vadd.f32 %v3107_v14, %v3046_v28  ;;  %v3251_v37 = vadd.f32 %v3250_v17, %v3249_v43  ;;  %v7263_v61 = vld [vmem:[#allocation44_spill] sm:$0xff]  ;;  %v2992_v50 = vld [vmem:[#allocation2 + $0x338] sm:$0x3f]  ;;  %v3168_v17 = vld [vmem:[#allocation2 + $0x568] sm:$0x3f] }
 0x1e4   : > { %v3196_v30 = vmul.f32 %v6205_v6, %v3164_v3  ;;  %v3048_v1 = vadd.f32 %v3020_v58, %v2959_v11  ;;  %v3109_v44 = vmul.f32 %v7204_v9, %v3077_v36  ;;  %v2700_v29 = vadd.f32 %v7262_v48, %v2611_v18  ;;  %v2907_v18 = vld [vmem:[#allocation2 + $0x238] sm:$0x3f]  ;;  %v2994_v3 = vld [vmem:[#allocation2 + $0x348] sm:$0x3f]  ;;  %v7266_v48 = vld [vmem:[#allocation90_spill] sm:$0xff] }
 0x1e5   : > { %v6310_v59 = vadd.f32 %v3194_v46, %v3133_v0  ;;  %v2961_v39 = vadd.f32 %v2933_v8, %v2872_v52  ;;  %v3022_v53 = vmul.f32 %v7201_v34, %v2990_v55  ;;  %v3252_v54 = vadd.f32 %v3251_v37, %v7263_v61  ;;  %v3081_v46 = vld [vmem:[#allocation2 + $0x458] sm:$0x3f] }
 0x1e6   : > { %v2874_v28 = vadd.f32 %v2846_v31, %v2785_v19  ;;  %v2935_v14 = vmul.f32 %v7194_v41, %v2903_v57  ;;  %v2787_v20 = vadd.f32 %v2759_v56, %v2698_v21  ;;  %v3253_v24 = vsel %vm897_vm5, %v6294_v32, 0.0  ;;  %v7264_v19 = vld [vmem:[#allocation25_spill] sm:$0xff]  ;;  %v7265_v21 = vld [vmem:[#allocation83_spill] sm:$0xff] }
 0x1e7   : > { %v2850_v38 = vmul.f32 %v7167_v62, %v2818_v45  ;;  %v3254_v51 = vadd.f32 %v3253_v24, %v3252_v54  ;;  %v2937_v0 = vmul.f32 %v7194_v41, %v2905_v16  ;;  %v6319_v11 = vadd.f32 %v3196_v30, %v3135_v63  ;;  %v2996_v45 = vld [vmem:[#allocation2 + $0x358] sm:$0x3f]  ;;  %v3083_v16 = vld [vmem:[#allocation2 + $0x468] sm:$0x3f] }
 0x1e8   : > { %v3137_v58 = vadd.f32 %v3109_v44, %v3048_v1  ;;  %v2789_v7 = vadd.f32 %v2761_v49, %v2700_v29  ;;  %v3198_v36 = vmul.f32 %v6205_v6, %v3166_v22  ;;  %v3050_v52 = vadd.f32 %v3022_v53, %v2961_v39 }
 0x1e9   : > { %v3111_v8 = vmul.f32 %v7204_v9, %v3079_v33  ;;  %v3255_v43 = vadd.f32 %v3254_v51, %v7264_v19  ;;  %v3256_v62 = vsel %vm897_vm5, %v6310_v59, 0.0  ;;  %v2963_v55 = vadd.f32 %v2935_v14, %v2874_v28 }
 0x1ea   : > { %v3024_v31 = vmul.f32 %v7201_v34, %v2992_v50  ;;  %v2876_v56 = vadd.f32 %v7265_v21, %v2787_v20  ;;  %v2939_v63 = vmul.f32 %v7194_v41, %v2907_v18  ;;  %v3026_v57 = vmul.f32 %v7201_v34, %v2994_v3  ;;  %v3170_v41 = vld [vmem:[#allocation2 + $0x578] sm:$0x3f] }
 0x1eb   : > { %v3257_v49 = vadd.f32 %v3256_v62, %v3255_v43  ;;  %v2878_v37 = vadd.f32 %v2850_v38, %v2789_v7  ;;  %v3259_v30 = vsel %vm897_vm5, %v6319_v11, 0.0  ;;  %v6332_v1 = vadd.f32 %v3198_v36, %v3137_v58  ;;  %v3085_v20 = vld [vmem:[#allocation2 + $0x478] sm:$0x3f] }
 0x1ec   : > { %v3139_v44 = vadd.f32 %v3111_v8, %v3050_v52  ;;  %v3200_v39 = vmul.f32 %v6205_v6, %v3168_v17  ;;  %v3052_v53 = vadd.f32 %v3024_v31, %v2963_v55  ;;  %v3113_v54 = vmul.f32 %v7204_v9, %v3081_v46  ;;  %v7267_v50 = vld [vmem:[#allocation109_spill] sm:$0xff] }
 0x1ed   : > { %v3258_v29 = vadd.f32 %v3257_v49, %v7266_v48  ;;  %v2965_v22 = vadd.f32 %v2937_v0, %v2876_v56  ;;  %v3028_v28 = vmul.f32 %v7201_v34, %v2996_v45  ;;  %v2967_v14 = vadd.f32 %v2939_v63, %v2878_v37  ;;  %v3172_v0 = vld [vmem:[#allocation2 + $0x588] sm:$0x3f]  ;;  %v3174_v8 = vld [vmem:[#allocation2 + $0x598] sm:$0x3f] }
 0x1ee   : > { %v3115_v24 = vmul.f32 %v7204_v9, %v3083_v16  ;;  %v3262_v38 = vsel %vm897_vm5, %v6332_v1, 0.0  ;;  %v6342_v58 = vadd.f32 %v3200_v39, %v3139_v44  ;;  %v3141_v7 = vadd.f32 %v3113_v54, %v3052_v53 }
 0x1ef   : > { %v3260_v33 = vadd.f32 %v3259_v30, %v3258_v29  ;;  %v3202_v18 = vmul.f32 %v6205_v6, %v3170_v41  ;;  %v3054_v3 = vadd.f32 %v3026_v57, %v2965_v22  ;;  %v3117_v52 = vmul.f32 %v7204_v9, %v3085_v20 }
 0x1f0   : > { %v3056_v34 = vadd.f32 %v3028_v28, %v2967_v14  ;;  %v3204_v62 = vmul.f32 %v6205_v6, %v3172_v0  ;;  %v3265_v55 = vsel %vm897_vm5, %v6342_v58, 0.0  ;;  %v3206_v17 = vmul.f32 %v6205_v6, %v3174_v8 }
 0x1f1   : > { %v3261_v51 = vadd.f32 %v3260_v33, %v7267_v50  ;;  %v6350_v31 = vadd.f32 %v3202_v18, %v3141_v7  ;;  %v3143_v21 = vadd.f32 %v3115_v24, %v3054_v3 }
 0x1f2   : > { %v3145_v46 = vadd.f32 %v3117_v52, %v3056_v34 }
 0x1f3   : > { %v3263_v36 = vadd.f32 %v3262_v38, %v3261_v51  ;;  %v3268_v9 = vsel %vm897_vm5, %v6350_v31, 0.0  ;;  %v6356_v63 = vadd.f32 %v3204_v62, %v3143_v21 }
 0x1f4   : > { %v6358_v37 = vadd.f32 %v3206_v17, %v3145_v46 }
 0x1f5   : > { %v3264_v43 = vadd.f32 %v3263_v36, %v6009_v5  ;;  %v3271_v30 = vsel %vm897_vm5, %v6356_v63, 0.0 }
 0x1f6   : > { %v3274_v6 = vsel %vm897_vm5, %v6358_v37, 0.0 }
 0x1f7   : > { %v3266_v56 = vadd.f32 %v3265_v55, %v3264_v43 }
 0x1f9   : > { %v3267_v49 = vadd.f32 %v3266_v56, %v6084_v47 }
 0x1fb   : > { %v3269_v57 = vadd.f32 %v3268_v9, %v3267_v49 }
 0x1fd   : > { %v3270_v45 = vadd.f32 %v3269_v57, %v6124_v26 }
 0x1ff   : > { %v3272_v44 = vadd.f32 %v3271_v30, %v3270_v45 }
 0x201   : > { %v3273_v29 = vadd.f32 %v3272_v44, %v6162_v40 }
 0x203   : > { %v3275_v16 = vadd.f32 %v3274_v6, %v3273_v29 }
 0x205   : > { %v3276_v39 = vrot.slane %v3275_v16, 4 }
 0x207   : > { %v3277_v53 = vadd.f32 %v3276_v39, %v3275_v16 }
 0x209   : > { %v3278_v54 = vrot.slane %v3277_v53, 2 }
 0x20b   : > { %v3279_v22 = vadd.f32 %v3278_v54, %v3277_v53 }
 0x20d   : > { %v3280_v41 = vrot.slane %v3279_v22, 1 }
 0x20f   : > { %v3281_v33 = vadd.f32 %v3280_v41, %v3279_v22 }
 0x211   : > { %v6366_v28 = vmul.f32 0.0051020407, %v3281_v33 }
 0x213   : > { %v3285_v14 = vsub.f32 %v6216_v42, %v6366_v28  ;;  %v3284_v20 = vsub.f32 %v6214_v25, %v6366_v28  ;;  %v3287_v24 = vsub.f32 %v6227_v23, %v6366_v28  ;;  %v3286_v51 = vsub.f32 %v6218_v4, %v6366_v28 }
 0x214   : > { %v3289_v18 = vsub.f32 %v6241_v60, %v6366_v28  ;;  %v3288_v36 = vsub.f32 %v6222_v13, %v6366_v28  ;;  %v3291_v43 = vsub.f32 %v6266_v15, %v6366_v28  ;;  %v3290_v21 = vsub.f32 %v6224_v2, %v6366_v28 }
 0x215   : > { %v3313_v38 = vmul.f32 %v3285_v14, %v3285_v14  ;;  %v3312_v7 = vmul.f32 %v3284_v20, %v3284_v20  ;;  %v3315_v3 = vmul.f32 %v3287_v24, %v3287_v24  ;;  %v3314_v52 = vmul.f32 %v3286_v51, %v3286_v51 }
 0x216   : > { %v3317_v62 = vmul.f32 %v3289_v18, %v3289_v18  ;;  %v3316_v56 = vmul.f32 %v3288_v36, %v3288_v36  ;;  %v3293_v49 = vsub.f32 %v6278_v27, %v6366_v28  ;;  %v3319_v9 = vmul.f32 %v3291_v43, %v3291_v43 }
 0x217   : > { %v3340_v0 = vsel %vm897_vm5, %v3313_v38, 0.0  ;;  %v3343_v55 = vsel %vm897_vm5, %v3315_v3, 0.0  ;;  %v3292_v45 = vsub.f32 %v6230_v35, %v6366_v28  ;;  %v3318_v30 = vmul.f32 %v3290_v21, %v3290_v21 }
 0x218   : > { %v3341_v34 = vadd.f32 %v3340_v0, %v3312_v7  ;;  %v3346_v57 = vsel %vm897_vm5, %v3317_v62, 0.0  ;;  %v3295_v29 = vsub.f32 %v7261_v12, %v6366_v28  ;;  %v3321_v16 = vmul.f32 %v3293_v49, %v3293_v49 }
 0x219   : > { %v3349_v39 = vsel %vm897_vm5, %v3319_v9, 0.0  ;;  %v3294_v53 = vsub.f32 %v7260_v10, %v6366_v28  ;;  %v3320_v54 = vmul.f32 %v3292_v45, %v3292_v45  ;;  %v3297_v33 = vsub.f32 %v6294_v32, %v6366_v28 }
 0x21a   : > { %v3342_v8 = vadd.f32 %v3341_v34, %v3314_v52  ;;  %v3323_v14 = vmul.f32 %v3295_v29, %v3295_v29  ;;  %v3352_v20 = vsel %vm897_vm5, %v3321_v16, 0.0  ;;  %v3296_v24 = vsub.f32 %v7263_v61, %v6366_v28 }
 0x21b   : > { %v3322_v38 = vmul.f32 %v3294_v53, %v3294_v53  ;;  %v3299_v18 = vsub.f32 %v6310_v59, %v6366_v28  ;;  %v3325_v3 = vmul.f32 %v3297_v33, %v3297_v33  ;;  %v3298_v36 = vsub.f32 %v7264_v19, %v6366_v28 }
 0x21c   : > { %v3344_v17 = vadd.f32 %v3343_v55, %v3342_v8  ;;  %v3355_v0 = vsel %vm897_vm5, %v3323_v14, 0.0  ;;  %v3324_v52 = vmul.f32 %v3296_v24, %v3296_v24  ;;  %v3301_v43 = vsub.f32 %v6319_v11, %v6366_v28 }
 0x21d   : > { %v3327_v62 = vmul.f32 %v3299_v18, %v3299_v18  ;;  %v3358_v55 = vsel %vm897_vm5, %v3325_v3, 0.0  ;;  %v3300_v21 = vsub.f32 %v7266_v48, %v6366_v28  ;;  %v3303_v49 = vsub.f32 %v6332_v1, %v6366_v28 }
 0x21e   : > { %v3345_v46 = vadd.f32 %v3344_v17, %v3316_v56  ;;  %v3326_v56 = vmul.f32 %v3298_v36, %v3298_v36  ;;  %v3329_v9 = vmul.f32 %v3301_v43, %v3301_v43  ;;  %v3302_v45 = vsub.f32 %v7267_v50, %v6366_v28 }
 0x21f   : > { %v3305_v29 = vsub.f32 %v6342_v58, %v6366_v28  ;;  %v3331_v16 = vmul.f32 %v3303_v49, %v3303_v49  ;;  %v3304_v53 = vsub.f32 %v6009_v5, %v6366_v28  ;;  %v3307_v33 = vsub.f32 %v6350_v31, %v6366_v28 }
 0x220   : > { %v3347_v44 = vadd.f32 %v3346_v57, %v3345_v46  ;;  %v3361_v57 = vsel %vm897_vm5, %v3327_v62, 0.0  ;;  %v3306_v24 = vsub.f32 %v6084_v47, %v6366_v28  ;;  %v3309_v18 = vsub.f32 %v6356_v63, %v6366_v28 }
 0x221   : > { %v3333_v14 = vmul.f32 %v3305_v29, %v3305_v29  ;;  %v3335_v3 = vmul.f32 %v3307_v33, %v3307_v33  ;;  %v3308_v36 = vsub.f32 %v6124_v26, %v6366_v28  ;;  %v3311_v43 = vsub.f32 %v6358_v37, %v6366_v28 }
 0x222   : > { %v3348_v6 = vadd.f32 %v3347_v44, %v3318_v30  ;;  %v3328_v30 = vmul.f32 %v3300_v21, %v3300_v21  ;;  %v3337_v62 = vmul.f32 %v3309_v18, %v3309_v18  ;;  %v3310_v21 = vsub.f32 %v6162_v40, %v6366_v28 }
 0x223   : > { %v3339_v49 = vmul.f32 %v3311_v43, %v3311_v43 }
 0x224   : > { %v3350_v22 = vadd.f32 %v3349_v39, %v3348_v6  ;;  %v3364_v39 = vsel %vm897_vm5, %v3329_v9, 0.0  ;;  %v3376_v9 = vsel %vm897_vm5, %v3337_v62, 0.0 }
 0x226   : > { %v3351_v41 = vadd.f32 %v3350_v22, %v3320_v54  ;;  %v3330_v54 = vmul.f32 %v3302_v45, %v3302_v45 }
 0x228   : > { %v3353_v51 = vadd.f32 %v3352_v20, %v3351_v41  ;;  %v3367_v20 = vsel %vm897_vm5, %v3331_v16, 0.0 }
 0x22a   : > { %v3354_v7 = vadd.f32 %v3353_v51, %v3322_v38  ;;  %v3332_v38 = vmul.f32 %v3304_v53, %v3304_v53 }
 0x22c   : > { %v3356_v34 = vadd.f32 %v3355_v0, %v3354_v7  ;;  %v3370_v0 = vsel %vm897_vm5, %v3333_v14, 0.0  ;;  %v3388_v14 = vld [vmem:[%s424_s26] sm:$0x1] }
 0x22e   : > { %v3357_v8 = vadd.f32 %v3356_v34, %v3324_v52  ;;  %v3334_v52 = vmul.f32 %v3306_v24, %v3306_v24 }
 0x230   : > { %v3359_v17 = vadd.f32 %v3358_v55, %v3357_v8  ;;  %v3373_v55 = vsel %vm897_vm5, %v3335_v3, 0.0 }
 0x232   : > { %v3360_v46 = vadd.f32 %v3359_v17, %v3326_v56  ;;  %v3336_v56 = vmul.f32 %v3308_v36, %v3308_v36 }
 0x234   : > { %v3362_v44 = vadd.f32 %v3361_v57, %v3360_v46  ;;  %v3338_v57 = vmul.f32 %v3310_v21, %v3310_v21 }
 0x236   : > { %v3363_v6 = vadd.f32 %v3362_v44, %v3328_v30  ;;  %v3379_v44 = vsel %vm897_vm5, %v3339_v49, 0.0 }
 0x238   : > { %v3365_v22 = vadd.f32 %v3364_v39, %v3363_v6 }
 0x23a   : > { %v3366_v41 = vadd.f32 %v3365_v22, %v3330_v54 }
 0x23c   : > { %v3368_v51 = vadd.f32 %v3367_v20, %v3366_v41 }
 0x23e   : > { %v3369_v7 = vadd.f32 %v3368_v51, %v3332_v38  ;;  %v3392_v38 = vld [vmem:[%s427_s29] sm:$0x1] }
 0x240   : > { %v3371_v34 = vadd.f32 %v3370_v0, %v3369_v7  ;;  %v7268_v7 = vld [vmem:[#allocation6_spill] sm:$0xff] }
 0x242   : > { %v3372_v8 = vadd.f32 %v3371_v34, %v3334_v52 }
 0x244   : > { %v3374_v17 = vadd.f32 %v3373_v55, %v3372_v8 }
 0x246   : > { %v3375_v46 = vadd.f32 %v3374_v17, %v3336_v56 }
 0x248   : > { %v3377_v45 = vadd.f32 %v3376_v9, %v3375_v46 }
 0x24a   : > { %v3378_v30 = vadd.f32 %v3377_v45, %v3338_v57 }
 0x24c   : > { %v3380_v6 = vadd.f32 %v3379_v44, %v3378_v30 }
 0x24e   : > { %v3381_v29 = vrot.slane %v3380_v6, 4 }
 0x250   : > { %v3382_v16 = vadd.f32 %v3381_v29, %v3380_v6 }
 0x252   : > { %v3383_v39 = vrot.slane %v3382_v16, 2 }
 0x254   : > { %v3384_v53 = vadd.f32 %v3383_v39, %v3382_v16 }
 0x256   : > { %v3385_v54 = vrot.slane %v3384_v53, 1 }
 0x258   : > { %v3386_v22 = vadd.f32 %v3385_v54, %v3384_v53 }
 0x25a   : > { %v3387_v41 = vmul.f32 0.0051020407, %v3386_v22 }
 0x25c   : > { %v3389_v33 = vadd.f32 1e-05, %v3387_v41 }
 0x25e   : > { %3772 = vrsqrt.f32 %v3389_v33 }
 0x268   : > { %v3773_v20 = vpop.eup %3772 }
 0x269   : > { %v3391_v24 = vmul.f32 %v3773_v20, %v3388_v14 }
 0x26b   : > { %v3393_v51 = vmul.f32 %v3391_v24, %v6366_v28  ;;  %v6448_v18 = vrot.slane %v3391_v24, %v7268_v7 }
 0x26d   : > { %v3394_v3 = vsub.f32 %v3392_v38, %v3393_v51  ;;  %v3401_v0 = vmul.f32 %v6448_v18, %v6214_v25  ;;  %v3402_v36 = vmul.f32 %v6448_v18, %v6216_v42  ;;  %v3403_v52 = vmul.f32 %v6448_v18, %v6218_v4 }
 0x26e   : > { %v3404_v34 = vmul.f32 %v6448_v18, %v6227_v23  ;;  %v3405_v8 = vmul.f32 %v6448_v18, %v6222_v13  ;;  %v3406_v28 = vmul.f32 %v6448_v18, %v6241_v60  ;;  %v3407_v43 = vmul.f32 %v6448_v18, %v6224_v2 }
 0x26f   : > { %v6465_v25 = vrot.slane %v3394_v3, %v7268_v7  ;;  %v3408_v42 = vmul.f32 %v6448_v18, %v6266_v15  ;;  %v3409_v4 = vmul.f32 %v6448_v18, %v6230_v35  ;;  %v3410_v23 = vmul.f32 %v6448_v18, %v6278_v27 }
 0x270   : > { %v3411_v13 = vmul.f32 %v6448_v18, %v7260_v10  ;;  %v3412_v60 = vmul.f32 %v6448_v18, %v7261_v12  ;;  %v3413_v2 = vmul.f32 %v6448_v18, %v7263_v61  ;;  %v3414_v62 = vmul.f32 %v6448_v18, %v6294_v32 }
 0x271   : > { %v3435_v15 = vadd.f32 %v6465_v25, %v3401_v0  ;;  %v3436_v55 = vadd.f32 %v6465_v25, %v3402_v36  ;;  %v3437_v35 = vadd.f32 %v6465_v25, %v3403_v52  ;;  %v3438_v27 = vadd.f32 %v6465_v25, %v3404_v34 }
 0x272   : > { %v3439_v21 = vadd.f32 %v6465_v25, %v3405_v8  ;;  %v3440_v10 = vadd.f32 %v6465_v25, %v3406_v28  ;;  %v3441_v12 = vadd.f32 %v6465_v25, %v3407_v43  ;;  %v3442_v56 = vadd.f32 %v6465_v25, %v3408_v42 }
 0x273   : > { %3463 = vst [vmem:[%s6490_s30] sm:$0xff] %v3435_v15  ;;  %3464 = vst [vmem:[%s6490_s30 + $0x8] sm:$0x3f] %v3436_v55  ;;  %v3443_v32 = vadd.f32 %v6465_v25, %v3409_v4  ;;  %v3444_v61 = vadd.f32 %v6465_v25, %v3410_v23  ;;  %v3445_v17 = vadd.f32 %v6465_v25, %v3411_v13 }
 0x274   : > { %3465 = vst [vmem:[%s6490_s30 + $0x10] sm:$0xff] %v3437_v35  ;;  %3466 = vst [vmem:[%s6490_s30 + $0x18] sm:$0x3f] %v3438_v27  ;;  %v3446_v46 = vadd.f32 %v6465_v25, %v3412_v60  ;;  %v3447_v49 = vadd.f32 %v6465_v25, %v3413_v2  ;;  %v3448_v9 = vadd.f32 %v6465_v25, %v3414_v62 }
 0x275   : > { %3467 = vst [vmem:[%s6490_s30 + $0x20] sm:$0xff] %v3439_v21  ;;  %3468 = vst [vmem:[%s6490_s30 + $0x28] sm:$0x3f] %v3440_v10  ;;  %v3415_v57 = vmul.f32 %v6448_v18, %v7264_v19  ;;  %v3416_v45 = vmul.f32 %v6448_v18, %v6310_v59  ;;  %v3417_v30 = vmul.f32 %v6448_v18, %v7266_v48 }
 0x276   : > { %3469 = vst [vmem:[%s6490_s30 + $0x30] sm:$0xff] %v3441_v12  ;;  %3470 = vst [vmem:[%s6490_s30 + $0x38] sm:$0x3f] %v3442_v56  ;;  %v3418_v44 = vmul.f32 %v6448_v18, %v6319_v11  ;;  %v3419_v6 = vmul.f32 %v6448_v18, %v7267_v50  ;;  %v3420_v19 = vmul.f32 %v6448_v18, %v6332_v1 }
 0x277   : > { %3471 = vst [vmem:[%s6490_s30 + $0x40] sm:$0xff] %v3443_v32  ;;  %3472 = vst [vmem:[%s6490_s30 + $0x48] sm:$0x3f] %v3444_v61  ;;  %v3449_v59 = vadd.f32 %v6465_v25, %v3415_v57  ;;  %v3450_v29 = vadd.f32 %v6465_v25, %v3416_v45  ;;  %v3421_v48 = vmul.f32 %v6448_v18, %v6009_v5 }
 0x278   : > { %3473 = vst [vmem:[%s6490_s30 + $0x50] sm:$0xff] %v3445_v17  ;;  %3474 = vst [vmem:[%s6490_s30 + $0x58] sm:$0x3f] %v3446_v46  ;;  %v3422_v11 = vmul.f32 %v6448_v18, %v6342_v58  ;;  %v3451_v50 = vadd.f32 %v6465_v25, %v3417_v30  ;;  %v3452_v1 = vadd.f32 %v6465_v25, %v3418_v44 }
 0x279   : > { %3475 = vst [vmem:[%s6490_s30 + $0x60] sm:$0xff] %v3447_v49  ;;  %3476 = vst [vmem:[%s6490_s30 + $0x68] sm:$0x3f] %v3448_v9  ;;  %v3453_v16 = vadd.f32 %v6465_v25, %v3419_v6  ;;  %v3454_v39 = vadd.f32 %v6465_v25, %v3420_v19  ;;  %v3455_v53 = vadd.f32 %v6465_v25, %v3421_v48 }
 0x27a   : > { %3477 = vst [vmem:[%s6490_s30 + $0x70] sm:$0xff] %v3449_v59  ;;  %3478 = vst [vmem:[%s6490_s30 + $0x78] sm:$0x3f] %v3450_v29  ;;  %v3456_v54 = vadd.f32 %v6465_v25, %v3422_v11  ;;  %v3423_v5 = vmul.f32 %v6448_v18, %v6084_v47  ;;  %v3424_v58 = vmul.f32 %v6448_v18, %v6350_v31  ;;  %3497 = sbr.rel (!%p3882_p5) target bundleno = 655 (0x28f), region = 116 }
 0x27b   : > { %3479 = vst [vmem:[%s6490_s30 + $0x80] sm:$0xff] %v3451_v50  ;;  %3480 = vst [vmem:[%s6490_s30 + $0x88] sm:$0x3f] %v3452_v1  ;;  %v3425_v22 = vmul.f32 %v6448_v18, %v6124_v26  ;;  %v3426_v41 = vmul.f32 %v6448_v18, %v6356_v63  ;;  %v3427_v47 = vmul.f32 %v6448_v18, %v6162_v40  ;;  %v3581_v40 = vld [vmem:[%s6490_s30] sm:$0xff] (%p3882_p5)  ;;  %v3585_v38 = vld [vmem:[%s6490_s30 + $0x10] sm:$0xff] (%p3882_p5) }
 0x27c   : > { %3481 = vst [vmem:[%s6490_s30 + $0x90] sm:$0xff] %v3453_v16  ;;  %3482 = vst [vmem:[%s6490_s30 + $0x98] sm:$0x3f] %v3454_v39  ;;  %v3428_v31 = vmul.f32 %v6448_v18, %v6358_v37  ;;  %v3457_v33 = vadd.f32 %v6465_v25, %v3423_v5  ;;  %v3458_v14 = vadd.f32 %v6465_v25, %v3424_v58  ;;  %v3583_v37 = vld [vmem:[%s6490_s30 + $0x8] sm:$0xff] (%p3882_p5)  ;;  %v3587_v51 = vld [vmem:[%s6490_s30 + $0x18] sm:$0xff] (%p3882_p5) }
 0x27d   : > { %3483 = vst [vmem:[%s6490_s30 + $0xa0] sm:$0xff] %v3455_v53  ;;  %3484 = vst [vmem:[%s6490_s30 + $0xa8] sm:$0x3f] %v3456_v54  ;;  %v3459_v20 = vadd.f32 %v6465_v25, %v3425_v22  ;;  %v3460_v26 = vadd.f32 %v6465_v25, %v3426_v41  ;;  %v3461_v24 = vadd.f32 %v6465_v25, %v3427_v47  ;;  %v3589_v7 = vld [vmem:[%s6490_s30 + $0x20] sm:$0xff] (%p3882_p5)  ;;  %v3591_v18 = vld [vmem:[%s6490_s30 + $0x28] sm:$0xff] (%p3882_p5) }
 0x27e   : > { %v3462_v63 = vadd.f32 %v6465_v25, %v3428_v31  ;;  %3485 = vst [vmem:[%s6490_s30 + $0xb0] sm:$0xff] %v3457_v33  ;;  %3486 = vst [vmem:[%s6490_s30 + $0xb8] sm:$0x3f] %v3458_v14  ;;  %v3593_v3 = vld [vmem:[%s6490_s30 + $0x30] sm:$0xff] (%p3882_p5)  ;;  %v3595_v0 = vld [vmem:[%s6490_s30 + $0x38] sm:$0xff] (%p3882_p5) }
 0x27f   : > { %3487 = vst [vmem:[%s6490_s30 + $0xc0] sm:$0xff] %v3459_v20  ;;  %3488 = vst [vmem:[%s6490_s30 + $0xc8] sm:$0x3f] %v3460_v26  ;;  %v3597_v36 = vld [vmem:[%s6490_s30 + $0x40] sm:$0xff] (%p3882_p5)  ;;  %v3599_v52 = vld [vmem:[%s6490_s30 + $0x48] sm:$0xff] (%p3882_p5) }
 0x280   : > { %3489 = vst [vmem:[%s6490_s30 + $0xd0] sm:$0xff] %v3461_v24  ;;  %3490 = vst [vmem:[%s6490_s30 + $0xd8] sm:$0x3f] %v3462_v63  ;;  %v3601_v34 = vld [vmem:[%s6490_s30 + $0x50] sm:$0xff] (%p3882_p5)  ;;  %v3603_v8 = vld [vmem:[%s6490_s30 + $0x58] sm:$0xff] (%p3882_p5) }
 0x281   : > { %3582 = vst [vmem:[%s6577_s8] sm:$0xff] %v3581_v40  ;;  %3584 = vst [vmem:[%s6577_s8 + $0x30] sm:$0xff] %v3583_v37  ;;  %v3605_v28 = vld [vmem:[%s6490_s30 + $0x60] sm:$0xff]  ;;  %v3607_v43 = vld [vmem:[%s6490_s30 + $0x68] sm:$0xff] }
 0x282   : > { %3586 = vst [vmem:[%s6577_s8 + $0x60] sm:$0xff] %v3585_v38  ;;  %3588 = vst [vmem:[%s6577_s8 + $0x90] sm:$0xff] %v3587_v51  ;;  %v3609_v25 = vld [vmem:[%s6490_s30 + $0x70] sm:$0xff]  ;;  %v3611_v42 = vld [vmem:[%s6490_s30 + $0x78] sm:$0xff] }
 0x283   : > { %3590 = vst [vmem:[%s6577_s8 + $0xc0] sm:$0xff] %v3589_v7  ;;  %3592 = vst [vmem:[%s6577_s8 + $0xf0] sm:$0xff] %v3591_v18  ;;  %v3613_v4 = vld [vmem:[%s6490_s30 + $0x80] sm:$0xff]  ;;  %v3615_v23 = vld [vmem:[%s6490_s30 + $0x88] sm:$0xff] }
 0x284   : > { %3594 = vst [vmem:[%s6577_s8 + $0x120] sm:$0xff] %v3593_v3  ;;  %3596 = vst [vmem:[%s6577_s8 + $0x150] sm:$0xff] %v3595_v0  ;;  %v3617_v13 = vld [vmem:[%s6490_s30 + $0x90] sm:$0xff]  ;;  %v3619_v60 = vld [vmem:[%s6490_s30 + $0x98] sm:$0xff] }
 0x285   : > { %3598 = vst [vmem:[%s6577_s8 + $0x180] sm:$0xff] %v3597_v36  ;;  %3600 = vst [vmem:[%s6577_s8 + $0x1b0] sm:$0xff] %v3599_v52  ;;  %v3621_v2 = vld [vmem:[%s6490_s30 + $0xa0] sm:$0xff]  ;;  %v3623_v62 = vld [vmem:[%s6490_s30 + $0xa8] sm:$0xff] }
 0x286   : > { %3602 = vst [vmem:[%s6577_s8 + $0x1e0] sm:$0xff] %v3601_v34  ;;  %3604 = vst [vmem:[%s6577_s8 + $0x210] sm:$0xff] %v3603_v8  ;;  %v3625_v15 = vld [vmem:[%s6490_s30 + $0xb0] sm:$0xff]  ;;  %v3627_v55 = vld [vmem:[%s6490_s30 + $0xb8] sm:$0xff] }
 0x287   : > { %3606 = vst [vmem:[%s6577_s8 + $0x240] sm:$0xff] %v3605_v28  ;;  %3608 = vst [vmem:[%s6577_s8 + $0x270] sm:$0xff] %v3607_v43  ;;  %v3629_v35 = vld [vmem:[%s6490_s30 + $0xc0] sm:$0xff]  ;;  %v3631_v27 = vld [vmem:[%s6490_s30 + $0xc8] sm:$0xff] }
 0x288   : > { %3610 = vst [vmem:[%s6577_s8 + $0x2a0] sm:$0xff] %v3609_v25  ;;  %3612 = vst [vmem:[%s6577_s8 + $0x2d0] sm:$0xff] %v3611_v42  ;;  %v3633_v21 = vld [vmem:[%s6490_s30 + $0xd0] sm:$0xff]  ;;  %v3635_v10 = vld [vmem:[%s6490_s30 + $0xd8] sm:$0xff] }
 0x289   : > { %3614 = vst [vmem:[%s6577_s8 + $0x300] sm:$0xff] %v3613_v4  ;;  %3616 = vst [vmem:[%s6577_s8 + $0x330] sm:$0xff] %v3615_v23 }
 0x28a   : > { %3618 = vst [vmem:[%s6577_s8 + $0x360] sm:$0xff] %v3617_v13  ;;  %3620 = vst [vmem:[%s6577_s8 + $0x390] sm:$0xff] %v3619_v60 }
 0x28b   : > { %3622 = vst [vmem:[%s6577_s8 + $0x3c0] sm:$0xff] %v3621_v2  ;;  %3624 = vst [vmem:[%s6577_s8 + $0x3f0] sm:$0xff] %v3623_v62 }
 0x28c   : > { %3626 = vst [vmem:[%s6577_s8 + $0x420] sm:$0xff] %v3625_v15  ;;  %3628 = vst [vmem:[%s6577_s8 + $0x450] sm:$0xff] %v3627_v55 }
 0x28d   : > { %3630 = vst [vmem:[%s6577_s8 + $0x480] sm:$0xff] %v3629_v35  ;;  %3632 = vst [vmem:[%s6577_s8 + $0x4b0] sm:$0xff] %v3631_v27 }
 0x28e   : > { %3634 = vst [vmem:[%s6577_s8 + $0x4e0] sm:$0xff] %v3633_v21  ;;  %3636 = vst [vmem:[%s6577_s8 + $0x510] sm:$0xff] %v3635_v10 }
 0x28f PF: > { %p11_p11 = scmp.ge.s32.totalorder %s3866_s19, 8   ;;  %s7269_s15 = smov %s3815_s16 }
 0x290   : > { %s7270_s16 = smov %s3876_s22  ;;  %s7271_s17 = smov %s3866_s19 }
 0x291   :  { %13 = sbr.rel (!%p11_p11) target bundleno = 2 (0x2), region = 224 }

</bundles_post_ra>
